<compile_context>
chip_gen: v7x
topology: tpu7x:2x2x1
jax: 0.10.0
libtpu: 0.0.40
codegen_flags: <defaults>
</compile_context>

<pallas_src>
import functools

import jax
import jax.numpy as jnp
import numpy as np
from jax.experimental import pallas as pl
from jax.experimental.pallas import tpu as pltpu


EMBED_SIZE = 32          # cfg.embed_size
IMG_FEAT_SIZE = 256      # cfg.img_feat_size -> num_layers = 3 (64 + 64 + 128 = 256)


# ----------------------------------------------------------------------------- #
# Pallas kernels
# ----------------------------------------------------------------------------- #
def _mm_kernel(a_ref, b_ref, s_ref, c_ref, o_ref, *, apply_relu):
    # bf16 x bf16 -> f32 on the MXU; scale/bias/ReLU epilogue in f32 (VPU).
    acc = jnp.dot(a_ref[...], b_ref[...], preferred_element_type=jnp.float32)
    acc = acc * s_ref[...] + c_ref[...]
    if apply_relu:
        acc = jnp.maximum(acc, 0.0)
    o_ref[...] = acc


def _mm_res_kernel(a_ref, b_ref, s_ref, c_ref, r_ref, o_ref, *, apply_relu):
    acc = jnp.dot(a_ref[...], b_ref[...], preferred_element_type=jnp.float32)
    acc = acc * s_ref[...] + c_ref[...] + r_ref[...]
    if apply_relu:
        acc = jnp.maximum(acc, 0.0)
    o_ref[...] = acc


def _conv3x3_from_ref(src_ref, w_ref, Ho, Wo):
    """3x3 stride-1 'valid' conv over a padded NHWC ref held in VMEM.

    src_ref: (B, Ho+2, Wo+2, Cin) f32
    w_ref:   (9, Cin, Cout) bf16  (tap-major, PyTorch weight order folded in)
    returns: (B*Ho*Wo, Cout) f32 accumulator
    """
    B = src_ref.shape[0]
    Cin = src_ref.shape[3]
    Cout = w_ref.shape[2]
    acc = jnp.zeros((B * Ho * Wo, Cout), jnp.float32)
    for i in range(3):
        for j in range(3):
            win = src_ref[:, i:i + Ho, j:j + Wo, :]              # (B,Ho,Wo,Cin)
            a = win.reshape(B * Ho * Wo, Cin).astype(jnp.bfloat16)
            acc = acc + jnp.dot(a, w_ref[i * 3 + j],
                                preferred_element_type=jnp.float32)
    return acc


def _basic_block_kernel(xpad_ref, w1_ref, s1_ref, b1_ref, w2_ref, s2_ref, b2_ref,
                        o_ref, pad_ref):
    """Whole ResNet BasicBlock (stride 1, no downsample) fused in one kernel.

    conv1 + BN + ReLU  ->  zero-padded VMEM scratch  ->  conv2 + BN + add + ReLU.
    Gridded over batch (one image per program).
    """
    B, Hp, Wp, C = xpad_ref.shape
    Ho, Wo = Hp - 2, Wp - 2

    # conv1 + bn1 + relu
    y1 = _conv3x3_from_ref(xpad_ref, w1_ref, Ho, Wo)
    y1 = jnp.maximum(y1 * s1_ref[...] + b1_ref[...], 0.0)

    # stage y1 zero-padded in VMEM for conv2 (no HBM round trip)
    pad_ref[...] = jnp.zeros(pad_ref.shape, pad_ref.dtype)
    pad_ref[:, 1:1 + Ho, 1:1 + Wo, :] = y1.reshape(B, Ho, Wo, C)

    # conv2 + bn2 + residual + relu
    y2 = _conv3x3_from_ref(pad_ref, w2_ref, Ho, Wo)
    identity = xpad_ref[:, 1:1 + Ho, 1:1 + Wo, :].reshape(B * Ho * Wo, C)
    o_ref[...] = jnp.maximum(y2 * s2_ref[...] + b2_ref[...] + identity, 0.0)


def _maxpool_kernel(p00_ref, p01_ref, p10_ref, p11_ref, o_ref):
    """3x3 / stride-2 / pad-1 max pool from 4 space-to-depth phases.

    Each phase is (1, Hph, Wph, C); every pooling tap is an offset (0/1) window
    of one of the phases, so no strided loads and no 9x data expansion.
    """
    Ho, Wo = o_ref.shape[1], o_ref.shape[2]
    refs = {(0, 0): p00_ref, (0, 1): p01_ref, (1, 0): p10_ref, (1, 1): p11_ref}
    sel = [(0, 0), (1, 0), (0, 1)]     # tap index -> (phase, offset)
    m = None
    for (pi, ai) in sel:
        for (pj, aj) in sel:
            v = refs[(pi, pj)][:, ai:ai + Ho, aj:aj + Wo, :]
            m = v if m is None else jnp.maximum(m, v)
    o_ref[...] = m


# ----------------------------------------------------------------------------- #
# Pallas wrappers
# ----------------------------------------------------------------------------- #
def _round_up(x, m):
    return (x + m - 1) // m * m


def pallas_matmul(a, b, scale, bias, *, relu=False, residual=None):
    """(M,K)@(K,N) with fused per-column scale/bias (+ optional residual, ReLU).

    Operands are cast to bf16 (MXU native), K is zero-padded to a multiple of
    128, and M is tiled with TM up to 256 so that M>=256 yields >=2 parallel
    grid programs (v7x megacore).
    """
    a = a.astype(jnp.float32)
    b = b.astype(jnp.float32)
    M, K = a.shape
    _, N = b.shape

    Kp = _round_up(K, 128)
    if Kp != K:
        a = jnp.pad(a, ((0, 0), (0, Kp - K)))
        b = jnp.pad(b, ((0, Kp - K), (0, 0)))

    Mp8 = _round_up(M, 8)
    TM = 256 if Mp8 >= 512 else (128 if Mp8 >= 256 else Mp8)
    Mp = _round_up(Mp8, TM)
    if Mp != M:
        a = jnp.pad(a, ((0, Mp - M), (0, 0)))
        if residual is not None:
            residual = jnp.pad(residual, ((0, Mp - M), (0, 0)))

    a = a.astype(jnp.bfloat16)
    b = b.astype(jnp.bfloat16)
    scale2 = scale.reshape(1, N).astype(jnp.float32)
    bias2 = bias.reshape(1, N).astype(jnp.float32)

    in_specs = [
        pl.BlockSpec((TM, Kp), lambda i: (i, 0)),
        pl.BlockSpec((Kp, N), lambda i: (0, 0)),
        pl.BlockSpec((1, N), lambda i: (0, 0)),
        pl.BlockSpec((1, N), lambda i: (0, 0)),
    ]
    args = [a, b, scale2, bias2]
    if residual is not None:
        in_specs.append(pl.BlockSpec((TM, N), lambda i: (i, 0)))
        args.append(residual.astype(jnp.float32))
        kernel = functools.partial(_mm_res_kernel, apply_relu=relu)
    else:
        kernel = functools.partial(_mm_kernel, apply_relu=relu)

    out = pl.pallas_call(
        kernel,
        out_shape=jax.ShapeDtypeStruct((Mp, N), jnp.float32),
        grid=(Mp // TM,),
        in_specs=in_specs,
        out_specs=pl.BlockSpec((TM, N), lambda i: (i, 0)),
        compiler_params=pltpu.CompilerParams(dimension_semantics=("parallel",)),
    )(*args)
    return out[:M]


def im2col_nhwc(x, kh, kw, stride, pad):
    """x: (B,H,W,C) NHWC -> (B*Ho*Wo, kh*kw*C) patches (tap-major, then channel)."""
    B, H, W, C = x.shape
    xp = jnp.pad(x, ((0, 0), (pad, pad), (pad, pad), (0, 0)))
    Ho = (H + 2 * pad - kh) // stride + 1
    Wo = (W + 2 * pad - kw) // stride + 1
    cols = []
    for i in range(kh):
        for j in range(kw):
            cols.append(xp[:, i:i + stride * Ho:stride, j:j + stride * Wo:stride, :])
    patches = jnp.stack(cols, axis=3)                     # (B,Ho,Wo,kh*kw,C)
    return patches.reshape(B * Ho * Wo, kh * kw * C), Ho, Wo


def conv2d_im2col(x, w, scale, bias, *, stride=1, pad=0, relu=False, residual=None):
    """NHWC conv via wrapper im2col + fused Pallas matmul (used only for the 7x7
    stem and the tiny stride-2 / 4x4 layer2 convs)."""
    B, H, W, C = x.shape
    Cout, Cin, kh, kw = w.shape
    A, Ho, Wo = im2col_nhwc(x, kh, kw, stride, pad)
    W2 = w.transpose(2, 3, 1, 0).reshape(kh * kw * Cin, Cout)
    res2 = None
    if residual is not None:
        res2 = residual.reshape(B * Ho * Wo, Cout)
    out = pallas_matmul(A, W2, scale, bias, relu=relu, residual=res2)
    return out.reshape(B, Ho, Wo, Cout)


def fused_basic_block(x, w1, bn1, w2, bn2):
    """Full ResNet BasicBlock (stride 1, no downsample) as ONE pallas_call."""
    B, H, W, C = x.shape
    Hp, Wp = H + 2, W + 2
    s1, b1 = _bn_fold(bn1)
    s2, b2 = _bn_fold(bn2)
    xpad = jnp.pad(x.astype(jnp.float32), ((0, 0), (1, 1), (1, 1), (0, 0)))
    w1r = w1.transpose(2, 3, 1, 0).reshape(9, C, C).astype(jnp.bfloat16)
    w2r = w2.transpose(2, 3, 1, 0).reshape(9, C, C).astype(jnp.bfloat16)
    s1 = s1.reshape(1, C).astype(jnp.float32)
    b1 = b1.reshape(1, C).astype(jnp.float32)
    s2 = s2.reshape(1, C).astype(jnp.float32)
    b2 = b2.reshape(1, C).astype(jnp.float32)

    out = pl.pallas_call(
        _basic_block_kernel,
        out_shape=jax.ShapeDtypeStruct((B * H * W, C), jnp.float32),
        grid=(B,),
        in_specs=[
            pl.BlockSpec((1, Hp, Wp, C), lambda b: (b, 0, 0, 0)),
            pl.BlockSpec((9, C, C), lambda b: (0, 0, 0)),
            pl.BlockSpec((1, C), lambda b: (0, 0)),
            pl.BlockSpec((1, C), lambda b: (0, 0)),
            pl.BlockSpec((9, C, C), lambda b: (0, 0, 0)),
            pl.BlockSpec((1, C), lambda b: (0, 0)),
            pl.BlockSpec((1, C), lambda b: (0, 0)),
        ],
        out_specs=pl.BlockSpec((H * W, C), lambda b: (b, 0)),
        scratch_shapes=[pltpu.VMEM((1, Hp, Wp, C), jnp.float32)],
        compiler_params=pltpu.CompilerParams(dimension_semantics=("parallel",)),
    )(xpad, w1r, s1, b1, w2r, s2, b2)
    return out.reshape(B, H, W, C)


def maxpool2d_3x3_s2_p1(x):
    """nn.MaxPool2d(3, stride=2, padding=1) on NHWC via 4-phase Pallas kernel."""
    B, H, W, C = x.shape
    Ho = (H + 2 - 3) // 2 + 1
    Wo = (W + 2 - 3) // 2 + 1
    xp = jnp.pad(x.astype(jnp.float32), ((0, 0), (1, 1), (1, 1), (0, 0)),
                 constant_values=-jnp.inf)
    phases = [xp[:, p::2, q::2, :] for p in (0, 1) for q in (0, 1)]
    Ph, Pw = phases[0].shape[1], phases[0].shape[2]
    out = pl.pallas_call(
        _maxpool_kernel,
        out_shape=jax.ShapeDtypeStruct((B, Ho, Wo, C), jnp.float32),
        grid=(B,),
        in_specs=[pl.BlockSpec((1, Ph, Pw, C), lambda b: (b, 0, 0, 0))] * 4,
        out_specs=pl.BlockSpec((1, Ho, Wo, C), lambda b: (b, 0, 0, 0)),
        compiler_params=pltpu.CompilerParams(dimension_semantics=("parallel",)),
    )(*phases)
    return out


def _interp_matrix(Lout, Lin):
    """1-D linear interpolation matrix, F.interpolate(bilinear, align_corners=True)."""
    if Lin == 1 or Lout == 1:
        src = np.zeros(Lout)
    else:
        src = np.arange(Lout) * (Lin - 1) / (Lout - 1)
    i0 = np.clip(np.floor(src).astype(np.int64), 0, Lin - 1)
    i1 = np.clip(i0 + 1, 0, Lin - 1)
    w = src - i0
    A = np.zeros((Lout, Lin), np.float32)
    A[np.arange(Lout), i0] += (1.0 - w)
    A[np.arange(Lout), i1] += w
    return A


def bilinear_upsample(x, Hout, Wout):
    """NHWC bilinear (align_corners=True) upsample as ONE lane-dense Pallas matmul
    using the Kronecker product of the two 1-D interpolation matrices."""
    B, Hin, Win, C = x.shape
    if (Hin, Win) == (Hout, Wout):
        return x                                  # identity upsample -> skip
    P = jnp.asarray(np.kron(_interp_matrix(Hout, Hin), _interp_matrix(Wout, Win)))
    Xr = x.transpose(1, 2, 0, 3).reshape(Hin * Win, B * C)    # K x (B*C), lane dense
    ones = jnp.ones((B * C,), jnp.float32)
    zeros = jnp.zeros((B * C,), jnp.float32)
    Y = pallas_matmul(P, Xr, ones, zeros)                      # (Hout*Wout, B*C)
    return Y.reshape(Hout, Wout, B, C).transpose(2, 0, 1, 3)


# ----------------------------------------------------------------------------- #
# SpatialEncoder (resnet18 backbone, num_layers=3) parameters & forward
# ----------------------------------------------------------------------------- #
def _bn_fold(bn, eps=1e-5):
    scale = bn["gamma"] / jnp.sqrt(bn["var"] + eps)
    bias = bn["beta"] - bn["mean"] * scale
    return scale, bias


def init_params(key):
    """Deterministic synthetic weights matching the ResNet18 layer shapes."""
    ks = iter(jax.random.split(key, 64))

    def conv_w(cout, cin, k):
        fan_in = cin * k * k
        return jax.random.normal(next(ks), (cout, cin, k, k), jnp.float32) / np.sqrt(fan_in)

    def bn_p(c):
        return dict(
            gamma=1.0 + 0.1 * jax.random.normal(next(ks), (c,), jnp.float32),
            beta=0.1 * jax.random.normal(next(ks), (c,), jnp.float32),
            mean=0.1 * jax.random.normal(next(ks), (c,), jnp.float32),
            var=0.5 + jax.random.uniform(next(ks), (c,), jnp.float32),
        )

    def basic_block(cin, cout, downsample):
        p = dict(conv1=conv_w(cout, cin, 3), bn1=bn_p(cout),
                 conv2=conv_w(cout, cout, 3), bn2=bn_p(cout))
        if downsample:
            p["down_w"] = conv_w(cout, cin, 1)
            p["down_bn"] = bn_p(cout)
        return p

    params = dict(
        conv1=conv_w(64, 3, 7), bn1=bn_p(64),
        l1b0=basic_block(64, 64, False), l1b1=basic_block(64, 64, False),
        l2b0=basic_block(64, 128, True), l2b1=basic_block(128, 128, False),
        red_w=conv_w(EMBED_SIZE, IMG_FEAT_SIZE, 1),
        red_b=0.1 * jax.random.normal(next(ks), (EMBED_SIZE,), jnp.float32),
    )
    return params


def spatial_encoder_forward(params, x_nchw):
    """Mirrors SpatialEncoder.forward (feature_scale=1.0, use_first_pool=True,
    index_interp='bilinear', upsample_interp='bilinear', num_layers=3).
    BatchNorm is evaluated in inference mode with the synthetic running stats."""
    p = params
    x = x_nchw.transpose(0, 2, 3, 1)                              # NCHW -> NHWC (once)

    s, b = _bn_fold(p["bn1"])
    x = conv2d_im2col(x, p["conv1"], s, b, stride=2, pad=3, relu=True)   # conv1+bn1+relu
    latents = [x]                                                 # (B,16,16,64)

    x = maxpool2d_3x3_s2_p1(x)                                    # model.maxpool -> 8x8
    # model.layer1: two fused BasicBlocks (single pallas_call each)
    x = fused_basic_block(x, p["l1b0"]["conv1"], p["l1b0"]["bn1"],
                          p["l1b0"]["conv2"], p["l1b0"]["bn2"])
    x = fused_basic_block(x, p["l1b1"]["conv1"], p["l1b1"]["bn1"],
                          p["l1b1"]["conv2"], p["l1b1"]["bn2"])
    latents.append(x)                                             # (B,8,8,64)

    # model.layer2 block0 (stride 2 + 1x1 downsample) -- tiny 4x4 maps, im2col path
    bp = p["l2b0"]
    s1, b1 = _bn_fold(bp["bn1"])
    s2, b2 = _bn_fold(bp["bn2"])
    sd, bd = _bn_fold(bp["down_bn"])
    y = conv2d_im2col(x, bp["conv1"], s1, b1, stride=2, pad=1, relu=True)
    identity = conv2d_im2col(x[:, ::2, ::2, :], bp["down_w"], sd, bd,
                             stride=1, pad=0, relu=False)
    x = conv2d_im2col(y, bp["conv2"], s2, b2, stride=1, pad=1, relu=True,
                      residual=identity)
    # model.layer2 block1
    bp = p["l2b1"]
    s1, b1 = _bn_fold(bp["bn1"])
    s2, b2 = _bn_fold(bp["bn2"])
    y = conv2d_im2col(x, bp["conv1"], s1, b1, stride=1, pad=1, relu=True)
    x = conv2d_im2col(y, bp["conv2"], s2, b2, stride=1, pad=1, relu=True, residual=x)
    latents.append(x)                                             # (B,4,4,128)

    # upsample latents to latents[0] size (align_corners=True); latents[0] is identity
    Hl, Wl = latents[0].shape[1], latents[0].shape[2]
    ups = [bilinear_upsample(l, Hl, Wl) for l in latents]
    pixel_nhwc = jnp.concatenate(ups, axis=-1)                    # (B,16,16,256)
    B = pixel_nhwc.shape[0]

    # reduction_layer: 1x1 conv == lane-dense (512,256)@(256,32) matmul
    # TODO(synk): Cout=32 output is lane-sparse on store; a transposed product would
    # fix it but costs an extra full-map transpose at this tiny size.
    red_w = p["red_w"].reshape(EMBED_SIZE, IMG_FEAT_SIZE)
    ones = jnp.ones((EMBED_SIZE,), jnp.float32)
    holder = pallas_matmul(pixel_nhwc.reshape(-1, IMG_FEAT_SIZE), red_w.T,
                           ones, p["red_b"], relu=False)
    holder_nhwc = holder.reshape(B, Hl, Wl, EMBED_SIZE)

    # back to NCHW (PyTorch convention) only at the graph boundary
    pixel_feat_map = pixel_nhwc.transpose(0, 3, 1, 2)
    holder_feat_map = holder_nhwc.transpose(0, 3, 1, 2)

    pixel_feat_scale = np.array([pixel_feat_map.shape[-1], pixel_feat_map.shape[-2]])
    pixel_feat_scale = pixel_feat_scale / (pixel_feat_scale - 1) * 2.0
    holder_feat_scale = np.array([holder_feat_map.shape[-1], holder_feat_map.shape[-2]])
    holder_feat_scale = holder_feat_scale / (holder_feat_scale - 1) * 2.0
    return holder_feat_map, holder_feat_scale, pixel_feat_map, pixel_feat_scale


# ----------------------------------------------------------------------------- #
if __name__ == "__main__":
    key = jax.random.PRNGKey(0)
    kp, kx = jax.random.split(key)
    params = init_params(kp)
    # Input image batch, NCHW (PyTorch convention): B=2, C=3 (RGB), 32x32 spatial.
    x = jax.random.normal(kx, (2, 3, 32, 32), jnp.float32)

    fwd = jax.jit(spatial_encoder_forward)
    holder_feat_map, holder_feat_scale, pixel_feat_map, pixel_feat_scale = fwd(params, x)

    jax.block_until_ready(holder_feat_map)
    jax.block_until_ready(pixel_feat_map)

    assert holder_feat_map.shape == (2, EMBED_SIZE, 16, 16), holder_feat_map.shape
    assert pixel_feat_map.shape == (2, IMG_FEAT_SIZE, 16, 16), pixel_feat_map.shape
    assert np.all(np.isfinite(np.asarray(holder_feat_map)))
    assert np.all(np.isfinite(np.asarray(pixel_feat_map)))
    assert np.allclose(np.asarray(pixel_feat_scale), np.array([16.0, 16.0]) / 15.0 * 2.0)
    assert np.allclose(np.asarray(holder_feat_scale), np.array([16.0, 16.0]) / 15.0 * 2.0)
    print("KERNEL_OK")
</pallas_src>

<mosaic_0001>
module attributes {stable_mosaic.version = 11 : i64} {
  func.func @_mm_kernel(%arg0: i32, %arg1: memref<256x256xbf16, #tpu.memory_space<vmem>>, %arg2: memref<256x64xbf16, #tpu.memory_space<vmem>>, %arg3: memref<1x64xf32, #tpu.memory_space<vmem>>, %arg4: memref<1x64xf32, #tpu.memory_space<vmem>>, %arg5: memref<256x64xf32, #tpu.memory_space<vmem>>) attributes {dimension_semantics = [#tpu.dimension_semantics<parallel>], iteration_bounds = array<i64: 2>, scalar_prefetch = 0 : i64, scratch_operands = 0 : i64, tpu.core_type = #tpu.core_type<tc>, window_params = [{transform_indices = @transform_0, window_bounds = array<i64: 256, 256>}, {pipeline_mode = #tpu.pipeline_mode<synchronous>, transform_indices = @transform_1, window_bounds = array<i64: 256, 64>}, {pipeline_mode = #tpu.pipeline_mode<synchronous>, transform_indices = @transform_2, window_bounds = array<i64: 1, 64>}, {pipeline_mode = #tpu.pipeline_mode<synchronous>, transform_indices = @transform_3, window_bounds = array<i64: 1, 64>}, {transform_indices = @transform_4, window_bounds = array<i64: 256, 64>}]} {
    %c0 = arith.constant 0 : index
    %c0_0 = arith.constant 0 : index
    %0 = vector.load %arg1[%c0, %c0_0] : memref<256x256xbf16, #tpu.memory_space<vmem>>, vector<256x256xbf16>
    %c0_1 = arith.constant 0 : index
    %c0_2 = arith.constant 0 : index
    %1 = vector.load %arg2[%c0_1, %c0_2] : memref<256x64xbf16, #tpu.memory_space<vmem>>, vector<256x64xbf16>
    %cst = arith.constant dense<0.000000e+00> : vector<256x64xf32>
    %2 = tpu.matmul %0, %1, %cst {dimension_numbers = #tpu.dot_dimension_numbers<[1], [0], [0], [1], [0, 0, 1, 1], [], []>} : vector<256x256xbf16>, vector<256x64xbf16>, vector<256x64xf32> -> vector<256x64xf32>
    %c0_3 = arith.constant 0 : index
    %c0_4 = arith.constant 0 : index
    %3 = vector.load %arg3[%c0_3, %c0_4] : memref<1x64xf32, #tpu.memory_space<vmem>>, vector<1x64xf32>
    %4 = vector.broadcast %3 : vector<1x64xf32> to vector<256x64xf32>
    %5 = arith.mulf %2, %4 : vector<256x64xf32>
    %c0_5 = arith.constant 0 : index
    %c0_6 = arith.constant 0 : index
    %6 = vector.load %arg4[%c0_5, %c0_6] : memref<1x64xf32, #tpu.memory_space<vmem>>, vector<1x64xf32>
    %7 = vector.broadcast %6 : vector<1x64xf32> to vector<256x64xf32>
    %8 = arith.addf %5, %7 : vector<256x64xf32>
    %cst_7 = arith.constant 0.000000e+00 : f32
    %9 = vector.broadcast %cst_7 : f32 to vector<256x64xf32>
    %10 = arith.maximumf %8, %9 : vector<256x64xf32>
    %c0_8 = arith.constant 0 : index
    %c0_9 = arith.constant 0 : index
    %11 = vector.load %arg5[%c0_8, %c0_9] : memref<256x64xf32, #tpu.memory_space<vmem>>, vector<256x64xf32>
    tpu.vector_store %arg5[%c0_8, %c0_9], %10 {strides = array<i32>} : memref<256x64xf32, #tpu.memory_space<vmem>>, vector<256x64xf32>,
    return
  }
  func.func @transform_0(%arg0: i32) -> (i32, i32) {
    %c0_i32 = arith.constant 0 : i32
    %c0_i32_0 = arith.constant 0 : i32
    return %arg0, %c0_i32 : i32, i32
  }
  func.func @transform_1(%arg0: i32) -> (i32, i32) {
    %c0_i32 = arith.constant 0 : i32
    %c0_i32_0 = arith.constant 0 : i32
    %c0_i32_1 = arith.constant 0 : i32
    return %c0_i32, %c0_i32_0 : i32, i32
  }
  func.func @transform_2(%arg0: i32) -> (i32, i32) {
    %c0_i32 = arith.constant 0 : i32
    %c0_i32_0 = arith.constant 0 : i32
    %c0_i32_1 = arith.constant 0 : i32
    return %c0_i32, %c0_i32_0 : i32, i32
  }
  func.func @transform_3(%arg0: i32) -> (i32, i32) {
    %c0_i32 = arith.constant 0 : i32
    %c0_i32_0 = arith.constant 0 : i32
    %c0_i32_1 = arith.constant 0 : i32
    return %c0_i32, %c0_i32_0 : i32, i32
  }
  func.func @transform_4(%arg0: i32) -> (i32, i32) {
    %c0_i32 = arith.constant 0 : i32
    %c0_i32_0 = arith.constant 0 : i32
    return %arg0, %c0_i32 : i32, i32
  }
}

module attributes {stable_mosaic.version = 11 : i64} {
  func.func @_maxpool_kernel(%arg0: i32, %arg1: memref<1x9x9x64xf32, #tpu.memory_space<vmem>>, %arg2: memref<1x9x9x64xf32, #tpu.memory_space<vmem>>, %arg3: memref<1x9x9x64xf32, #tpu.memory_space<vmem>>, %arg4: memref<1x9x9x64xf32, #tpu.memory_space<vmem>>, %arg5: memref<1x8x8x64xf32, #tpu.memory_space<vmem>>) attributes {dimension_semantics = [#tpu.dimension_semantics<parallel>], iteration_bounds = array<i64: 2>, scalar_prefetch = 0 : i64, scratch_operands = 0 : i64, tpu.core_type = #tpu.core_type<tc>, window_params = [{transform_indices = @transform_0, window_bounds = array<i64: 1, 9, 9, 64>}, {transform_indices = @transform_1, window_bounds = array<i64: 1, 9, 9, 64>}, {transform_indices = @transform_2, window_bounds = array<i64: 1, 9, 9, 64>}, {transform_indices = @transform_3, window_bounds = array<i64: 1, 9, 9, 64>}, {transform_indices = @transform_4, window_bounds = array<i64: 1, 8, 8, 64>}]} {
    %c0 = arith.constant 0 : index
    %c0_0 = arith.constant 0 : index
    %c0_1 = arith.constant 0 : index
    %c0_2 = arith.constant 0 : index
    %0 = vector.load %arg1[%c0, %c0_0, %c0_1, %c0_2] : memref<1x9x9x64xf32, #tpu.memory_space<vmem>>, vector<1x8x8x64xf32>
    %c0_3 = arith.constant 0 : index
    %c0_4 = arith.constant 0 : index
    %c0_5 = arith.constant 0 : index
    %c0_6 = arith.constant 0 : index
    %1 = vector.load %arg2[%c0_3, %c0_4, %c0_5, %c0_6] : memref<1x9x9x64xf32, #tpu.memory_space<vmem>>, vector<1x8x8x64xf32>
    %2 = arith.maximumf %0, %1 : vector<1x8x8x64xf32>
    %c0_7 = arith.constant 0 : index
    %c0_8 = arith.constant 0 : index
    %c1 = arith.constant 1 : index
    %c0_9 = arith.constant 0 : index
    %3 = vector.load %arg1[%c0_7, %c0_8, %c1, %c0_9] : memref<1x9x9x64xf32, #tpu.memory_space<vmem>>, vector<1x8x8x64xf32>
    %4 = arith.maximumf %2, %3 : vector<1x8x8x64xf32>
    %c0_10 = arith.constant 0 : index
    %c0_11 = arith.constant 0 : index
    %c0_12 = arith.constant 0 : index
    %c0_13 = arith.constant 0 : index
    %5 = vector.load %arg3[%c0_10, %c0_11, %c0_12, %c0_13] : memref<1x9x9x64xf32, #tpu.memory_space<vmem>>, vector<1x8x8x64xf32>
    %6 = arith.maximumf %4, %5 : vector<1x8x8x64xf32>
    %c0_14 = arith.constant 0 : index
    %c0_15 = arith.constant 0 : index
    %c0_16 = arith.constant 0 : index
    %c0_17 = arith.constant 0 : index
    %7 = vector.load %arg4[%c0_14, %c0_15, %c0_16, %c0_17] : memref<1x9x9x64xf32, #tpu.memory_space<vmem>>, vector<1x8x8x64xf32>
    %8 = arith.maximumf %6, %7 : vector<1x8x8x64xf32>
    %c0_18 = arith.constant 0 : index
    %c0_19 = arith.constant 0 : index
    %c1_20 = arith.constant 1 : index
    %c0_21 = arith.constant 0 : index
    %9 = vector.load %arg3[%c0_18, %c0_19, %c1_20, %c0_21] : memref<1x9x9x64xf32, #tpu.memory_space<vmem>>, vector<1x8x8x64xf32>
    %10 = arith.maximumf %8, %9 : vector<1x8x8x64xf32>
    %c0_22 = arith.constant 0 : index
    %c1_23 = arith.constant 1 : index
    %c0_24 = arith.constant 0 : index
    %c0_25 = arith.constant 0 : index
    %11 = vector.load %arg1[%c0_22, %c1_23, %c0_24, %c0_25] : memref<1x9x9x64xf32, #tpu.memory_space<vmem>>, vector<1x8x8x64xf32>
    %12 = arith.maximumf %10, %11 : vector<1x8x8x64xf32>
    %c0_26 = arith.constant 0 : index
    %c1_27 = arith.constant 1 : index
    %c0_28 = arith.constant 0 : index
    %c0_29 = arith.constant 0 : index
    %13 = vector.load %arg2[%c0_26, %c1_27, %c0_28, %c0_29] : memref<1x9x9x64xf32, #tpu.memory_space<vmem>>, vector<1x8x8x64xf32>
    %14 = arith.maximumf %12, %13 : vector<1x8x8x64xf32>
    %c0_30 = arith.constant 0 : index
    %c1_31 = arith.constant 1 : index
    %c1_32 = arith.constant 1 : index
    %c0_33 = arith.constant 0 : index
    %15 = vector.load %arg1[%c0_30, %c1_31, %c1_32, %c0_33] : memref<1x9x9x64xf32, #tpu.memory_space<vmem>>, vector<1x8x8x64xf32>
    %16 = arith.maximumf %14, %15 : vector<1x8x8x64xf32>
    %c0_34 = arith.constant 0 : index
    %c0_35 = arith.constant 0 : index
    %c0_36 = arith.constant 0 : index
    %c0_37 = arith.constant 0 : index
    %17 = vector.load %arg5[%c0_34, %c0_35, %c0_36, %c0_37] : memref<1x8x8x64xf32, #tpu.memory_space<vmem>>, vector<1x8x8x64xf32>
    tpu.vector_store %arg5[%c0_34, %c0_35, %c0_36, %c0_37], %16 {strides = array<i32>} : memref<1x8x8x64xf32, #tpu.memory_space<vmem>>, vector<1x8x8x64xf32>,
    return
  }
  func.func @transform_0(%arg0: i32) -> (i32, i32, i32, i32) {
    %c0_i32 = arith.constant 0 : i32
    %c0_i32_0 = arith.constant 0 : i32
    %c0_i32_1 = arith.constant 0 : i32
    %c0_i32_2 = arith.constant 0 : i32
    return %arg0, %c0_i32, %c0_i32_0, %c0_i32_1 : i32, i32, i32, i32
  }
  func.func @transform_1(%arg0: i32) -> (i32, i32, i32, i32) {
    %c0_i32 = arith.constant 0 : i32
    %c0_i32_0 = arith.constant 0 : i32
    %c0_i32_1 = arith.constant 0 : i32
    %c0_i32_2 = arith.constant 0 : i32
    return %arg0, %c0_i32, %c0_i32_0, %c0_i32_1 : i32, i32, i32, i32
  }
  func.func @transform_2(%arg0: i32) -> (i32, i32, i32, i32) {
    %c0_i32 = arith.constant 0 : i32
    %c0_i32_0 = arith.constant 0 : i32
    %c0_i32_1 = arith.constant 0 : i32
    %c0_i32_2 = arith.constant 0 : i32
    return %arg0, %c0_i32, %c0_i32_0, %c0_i32_1 : i32, i32, i32, i32
  }
  func.func @transform_3(%arg0: i32) -> (i32, i32, i32, i32) {
    %c0_i32 = arith.constant 0 : i32
    %c0_i32_0 = arith.constant 0 : i32
    %c0_i32_1 = arith.constant 0 : i32
    %c0_i32_2 = arith.constant 0 : i32
    return %arg0, %c0_i32, %c0_i32_0, %c0_i32_1 : i32, i32, i32, i32
  }
  func.func @transform_4(%arg0: i32) -> (i32, i32, i32, i32) {
    %c0_i32 = arith.constant 0 : i32
    %c0_i32_0 = arith.constant 0 : i32
    %c0_i32_1 = arith.constant 0 : i32
    %c0_i32_2 = arith.constant 0 : i32
    return %arg0, %c0_i32, %c0_i32_0, %c0_i32_1 : i32, i32, i32, i32
  }
}

module attributes {stable_mosaic.version = 11 : i64} {
  func.func @_basic_block_kernel(%arg0: i32, %arg1: memref<1x10x10x64xf32, #tpu.memory_space<vmem>>, %arg2: memref<9x64x64xbf16, #tpu.memory_space<vmem>>, %arg3: memref<1x64xf32, #tpu.memory_space<vmem>>, %arg4: memref<1x64xf32, #tpu.memory_space<vmem>>, %arg5: memref<9x64x64xbf16, #tpu.memory_space<vmem>>, %arg6: memref<1x64xf32, #tpu.memory_space<vmem>>, %arg7: memref<1x64xf32, #tpu.memory_space<vmem>>, %arg8: memref<64x64xf32, #tpu.memory_space<vmem>>, %arg9: memref<1x10x10x64xf32, #tpu.memory_space<vmem>>) attributes {dimension_semantics = [#tpu.dimension_semantics<parallel>], iteration_bounds = array<i64: 2>, scalar_prefetch = 0 : i64, scratch_operands = 1 : i64, tpu.core_type = #tpu.core_type<tc>, window_params = [{transform_indices = @transform_0, window_bounds = array<i64: 1, 10, 10, 64>}, {pipeline_mode = #tpu.pipeline_mode<synchronous>, transform_indices = @transform_1, window_bounds = array<i64: 9, 64, 64>}, {pipeline_mode = #tpu.pipeline_mode<synchronous>, transform_indices = @transform_2, window_bounds = array<i64: 1, 64>}, {pipeline_mode = #tpu.pipeline_mode<synchronous>, transform_indices = @transform_3, window_bounds = array<i64: 1, 64>}, {pipeline_mode = #tpu.pipeline_mode<synchronous>, transform_indices = @transform_4, window_bounds = array<i64: 9, 64, 64>}, {pipeline_mode = #tpu.pipeline_mode<synchronous>, transform_indices = @transform_5, window_bounds = array<i64: 1, 64>}, {pipeline_mode = #tpu.pipeline_mode<synchronous>, transform_indices = @transform_6, window_bounds = array<i64: 1, 64>}, {transform_indices = @transform_7, window_bounds = array<i64: 64, 64>}]} {
    %cst = arith.constant 0.000000e+00 : f32
    %0 = vector.broadcast %cst : f32 to vector<64x64xf32>
    %c0 = arith.constant 0 : index
    %c0_0 = arith.constant 0 : index
    %c0_1 = arith.constant 0 : index
    %c0_2 = arith.constant 0 : index
    %1 = vector.load %arg1[%c0, %c0_0, %c0_1, %c0_2] : memref<1x10x10x64xf32, #tpu.memory_space<vmem>>, vector<1x8x8x64xf32>
    %2 = vector.shape_cast %1 : vector<1x8x8x64xf32> to vector<64x64xf32>
    %3 = arith.truncf %2 : vector<64x64xf32> to vector<64x64xbf16>
    %c0_3 = arith.constant 0 : index
    %c0_4 = arith.constant 0 : index
    %c0_5 = arith.constant 0 : index
    %4 = vector.load %arg2[%c0_3, %c0_4, %c0_5] : memref<9x64x64xbf16, #tpu.memory_space<vmem>>, vector<1x64x64xbf16>
    %5 = vector.shape_cast %4 : vector<1x64x64xbf16> to vector<64x64xbf16>
    %cst_6 = arith.constant dense<0.000000e+00> : vector<64x64xf32>
    %6 = tpu.matmul %3, %5, %cst_6 {dimension_numbers = #tpu.dot_dimension_numbers<[1], [0], [0], [1], [0, 0, 1, 1], [], []>} : vector<64x64xbf16>, vector<64x64xbf16>, vector<64x64xf32> -> vector<64x64xf32>
    %7 = arith.addf %0, %6 : vector<64x64xf32>
    %c0_7 = arith.constant 0 : index
    %c0_8 = arith.constant 0 : index
    %c1 = arith.constant 1 : index
    %c0_9 = arith.constant 0 : index
    %8 = vector.load %arg1[%c0_7, %c0_8, %c1, %c0_9] : memref<1x10x10x64xf32, #tpu.memory_space<vmem>>, vector<1x8x8x64xf32>
    %9 = vector.shape_cast %8 : vector<1x8x8x64xf32> to vector<64x64xf32>
    %10 = arith.truncf %9 : vector<64x64xf32> to vector<64x64xbf16>
    %c1_10 = arith.constant 1 : index
    %c0_11 = arith.constant 0 : index
    %c0_12 = arith.constant 0 : index
    %11 = vector.load %arg2[%c1_10, %c0_11, %c0_12] : memref<9x64x64xbf16, #tpu.memory_space<vmem>>, vector<1x64x64xbf16>
    %12 = vector.shape_cast %11 : vector<1x64x64xbf16> to vector<64x64xbf16>
    %cst_13 = arith.constant dense<0.000000e+00> : vector<64x64xf32>
    %13 = tpu.matmul %10, %12, %cst_13 {dimension_numbers = #tpu.dot_dimension_numbers<[1], [0], [0], [1], [0, 0, 1, 1], [], []>} : vector<64x64xbf16>, vector<64x64xbf16>, vector<64x64xf32> -> vector<64x64xf32>
    %14 = arith.addf %7, %13 : vector<64x64xf32>
    %c0_14 = arith.constant 0 : index
    %c0_15 = arith.constant 0 : index
    %c2 = arith.constant 2 : index
    %c0_16 = arith.constant 0 : index
    %15 = vector.load %arg1[%c0_14, %c0_15, %c2, %c0_16] : memref<1x10x10x64xf32, #tpu.memory_space<vmem>>, vector<1x8x8x64xf32>
    %16 = vector.shape_cast %15 : vector<1x8x8x64xf32> to vector<64x64xf32>
    %17 = arith.truncf %16 : vector<64x64xf32> to vector<64x64xbf16>
    %c2_17 = arith.constant 2 : index
    %c0_18 = arith.constant 0 : index
    %c0_19 = arith.constant 0 : index
    %18 = vector.load %arg2[%c2_17, %c0_18, %c0_19] : memref<9x64x64xbf16, #tpu.memory_space<vmem>>, vector<1x64x64xbf16>
    %19 = vector.shape_cast %18 : vector<1x64x64xbf16> to vector<64x64xbf16>
    %cst_20 = arith.constant dense<0.000000e+00> : vector<64x64xf32>
    %20 = tpu.matmul %17, %19, %cst_20 {dimension_numbers = #tpu.dot_dimension_numbers<[1], [0], [0], [1], [0, 0, 1, 1], [], []>} : vector<64x64xbf16>, vector<64x64xbf16>, vector<64x64xf32> -> vector<64x64xf32>
    %21 = arith.addf %14, %20 : vector<64x64xf32>
    %c0_21 = arith.constant 0 : index
    %c1_22 = arith.constant 1 : index
    %c0_23 = arith.constant 0 : index
    %c0_24 = arith.constant 0 : index
    %22 = vector.load %arg1[%c0_21, %c1_22, %c0_23, %c0_24] : memref<1x10x10x64xf32, #tpu.memory_space<vmem>>, vector<1x8x8x64xf32>
    %23 = vector.shape_cast %22 : vector<1x8x8x64xf32> to vector<64x64xf32>
    %24 = arith.truncf %23 : vector<64x64xf32> to vector<64x64xbf16>
    %c3 = arith.constant 3 : index
    %c0_25 = arith.constant 0 : index
    %c0_26 = arith.constant 0 : index
    %25 = vector.load %arg2[%c3, %c0_25, %c0_26] : memref<9x64x64xbf16, #tpu.memory_space<vmem>>, vector<1x64x64xbf16>
    %26 = vector.shape_cast %25 : vector<1x64x64xbf16> to vector<64x64xbf16>
    %cst_27 = arith.constant dense<0.000000e+00> : vector<64x64xf32>
    %27 = tpu.matmul %24, %26, %cst_27 {dimension_numbers = #tpu.dot_dimension_numbers<[1], [0], [0], [1], [0, 0, 1, 1], [], []>} : vector<64x64xbf16>, vector<64x64xbf16>, vector<64x64xf32> -> vector<64x64xf32>
    %28 = arith.addf %21, %27 : vector<64x64xf32>
    %c0_28 = arith.constant 0 : index
    %c1_29 = arith.constant 1 : index
    %c1_30 = arith.constant 1 : index
    %c0_31 = arith.constant 0 : index
    %29 = vector.load %arg1[%c0_28, %c1_29, %c1_30, %c0_31] : memref<1x10x10x64xf32, #tpu.memory_space<vmem>>, vector<1x8x8x64xf32>
    %30 = vector.shape_cast %29 : vector<1x8x8x64xf32> to vector<64x64xf32>
    %31 = arith.truncf %30 : vector<64x64xf32> to vector<64x64xbf16>
    %c4 = arith.constant 4 : index
    %c0_32 = arith.constant 0 : index
    %c0_33 = arith.constant 0 : index
    %32 = vector.load %arg2[%c4, %c0_32, %c0_33] : memref<9x64x64xbf16, #tpu.memory_space<vmem>>, vector<1x64x64xbf16>
    %33 = vector.shape_cast %32 : vector<1x64x64xbf16> to vector<64x64xbf16>
    %cst_34 = arith.constant dense<0.000000e+00> : vector<64x64xf32>
    %34 = tpu.matmul %31, %33, %cst_34 {dimension_numbers = #tpu.dot_dimension_numbers<[1], [0], [0], [1], [0, 0, 1, 1], [], []>} : vector<64x64xbf16>, vector<64x64xbf16>, vector<64x64xf32> -> vector<64x64xf32>
    %35 = arith.addf %28, %34 : vector<64x64xf32>
    %c0_35 = arith.constant 0 : index
    %c1_36 = arith.constant 1 : index
    %c2_37 = arith.constant 2 : index
    %c0_38 = arith.constant 0 : index
    %36 = vector.load %arg1[%c0_35, %c1_36, %c2_37, %c0_38] : memref<1x10x10x64xf32, #tpu.memory_space<vmem>>, vector<1x8x8x64xf32>
    %37 = vector.shape_cast %36 : vector<1x8x8x64xf32> to vector<64x64xf32>
    %38 = arith.truncf %37 : vector<64x64xf32> to vector<64x64xbf16>
    %c5 = arith.constant 5 : index
    %c0_39 = arith.constant 0 : index
    %c0_40 = arith.constant 0 : index
    %39 = vector.load %arg2[%c5, %c0_39, %c0_40] : memref<9x64x64xbf16, #tpu.memory_space<vmem>>, vector<1x64x64xbf16>
    %40 = vector.shape_cast %39 : vector<1x64x64xbf16> to vector<64x64xbf16>
    %cst_41 = arith.constant dense<0.000000e+00> : vector<64x64xf32>
    %41 = tpu.matmul %38, %40, %cst_41 {dimension_numbers = #tpu.dot_dimension_numbers<[1], [0], [0], [1], [0, 0, 1, 1], [], []>} : vector<64x64xbf16>, vector<64x64xbf16>, vector<64x64xf32> -> vector<64x64xf32>
    %42 = arith.addf %35, %41 : vector<64x64xf32>
    %c0_42 = arith.constant 0 : index
    %c2_43 = arith.constant 2 : index
    %c0_44 = arith.constant 0 : index
    %c0_45 = arith.constant 0 : index
    %43 = vector.load %arg1[%c0_42, %c2_43, %c0_44, %c0_45] : memref<1x10x10x64xf32, #tpu.memory_space<vmem>>, vector<1x8x8x64xf32>
    %44 = vector.shape_cast %43 : vector<1x8x8x64xf32> to vector<64x64xf32>
    %45 = arith.truncf %44 : vector<64x64xf32> to vector<64x64xbf16>
    %c6 = arith.constant 6 : index
    %c0_46 = arith.constant 0 : index
    %c0_47 = arith.constant 0 : index
    %46 = vector.load %arg2[%c6, %c0_46, %c0_47] : memref<9x64x64xbf16, #tpu.memory_space<vmem>>, vector<1x64x64xbf16>
    %47 = vector.shape_cast %46 : vector<1x64x64xbf16> to vector<64x64xbf16>
    %cst_48 = arith.constant dense<0.000000e+00> : vector<64x64xf32>
    %48 = tpu.matmul %45, %47, %cst_48 {dimension_numbers = #tpu.dot_dimension_numbers<[1], [0], [0], [1], [0, 0, 1, 1], [], []>} : vector<64x64xbf16>, vector<64x64xbf16>, vector<64x64xf32> -> vector<64x64xf32>
    %49 = arith.addf %42, %48 : vector<64x64xf32>
    %c0_49 = arith.constant 0 : index
    %c2_50 = arith.constant 2 : index
    %c1_51 = arith.constant 1 : index
    %c0_52 = arith.constant 0 : index
    %50 = vector.load %arg1[%c0_49, %c2_50, %c1_51, %c0_52] : memref<1x10x10x64xf32, #tpu.memory_space<vmem>>, vector<1x8x8x64xf32>
    %51 = vector.shape_cast %50 : vector<1x8x8x64xf32> to vector<64x64xf32>
    %52 = arith.truncf %51 : vector<64x64xf32> to vector<64x64xbf16>
    %c7 = arith.constant 7 : index
    %c0_53 = arith.constant 0 : index
    %c0_54 = arith.constant 0 : index
    %53 = vector.load %arg2[%c7, %c0_53, %c0_54] : memref<9x64x64xbf16, #tpu.memory_space<vmem>>, vector<1x64x64xbf16>
    %54 = vector.shape_cast %53 : vector<1x64x64xbf16> to vector<64x64xbf16>
    %cst_55 = arith.constant dense<0.000000e+00> : vector<64x64xf32>
    %55 = tpu.matmul %52, %54, %cst_55 {dimension_numbers = #tpu.dot_dimension_numbers<[1], [0], [0], [1], [0, 0, 1, 1], [], []>} : vector<64x64xbf16>, vector<64x64xbf16>, vector<64x64xf32> -> vector<64x64xf32>
    %56 = arith.addf %49, %55 : vector<64x64xf32>
    %c0_56 = arith.constant 0 : index
    %c2_57 = arith.constant 2 : index
    %c2_58 = arith.constant 2 : index
    %c0_59 = arith.constant 0 : index
    %57 = vector.load %arg1[%c0_56, %c2_57, %c2_58, %c0_59] : memref<1x10x10x64xf32, #tpu.memory_space<vmem>>, vector<1x8x8x64xf32>
    %58 = vector.shape_cast %57 : vector<1x8x8x64xf32> to vector<64x64xf32>
    %59 = arith.truncf %58 : vector<64x64xf32> to vector<64x64xbf16>
    %c8 = arith.constant 8 : index
    %c0_60 = arith.constant 0 : index
    %c0_61 = arith.constant 0 : index
    %60 = vector.load %arg2[%c8, %c0_60, %c0_61] : memref<9x64x64xbf16, #tpu.memory_space<vmem>>, vector<1x64x64xbf16>
    %61 = vector.shape_cast %60 : vector<1x64x64xbf16> to vector<64x64xbf16>
    %cst_62 = arith.constant dense<0.000000e+00> : vector<64x64xf32>
    %62 = tpu.matmul %59, %61, %cst_62 {dimension_numbers = #tpu.dot_dimension_numbers<[1], [0], [0], [1], [0, 0, 1, 1], [], []>} : vector<64x64xbf16>, vector<64x64xbf16>, vector<64x64xf32> -> vector<64x64xf32>
    %63 = arith.addf %56, %62 : vector<64x64xf32>
    %c0_63 = arith.constant 0 : index
    %c0_64 = arith.constant 0 : index
    %64 = vector.load %arg3[%c0_63, %c0_64] : memref<1x64xf32, #tpu.memory_space<vmem>>, vector<1x64xf32>
    %65 = vector.broadcast %64 : vector<1x64xf32> to vector<64x64xf32>
    %66 = arith.mulf %63, %65 : vector<64x64xf32>
    %c0_65 = arith.constant 0 : index
    %c0_66 = arith.constant 0 : index
    %67 = vector.load %arg4[%c0_65, %c0_66] : memref<1x64xf32, #tpu.memory_space<vmem>>, vector<1x64xf32>
    %68 = vector.broadcast %67 : vector<1x64xf32> to vector<64x64xf32>
    %69 = arith.addf %66, %68 : vector<64x64xf32>
    %cst_67 = arith.constant 0.000000e+00 : f32
    %70 = vector.broadcast %cst_67 : f32 to vector<64x64xf32>
    %71 = arith.maximumf %69, %70 : vector<64x64xf32>
    %cst_68 = arith.constant 0.000000e+00 : f32
    %72 = vector.broadcast %cst_68 : f32 to vector<1x10x10x64xf32>
    %c0_69 = arith.constant 0 : index
    %c0_70 = arith.constant 0 : index
    %c0_71 = arith.constant 0 : index
    %c0_72 = arith.constant 0 : index
    %73 = vector.load %arg9[%c0_69, %c0_70, %c0_71, %c0_72] : memref<1x10x10x64xf32, #tpu.memory_space<vmem>>, vector<1x10x10x64xf32>
    tpu.vector_store %arg9[%c0_69, %c0_70, %c0_71, %c0_72], %72 {strides = array<i32>} : memref<1x10x10x64xf32, #tpu.memory_space<vmem>>, vector<1x10x10x64xf32>,
    %74 = vector.shape_cast %71 : vector<64x64xf32> to vector<1x8x8x64xf32>
    %c0_73 = arith.constant 0 : index
    %c1_74 = arith.constant 1 : index
    %c1_75 = arith.constant 1 : index
    %c0_76 = arith.constant 0 : index
    %75 = vector.load %arg9[%c0_73, %c1_74, %c1_75, %c0_76] : memref<1x10x10x64xf32, #tpu.memory_space<vmem>>, vector<1x8x8x64xf32>
    tpu.vector_store %arg9[%c0_73, %c1_74, %c1_75, %c0_76], %74 {strides = array<i32>} : memref<1x10x10x64xf32, #tpu.memory_space<vmem>>, vector<1x8x8x64xf32>,
    %cst_77 = arith.constant 0.000000e+00 : f32
    %76 = vector.broadcast %cst_77 : f32 to vector<64x64xf32>
    %c0_78 = arith.constant 0 : index
    %c0_79 = arith.constant 0 : index
    %c0_80 = arith.constant 0 : index
    %c0_81 = arith.constant 0 : index
    %77 = vector.load %arg9[%c0_78, %c0_79, %c0_80, %c0_81] : memref<1x10x10x64xf32, #tpu.memory_space<vmem>>, vector<1x8x8x64xf32>
    %78 = vector.shape_cast %77 : vector<1x8x8x64xf32> to vector<64x64xf32>
    %79 = arith.truncf %78 : vector<64x64xf32> to vector<64x64xbf16>
    %c0_82 = arith.constant 0 : index
    %c0_83 = arith.constant 0 : index
    %c0_84 = arith.constant 0 : index
    %80 = vector.load %arg5[%c0_82, %c0_83, %c0_84] : memref<9x64x64xbf16, #tpu.memory_space<vmem>>, vector<1x64x64xbf16>
    %81 = vector.shape_cast %80 : vector<1x64x64xbf16> to vector<64x64xbf16>
    %cst_85 = arith.constant dense<0.000000e+00> : vector<64x64xf32>
    %82 = tpu.matmul %79, %81, %cst_85 {dimension_numbers = #tpu.dot_dimension_numbers<[1], [0], [0], [1], [0, 0, 1, 1], [], []>} : vector<64x64xbf16>, vector<64x64xbf16>, vector<64x64xf32> -> vector<64x64xf32>
    %83 = arith.addf %76, %82 : vector<64x64xf32>
    %c0_86 = arith.constant 0 : index
    %c0_87 = arith.constant 0 : index
    %c1_88 = arith.constant 1 : index
    %c0_89 = arith.constant 0 : index
    %84 = vector.load %arg9[%c0_86, %c0_87, %c1_88, %c0_89] : memref<1x10x10x64xf32, #tpu.memory_space<vmem>>, vector<1x8x8x64xf32>
    %85 = vector.shape_cast %84 : vector<1x8x8x64xf32> to vector<64x64xf32>
    %86 = arith.truncf %85 : vector<64x64xf32> to vector<64x64xbf16>
    %c1_90 = arith.constant 1 : index
    %c0_91 = arith.constant 0 : index
    %c0_92 = arith.constant 0 : index
    %87 = vector.load %arg5[%c1_90, %c0_91, %c0_92] : memref<9x64x64xbf16, #tpu.memory_space<vmem>>, vector<1x64x64xbf16>
    %88 = vector.shape_cast %87 : vector<1x64x64xbf16> to vector<64x64xbf16>
    %cst_93 = arith.constant dense<0.000000e+00> : vector<64x64xf32>
    %89 = tpu.matmul %86, %88, %cst_93 {dimension_numbers = #tpu.dot_dimension_numbers<[1], [0], [0], [1], [0, 0, 1, 1], [], []>} : vector<64x64xbf16>, vector<64x64xbf16>, vector<64x64xf32> -> vector<64x64xf32>
    %90 = arith.addf %83, %89 : vector<64x64xf32>
    %c0_94 = arith.constant 0 : index
    %c0_95 = arith.constant 0 : index
    %c2_96 = arith.constant 2 : index
    %c0_97 = arith.constant 0 : index
    %91 = vector.load %arg9[%c0_94, %c0_95, %c2_96, %c0_97] : memref<1x10x10x64xf32, #tpu.memory_space<vmem>>, vector<1x8x8x64xf32>
    %92 = vector.shape_cast %91 : vector<1x8x8x64xf32> to vector<64x64xf32>
    %93 = arith.truncf %92 : vector<64x64xf32> to vector<64x64xbf16>
    %c2_98 = arith.constant 2 : index
    %c0_99 = arith.constant 0 : index
    %c0_100 = arith.constant 0 : index
    %94 = vector.load %arg5[%c2_98, %c0_99, %c0_100] : memref<9x64x64xbf16, #tpu.memory_space<vmem>>, vector<1x64x64xbf16>
    %95 = vector.shape_cast %94 : vector<1x64x64xbf16> to vector<64x64xbf16>
    %cst_101 = arith.constant dense<0.000000e+00> : vector<64x64xf32>
    %96 = tpu.matmul %93, %95, %cst_101 {dimension_numbers = #tpu.dot_dimension_numbers<[1], [0], [0], [1], [0, 0, 1, 1], [], []>} : vector<64x64xbf16>, vector<64x64xbf16>, vector<64x64xf32> -> vector<64x64xf32>
    %97 = arith.addf %90, %96 : vector<64x64xf32>
    %c0_102 = arith.constant 0 : index
    %c1_103 = arith.constant 1 : index
    %c0_104 = arith.constant 0 : index
    %c0_105 = arith.constant 0 : index
    %98 = vector.load %arg9[%c0_102, %c1_103, %c0_104, %c0_105] : memref<1x10x10x64xf32, #tpu.memory_space<vmem>>, vector<1x8x8x64xf32>
    %99 = vector.shape_cast %98 : vector<1x8x8x64xf32> to vector<64x64xf32>
    %100 = arith.truncf %99 : vector<64x64xf32> to vector<64x64xbf16>
    %c3_106 = arith.constant 3 : index
    %c0_107 = arith.constant 0 : index
    %c0_108 = arith.constant 0 : index
    %101 = vector.load %arg5[%c3_106, %c0_107, %c0_108] : memref<9x64x64xbf16, #tpu.memory_space<vmem>>, vector<1x64x64xbf16>
    %102 = vector.shape_cast %101 : vector<1x64x64xbf16> to vector<64x64xbf16>
    %cst_109 = arith.constant dense<0.000000e+00> : vector<64x64xf32>
    %103 = tpu.matmul %100, %102, %cst_109 {dimension_numbers = #tpu.dot_dimension_numbers<[1], [0], [0], [1], [0, 0, 1, 1], [], []>} : vector<64x64xbf16>, vector<64x64xbf16>, vector<64x64xf32> -> vector<64x64xf32>
    %104 = arith.addf %97, %103 : vector<64x64xf32>
    %c0_110 = arith.constant 0 : index
    %c1_111 = arith.constant 1 : index
    %c1_112 = arith.constant 1 : index
    %c0_113 = arith.constant 0 : index
    %105 = vector.load %arg9[%c0_110, %c1_111, %c1_112, %c0_113] : memref<1x10x10x64xf32, #tpu.memory_space<vmem>>, vector<1x8x8x64xf32>
    %106 = vector.shape_cast %105 : vector<1x8x8x64xf32> to vector<64x64xf32>
    %107 = arith.truncf %106 : vector<64x64xf32> to vector<64x64xbf16>
    %c4_114 = arith.constant 4 : index
    %c0_115 = arith.constant 0 : index
    %c0_116 = arith.constant 0 : index
    %108 = vector.load %arg5[%c4_114, %c0_115, %c0_116] : memref<9x64x64xbf16, #tpu.memory_space<vmem>>, vector<1x64x64xbf16>
    %109 = vector.shape_cast %108 : vector<1x64x64xbf16> to vector<64x64xbf16>
    %cst_117 = arith.constant dense<0.000000e+00> : vector<64x64xf32>
    %110 = tpu.matmul %107, %109, %cst_117 {dimension_numbers = #tpu.dot_dimension_numbers<[1], [0], [0], [1], [0, 0, 1, 1], [], []>} : vector<64x64xbf16>, vector<64x64xbf16>, vector<64x64xf32> -> vector<64x64xf32>
    %111 = arith.addf %104, %110 : vector<64x64xf32>
    %c0_118 = arith.constant 0 : index
    %c1_119 = arith.constant 1 : index
    %c2_120 = arith.constant 2 : index
    %c0_121 = arith.constant 0 : index
    %112 = vector.load %arg9[%c0_118, %c1_119, %c2_120, %c0_121] : memref<1x10x10x64xf32, #tpu.memory_space<vmem>>, vector<1x8x8x64xf32>
    %113 = vector.shape_cast %112 : vector<1x8x8x64xf32> to vector<64x64xf32>
    %114 = arith.truncf %113 : vector<64x64xf32> to vector<64x64xbf16>
    %c5_122 = arith.constant 5 : index
    %c0_123 = arith.constant 0 : index
    %c0_124 = arith.constant 0 : index
    %115 = vector.load %arg5[%c5_122, %c0_123, %c0_124] : memref<9x64x64xbf16, #tpu.memory_space<vmem>>, vector<1x64x64xbf16>
    %116 = vector.shape_cast %115 : vector<1x64x64xbf16> to vector<64x64xbf16>
    %cst_125 = arith.constant dense<0.000000e+00> : vector<64x64xf32>
    %117 = tpu.matmul %114, %116, %cst_125 {dimension_numbers = #tpu.dot_dimension_numbers<[1], [0], [0], [1], [0, 0, 1, 1], [], []>} : vector<64x64xbf16>, vector<64x64xbf16>, vector<64x64xf32> -> vector<64x64xf32>
    %118 = arith.addf %111, %117 : vector<64x64xf32>
    %c0_126 = arith.constant 0 : index
    %c2_127 = arith.constant 2 : index
    %c0_128 = arith.constant 0 : index
    %c0_129 = arith.constant 0 : index
    %119 = vector.load %arg9[%c0_126, %c2_127, %c0_128, %c0_129] : memref<1x10x10x64xf32, #tpu.memory_space<vmem>>, vector<1x8x8x64xf32>
    %120 = vector.shape_cast %119 : vector<1x8x8x64xf32> to vector<64x64xf32>
    %121 = arith.truncf %120 : vector<64x64xf32> to vector<64x64xbf16>
    %c6_130 = arith.constant 6 : index
    %c0_131 = arith.constant 0 : index
    %c0_132 = arith.constant 0 : index
    %122 = vector.load %arg5[%c6_130, %c0_131, %c0_132] : memref<9x64x64xbf16, #tpu.memory_space<vmem>>, vector<1x64x64xbf16>
    %123 = vector.shape_cast %122 : vector<1x64x64xbf16> to vector<64x64xbf16>
    %cst_133 = arith.constant dense<0.000000e+00> : vector<64x64xf32>
    %124 = tpu.matmul %121, %123, %cst_133 {dimension_numbers = #tpu.dot_dimension_numbers<[1], [0], [0], [1], [0, 0, 1, 1], [], []>} : vector<64x64xbf16>, vector<64x64xbf16>, vector<64x64xf32> -> vector<64x64xf32>
    %125 = arith.addf %118, %124 : vector<64x64xf32>
    %c0_134 = arith.constant 0 : index
    %c2_135 = arith.constant 2 : index
    %c1_136 = arith.constant 1 : index
    %c0_137 = arith.constant 0 : index
    %126 = vector.load %arg9[%c0_134, %c2_135, %c1_136, %c0_137] : memref<1x10x10x64xf32, #tpu.memory_space<vmem>>, vector<1x8x8x64xf32>
    %127 = vector.shape_cast %126 : vector<1x8x8x64xf32> to vector<64x64xf32>
    %128 = arith.truncf %127 : vector<64x64xf32> to vector<64x64xbf16>
    %c7_138 = arith.constant 7 : index
    %c0_139 = arith.constant 0 : index
    %c0_140 = arith.constant 0 : index
    %129 = vector.load %arg5[%c7_138, %c0_139, %c0_140] : memref<9x64x64xbf16, #tpu.memory_space<vmem>>, vector<1x64x64xbf16>
    %130 = vector.shape_cast %129 : vector<1x64x64xbf16> to vector<64x64xbf16>
    %cst_141 = arith.constant dense<0.000000e+00> : vector<64x64xf32>
    %131 = tpu.matmul %128, %130, %cst_141 {dimension_numbers = #tpu.dot_dimension_numbers<[1], [0], [0], [1], [0, 0, 1, 1], [], []>} : vector<64x64xbf16>, vector<64x64xbf16>, vector<64x64xf32> -> vector<64x64xf32>
    %132 = arith.addf %125, %131 : vector<64x64xf32>
    %c0_142 = arith.constant 0 : index
    %c2_143 = arith.constant 2 : index
    %c2_144 = arith.constant 2 : index
    %c0_145 = arith.constant 0 : index
    %133 = vector.load %arg9[%c0_142, %c2_143, %c2_144, %c0_145] : memref<1x10x10x64xf32, #tpu.memory_space<vmem>>, vector<1x8x8x64xf32>
    %134 = vector.shape_cast %133 : vector<1x8x8x64xf32> to vector<64x64xf32>
    %135 = arith.truncf %134 : vector<64x64xf32> to vector<64x64xbf16>
    %c8_146 = arith.constant 8 : index
    %c0_147 = arith.constant 0 : index
    %c0_148 = arith.constant 0 : index
    %136 = vector.load %arg5[%c8_146, %c0_147, %c0_148] : memref<9x64x64xbf16, #tpu.memory_space<vmem>>, vector<1x64x64xbf16>
    %137 = vector.shape_cast %136 : vector<1x64x64xbf16> to vector<64x64xbf16>
    %cst_149 = arith.constant dense<0.000000e+00> : vector<64x64xf32>
    %138 = tpu.matmul %135, %137, %cst_149 {dimension_numbers = #tpu.dot_dimension_numbers<[1], [0], [0], [1], [0, 0, 1, 1], [], []>} : vector<64x64xbf16>, vector<64x64xbf16>, vector<64x64xf32> -> vector<64x64xf32>
    %139 = arith.addf %132, %138 : vector<64x64xf32>
    %c0_150 = arith.constant 0 : index
    %c1_151 = arith.constant 1 : index
    %c1_152 = arith.constant 1 : index
    %c0_153 = arith.constant 0 : index
    %140 = vector.load %arg1[%c0_150, %c1_151, %c1_152, %c0_153] : memref<1x10x10x64xf32, #tpu.memory_space<vmem>>, vector<1x8x8x64xf32>
    %141 = vector.shape_cast %140 : vector<1x8x8x64xf32> to vector<64x64xf32>
    %c0_154 = arith.constant 0 : index
    %c0_155 = arith.constant 0 : index
    %142 = vector.load %arg6[%c0_154, %c0_155] : memref<1x64xf32, #tpu.memory_space<vmem>>, vector<1x64xf32>
    %143 = vector.broadcast %142 : vector<1x64xf32> to vector<64x64xf32>
    %144 = arith.mulf %139, %143 : vector<64x64xf32>
    %c0_156 = arith.constant 0 : index
    %c0_157 = arith.constant 0 : index
    %145 = vector.load %arg7[%c0_156, %c0_157] : memref<1x64xf32, #tpu.memory_space<vmem>>, vector<1x64xf32>
    %146 = vector.broadcast %145 : vector<1x64xf32> to vector<64x64xf32>
    %147 = arith.addf %144, %146 : vector<64x64xf32>
    %148 = arith.addf %147, %141 : vector<64x64xf32>
    %cst_158 = arith.constant 0.000000e+00 : f32
    %149 = vector.broadcast %cst_158 : f32 to vector<64x64xf32>
    %150 = arith.maximumf %148, %149 : vector<64x64xf32>
    %c0_159 = arith.constant 0 : index
    %c0_160 = arith.constant 0 : index
    %151 = vector.load %arg8[%c0_159, %c0_160] : memref<64x64xf32, #tpu.memory_space<vmem>>, vector<64x64xf32>
    tpu.vector_store %arg8[%c0_159, %c0_160], %150 {strides = array<i32>} : memref<64x64xf32, #tpu.memory_space<vmem>>, vector<64x64xf32>,
    return
  }
  func.func @transform_0(%arg0: i32) -> (i32, i32, i32, i32) {
    %c0_i32 = arith.constant 0 : i32
    %c0_i32_0 = arith.constant 0 : i32
    %c0_i32_1 = arith.constant 0 : i32
    %c0_i32_2 = arith.constant 0 : i32
    return %arg0, %c0_i32, %c0_i32_0, %c0_i32_1 : i32, i32, i32, i32
  }
  func.func @transform_1(%arg0: i32) -> (i32, i32, i32) {
    %c0_i32 = arith.constant 0 : i32
    %c0_i32_0 = arith.constant 0 : i32
    %c0_i32_1 = arith.constant 0 : i32
    %c0_i32_2 = arith.constant 0 : i32
    return %c0_i32, %c0_i32_0, %c0_i32_1 : i32, i32, i32
  }
  func.func @transform_2(%arg0: i32) -> (i32, i32) {
    %c0_i32 = arith.constant 0 : i32
    %c0_i32_0 = arith.constant 0 : i32
    %c0_i32_1 = arith.constant 0 : i32
    return %c0_i32, %c0_i32_0 : i32, i32
  }
  func.func @transform_3(%arg0: i32) -> (i32, i32) {
    %c0_i32 = arith.constant 0 : i32
    %c0_i32_0 = arith.constant 0 : i32
    %c0_i32_1 = arith.constant 0 : i32
    return %c0_i32, %c0_i32_0 : i32, i32
  }
  func.func @transform_4(%arg0: i32) -> (i32, i32, i32) {
    %c0_i32 = arith.constant 0 : i32
    %c0_i32_0 = arith.constant 0 : i32
    %c0_i32_1 = arith.constant 0 : i32
    %c0_i32_2 = arith.constant 0 : i32
    return %c0_i32, %c0_i32_0, %c0_i32_1 : i32, i32, i32
  }
  func.func @transform_5(%arg0: i32) -> (i32, i32) {
    %c0_i32 = arith.constant 0 : i32
    %c0_i32_0 = arith.constant 0 : i32
    %c0_i32_1 = arith.constant 0 : i32
    return %c0_i32, %c0_i32_0 : i32, i32
  }
  func.func @transform_6(%arg0: i32) -> (i32, i32) {
    %c0_i32 = arith.constant 0 : i32
    %c0_i32_0 = arith.constant 0 : i32
    %c0_i32_1 = arith.constant 0 : i32
    return %c0_i32, %c0_i32_0 : i32, i32
  }
  func.func @transform_7(%arg0: i32) -> (i32, i32) {
    %c0_i32 = arith.constant 0 : i32
    %c0_i32_0 = arith.constant 0 : i32
    return %arg0, %c0_i32 : i32, i32
  }
}

module attributes {stable_mosaic.version = 11 : i64} {
  func.func @_mm_kernel(%arg0: i32, %arg1: memref<32x640xbf16, #tpu.memory_space<vmem>>, %arg2: memref<640x128xbf16, #tpu.memory_space<vmem>>, %arg3: memref<1x128xf32, #tpu.memory_space<vmem>>, %arg4: memref<1x128xf32, #tpu.memory_space<vmem>>, %arg5: memref<32x128xf32, #tpu.memory_space<vmem>>) attributes {dimension_semantics = [#tpu.dimension_semantics<parallel>], iteration_bounds = array<i64: 1>, scalar_prefetch = 0 : i64, scratch_operands = 0 : i64, tpu.core_type = #tpu.core_type<tc>, window_params = [{transform_indices = @transform_0, window_bounds = array<i64: 32, 640>}, {pipeline_mode = #tpu.pipeline_mode<synchronous>, transform_indices = @transform_1, window_bounds = array<i64: 640, 128>}, {pipeline_mode = #tpu.pipeline_mode<synchronous>, transform_indices = @transform_2, window_bounds = array<i64: 1, 128>}, {pipeline_mode = #tpu.pipeline_mode<synchronous>, transform_indices = @transform_3, window_bounds = array<i64: 1, 128>}, {transform_indices = @transform_4, window_bounds = array<i64: 32, 128>}]} {
    %c0 = arith.constant 0 : index
    %c0_0 = arith.constant 0 : index
    %0 = vector.load %arg1[%c0, %c0_0] : memref<32x640xbf16, #tpu.memory_space<vmem>>, vector<32x640xbf16>
    %c0_1 = arith.constant 0 : index
    %c0_2 = arith.constant 0 : index
    %1 = vector.load %arg2[%c0_1, %c0_2] : memref<640x128xbf16, #tpu.memory_space<vmem>>, vector<640x128xbf16>
    %cst = arith.constant dense<0.000000e+00> : vector<32x128xf32>
    %2 = tpu.matmul %0, %1, %cst {dimension_numbers = #tpu.dot_dimension_numbers<[1], [0], [0], [1], [0, 0, 1, 1], [], []>} : vector<32x640xbf16>, vector<640x128xbf16>, vector<32x128xf32> -> vector<32x128xf32>
    %c0_3 = arith.constant 0 : index
    %c0_4 = arith.constant 0 : index
    %3 = vector.load %arg3[%c0_3, %c0_4] : memref<1x128xf32, #tpu.memory_space<vmem>>, vector<1x128xf32>
    %4 = vector.broadcast %3 : vector<1x128xf32> to vector<32x128xf32>
    %5 = arith.mulf %2, %4 : vector<32x128xf32>
    %c0_5 = arith.constant 0 : index
    %c0_6 = arith.constant 0 : index
    %6 = vector.load %arg4[%c0_5, %c0_6] : memref<1x128xf32, #tpu.memory_space<vmem>>, vector<1x128xf32>
    %7 = vector.broadcast %6 : vector<1x128xf32> to vector<32x128xf32>
    %8 = arith.addf %5, %7 : vector<32x128xf32>
    %cst_7 = arith.constant 0.000000e+00 : f32
    %9 = vector.broadcast %cst_7 : f32 to vector<32x128xf32>
    %10 = arith.maximumf %8, %9 : vector<32x128xf32>
    %c0_8 = arith.constant 0 : index
    %c0_9 = arith.constant 0 : index
    %11 = vector.load %arg5[%c0_8, %c0_9] : memref<32x128xf32, #tpu.memory_space<vmem>>, vector<32x128xf32>
    tpu.vector_store %arg5[%c0_8, %c0_9], %10 {strides = array<i32>} : memref<32x128xf32, #tpu.memory_space<vmem>>, vector<32x128xf32>,
    return
  }
  func.func @transform_0(%arg0: i32) -> (i32, i32) {
    %c0_i32 = arith.constant 0 : i32
    %c0_i32_0 = arith.constant 0 : i32
    return %arg0, %c0_i32 : i32, i32
  }
  func.func @transform_1(%arg0: i32) -> (i32, i32) {
    %c0_i32 = arith.constant 0 : i32
    %c0_i32_0 = arith.constant 0 : i32
    %c0_i32_1 = arith.constant 0 : i32
    return %c0_i32, %c0_i32_0 : i32, i32
  }
  func.func @transform_2(%arg0: i32) -> (i32, i32) {
    %c0_i32 = arith.constant 0 : i32
    %c0_i32_0 = arith.constant 0 : i32
    %c0_i32_1 = arith.constant 0 : i32
    return %c0_i32, %c0_i32_0 : i32, i32
  }
  func.func @transform_3(%arg0: i32) -> (i32, i32) {
    %c0_i32 = arith.constant 0 : i32
    %c0_i32_0 = arith.constant 0 : i32
    %c0_i32_1 = arith.constant 0 : i32
    return %c0_i32, %c0_i32_0 : i32, i32
  }
  func.func @transform_4(%arg0: i32) -> (i32, i32) {
    %c0_i32 = arith.constant 0 : i32
    %c0_i32_0 = arith.constant 0 : i32
    return %arg0, %c0_i32 : i32, i32
  }
}

module attributes {stable_mosaic.version = 11 : i64} {
  func.func @_mm_kernel(%arg0: i32, %arg1: memref<32x128xbf16, #tpu.memory_space<vmem>>, %arg2: memref<128x128xbf16, #tpu.memory_space<vmem>>, %arg3: memref<1x128xf32, #tpu.memory_space<vmem>>, %arg4: memref<1x128xf32, #tpu.memory_space<vmem>>, %arg5: memref<32x128xf32, #tpu.memory_space<vmem>>) attributes {dimension_semantics = [#tpu.dimension_semantics<parallel>], iteration_bounds = array<i64: 1>, scalar_prefetch = 0 : i64, scratch_operands = 0 : i64, tpu.core_type = #tpu.core_type<tc>, window_params = [{transform_indices = @transform_0, window_bounds = array<i64: 32, 128>}, {pipeline_mode = #tpu.pipeline_mode<synchronous>, transform_indices = @transform_1, window_bounds = array<i64: 128, 128>}, {pipeline_mode = #tpu.pipeline_mode<synchronous>, transform_indices = @transform_2, window_bounds = array<i64: 1, 128>}, {pipeline_mode = #tpu.pipeline_mode<synchronous>, transform_indices = @transform_3, window_bounds = array<i64: 1, 128>}, {transform_indices = @transform_4, window_bounds = array<i64: 32, 128>}]} {
    %c0 = arith.constant 0 : index
    %c0_0 = arith.constant 0 : index
    %0 = vector.load %arg1[%c0, %c0_0] : memref<32x128xbf16, #tpu.memory_space<vmem>>, vector<32x128xbf16>
    %c0_1 = arith.constant 0 : index
    %c0_2 = arith.constant 0 : index
    %1 = vector.load %arg2[%c0_1, %c0_2] : memref<128x128xbf16, #tpu.memory_space<vmem>>, vector<128x128xbf16>
    %cst = arith.constant dense<0.000000e+00> : vector<32x128xf32>
    %2 = tpu.matmul %0, %1, %cst {dimension_numbers = #tpu.dot_dimension_numbers<[1], [0], [0], [1], [0, 0, 1, 1], [], []>} : vector<32x128xbf16>, vector<128x128xbf16>, vector<32x128xf32> -> vector<32x128xf32>
    %c0_3 = arith.constant 0 : index
    %c0_4 = arith.constant 0 : index
    %3 = vector.load %arg3[%c0_3, %c0_4] : memref<1x128xf32, #tpu.memory_space<vmem>>, vector<1x128xf32>
    %4 = vector.broadcast %3 : vector<1x128xf32> to vector<32x128xf32>
    %5 = arith.mulf %2, %4 : vector<32x128xf32>
    %c0_5 = arith.constant 0 : index
    %c0_6 = arith.constant 0 : index
    %6 = vector.load %arg4[%c0_5, %c0_6] : memref<1x128xf32, #tpu.memory_space<vmem>>, vector<1x128xf32>
    %7 = vector.broadcast %6 : vector<1x128xf32> to vector<32x128xf32>
    %8 = arith.addf %5, %7 : vector<32x128xf32>
    %c0_7 = arith.constant 0 : index
    %c0_8 = arith.constant 0 : index
    %9 = vector.load %arg5[%c0_7, %c0_8] : memref<32x128xf32, #tpu.memory_space<vmem>>, vector<32x128xf32>
    tpu.vector_store %arg5[%c0_7, %c0_8], %8 {strides = array<i32>} : memref<32x128xf32, #tpu.memory_space<vmem>>, vector<32x128xf32>,
    return
  }
  func.func @transform_0(%arg0: i32) -> (i32, i32) {
    %c0_i32 = arith.constant 0 : i32
    %c0_i32_0 = arith.constant 0 : i32
    return %arg0, %c0_i32 : i32, i32
  }
  func.func @transform_1(%arg0: i32) -> (i32, i32) {
    %c0_i32 = arith.constant 0 : i32
    %c0_i32_0 = arith.constant 0 : i32
    %c0_i32_1 = arith.constant 0 : i32
    return %c0_i32, %c0_i32_0 : i32, i32
  }
  func.func @transform_2(%arg0: i32) -> (i32, i32) {
    %c0_i32 = arith.constant 0 : i32
    %c0_i32_0 = arith.constant 0 : i32
    %c0_i32_1 = arith.constant 0 : i32
    return %c0_i32, %c0_i32_0 : i32, i32
  }
  func.func @transform_3(%arg0: i32) -> (i32, i32) {
    %c0_i32 = arith.constant 0 : i32
    %c0_i32_0 = arith.constant 0 : i32
    %c0_i32_1 = arith.constant 0 : i32
    return %c0_i32, %c0_i32_0 : i32, i32
  }
  func.func @transform_4(%arg0: i32) -> (i32, i32) {
    %c0_i32 = arith.constant 0 : i32
    %c0_i32_0 = arith.constant 0 : i32
    return %arg0, %c0_i32 : i32, i32
  }
}

module attributes {stable_mosaic.version = 11 : i64} {
  func.func @_mm_kernel(%arg0: i32, %arg1: memref<32x1152xbf16, #tpu.memory_space<vmem>>, %arg2: memref<1152x128xbf16, #tpu.memory_space<vmem>>, %arg3: memref<1x128xf32, #tpu.memory_space<vmem>>, %arg4: memref<1x128xf32, #tpu.memory_space<vmem>>, %arg5: memref<32x128xf32, #tpu.memory_space<vmem>>) attributes {dimension_semantics = [#tpu.dimension_semantics<parallel>], iteration_bounds = array<i64: 1>, scalar_prefetch = 0 : i64, scratch_operands = 0 : i64, tpu.core_type = #tpu.core_type<tc>, window_params = [{transform_indices = @transform_0, window_bounds = array<i64: 32, 1152>}, {pipeline_mode = #tpu.pipeline_mode<synchronous>, transform_indices = @transform_1, window_bounds = array<i64: 1152, 128>}, {pipeline_mode = #tpu.pipeline_mode<synchronous>, transform_indices = @transform_2, window_bounds = array<i64: 1, 128>}, {pipeline_mode = #tpu.pipeline_mode<synchronous>, transform_indices = @transform_3, window_bounds = array<i64: 1, 128>}, {transform_indices = @transform_4, window_bounds = array<i64: 32, 128>}]} {
    %c0 = arith.constant 0 : index
    %c0_0 = arith.constant 0 : index
    %0 = vector.load %arg1[%c0, %c0_0] : memref<32x1152xbf16, #tpu.memory_space<vmem>>, vector<32x1152xbf16>
    %c0_1 = arith.constant 0 : index
    %c0_2 = arith.constant 0 : index
    %1 = vector.load %arg2[%c0_1, %c0_2] : memref<1152x128xbf16, #tpu.memory_space<vmem>>, vector<1152x128xbf16>
    %cst = arith.constant dense<0.000000e+00> : vector<32x128xf32>
    %2 = tpu.matmul %0, %1, %cst {dimension_numbers = #tpu.dot_dimension_numbers<[1], [0], [0], [1], [0, 0, 1, 1], [], []>} : vector<32x1152xbf16>, vector<1152x128xbf16>, vector<32x128xf32> -> vector<32x128xf32>
    %c0_3 = arith.constant 0 : index
    %c0_4 = arith.constant 0 : index
    %3 = vector.load %arg3[%c0_3, %c0_4] : memref<1x128xf32, #tpu.memory_space<vmem>>, vector<1x128xf32>
    %4 = vector.broadcast %3 : vector<1x128xf32> to vector<32x128xf32>
    %5 = arith.mulf %2, %4 : vector<32x128xf32>
    %c0_5 = arith.constant 0 : index
    %c0_6 = arith.constant 0 : index
    %6 = vector.load %arg4[%c0_5, %c0_6] : memref<1x128xf32, #tpu.memory_space<vmem>>, vector<1x128xf32>
    %7 = vector.broadcast %6 : vector<1x128xf32> to vector<32x128xf32>
    %8 = arith.addf %5, %7 : vector<32x128xf32>
    %cst_7 = arith.constant 0.000000e+00 : f32
    %9 = vector.broadcast %cst_7 : f32 to vector<32x128xf32>
    %10 = arith.maximumf %8, %9 : vector<32x128xf32>
    %c0_8 = arith.constant 0 : index
    %c0_9 = arith.constant 0 : index
    %11 = vector.load %arg5[%c0_8, %c0_9] : memref<32x128xf32, #tpu.memory_space<vmem>>, vector<32x128xf32>
    tpu.vector_store %arg5[%c0_8, %c0_9], %10 {strides = array<i32>} : memref<32x128xf32, #tpu.memory_space<vmem>>, vector<32x128xf32>,
    return
  }
  func.func @transform_0(%arg0: i32) -> (i32, i32) {
    %c0_i32 = arith.constant 0 : i32
    %c0_i32_0 = arith.constant 0 : i32
    return %arg0, %c0_i32 : i32, i32
  }
  func.func @transform_1(%arg0: i32) -> (i32, i32) {
    %c0_i32 = arith.constant 0 : i32
    %c0_i32_0 = arith.constant 0 : i32
    %c0_i32_1 = arith.constant 0 : i32
    return %c0_i32, %c0_i32_0 : i32, i32
  }
  func.func @transform_2(%arg0: i32) -> (i32, i32) {
    %c0_i32 = arith.constant 0 : i32
    %c0_i32_0 = arith.constant 0 : i32
    %c0_i32_1 = arith.constant 0 : i32
    return %c0_i32, %c0_i32_0 : i32, i32
  }
  func.func @transform_3(%arg0: i32) -> (i32, i32) {
    %c0_i32 = arith.constant 0 : i32
    %c0_i32_0 = arith.constant 0 : i32
    %c0_i32_1 = arith.constant 0 : i32
    return %c0_i32, %c0_i32_0 : i32, i32
  }
  func.func @transform_4(%arg0: i32) -> (i32, i32) {
    %c0_i32 = arith.constant 0 : i32
    %c0_i32_0 = arith.constant 0 : i32
    return %arg0, %c0_i32 : i32, i32
  }
}

module attributes {stable_mosaic.version = 11 : i64} {
  func.func @_mm_res_kernel(%arg0: i32, %arg1: memref<32x1152xbf16, #tpu.memory_space<vmem>>, %arg2: memref<1152x128xbf16, #tpu.memory_space<vmem>>, %arg3: memref<1x128xf32, #tpu.memory_space<vmem>>, %arg4: memref<1x128xf32, #tpu.memory_space<vmem>>, %arg5: memref<32x128xf32, #tpu.memory_space<vmem>>, %arg6: memref<32x128xf32, #tpu.memory_space<vmem>>) attributes {dimension_semantics = [#tpu.dimension_semantics<parallel>], iteration_bounds = array<i64: 1>, scalar_prefetch = 0 : i64, scratch_operands = 0 : i64, tpu.core_type = #tpu.core_type<tc>, window_params = [{transform_indices = @transform_0, window_bounds = array<i64: 32, 1152>}, {pipeline_mode = #tpu.pipeline_mode<synchronous>, transform_indices = @transform_1, window_bounds = array<i64: 1152, 128>}, {pipeline_mode = #tpu.pipeline_mode<synchronous>, transform_indices = @transform_2, window_bounds = array<i64: 1, 128>}, {pipeline_mode = #tpu.pipeline_mode<synchronous>, transform_indices = @transform_3, window_bounds = array<i64: 1, 128>}, {transform_indices = @transform_4, window_bounds = array<i64: 32, 128>}, {transform_indices = @transform_5, window_bounds = array<i64: 32, 128>}]} {
    %c0 = arith.constant 0 : index
    %c0_0 = arith.constant 0 : index
    %0 = vector.load %arg1[%c0, %c0_0] : memref<32x1152xbf16, #tpu.memory_space<vmem>>, vector<32x1152xbf16>
    %c0_1 = arith.constant 0 : index
    %c0_2 = arith.constant 0 : index
    %1 = vector.load %arg2[%c0_1, %c0_2] : memref<1152x128xbf16, #tpu.memory_space<vmem>>, vector<1152x128xbf16>
    %cst = arith.constant dense<0.000000e+00> : vector<32x128xf32>
    %2 = tpu.matmul %0, %1, %cst {dimension_numbers = #tpu.dot_dimension_numbers<[1], [0], [0], [1], [0, 0, 1, 1], [], []>} : vector<32x1152xbf16>, vector<1152x128xbf16>, vector<32x128xf32> -> vector<32x128xf32>
    %c0_3 = arith.constant 0 : index
    %c0_4 = arith.constant 0 : index
    %3 = vector.load %arg3[%c0_3, %c0_4] : memref<1x128xf32, #tpu.memory_space<vmem>>, vector<1x128xf32>
    %4 = vector.broadcast %3 : vector<1x128xf32> to vector<32x128xf32>
    %5 = arith.mulf %2, %4 : vector<32x128xf32>
    %c0_5 = arith.constant 0 : index
    %c0_6 = arith.constant 0 : index
    %6 = vector.load %arg4[%c0_5, %c0_6] : memref<1x128xf32, #tpu.memory_space<vmem>>, vector<1x128xf32>
    %7 = vector.broadcast %6 : vector<1x128xf32> to vector<32x128xf32>
    %8 = arith.addf %5, %7 : vector<32x128xf32>
    %c0_7 = arith.constant 0 : index
    %c0_8 = arith.constant 0 : index
    %9 = vector.load %arg5[%c0_7, %c0_8] : memref<32x128xf32, #tpu.memory_space<vmem>>, vector<32x128xf32>
    %10 = arith.addf %8, %9 : vector<32x128xf32>
    %cst_9 = arith.constant 0.000000e+00 : f32
    %11 = vector.broadcast %cst_9 : f32 to vector<32x128xf32>
    %12 = arith.maximumf %10, %11 : vector<32x128xf32>
    %c0_10 = arith.constant 0 : index
    %c0_11 = arith.constant 0 : index
    %13 = vector.load %arg6[%c0_10, %c0_11] : memref<32x128xf32, #tpu.memory_space<vmem>>, vector<32x128xf32>
    tpu.vector_store %arg6[%c0_10, %c0_11], %12 {strides = array<i32>} : memref<32x128xf32, #tpu.memory_space<vmem>>, vector<32x128xf32>,
    return
  }
  func.func @transform_0(%arg0: i32) -> (i32, i32) {
    %c0_i32 = arith.constant 0 : i32
    %c0_i32_0 = arith.constant 0 : i32
    return %arg0, %c0_i32 : i32, i32
  }
  func.func @transform_1(%arg0: i32) -> (i32, i32) {
    %c0_i32 = arith.constant 0 : i32
    %c0_i32_0 = arith.constant 0 : i32
    %c0_i32_1 = arith.constant 0 : i32
    return %c0_i32, %c0_i32_0 : i32, i32
  }
  func.func @transform_2(%arg0: i32) -> (i32, i32) {
    %c0_i32 = arith.constant 0 : i32
    %c0_i32_0 = arith.constant 0 : i32
    %c0_i32_1 = arith.constant 0 : i32
    return %c0_i32, %c0_i32_0 : i32, i32
  }
  func.func @transform_3(%arg0: i32) -> (i32, i32) {
    %c0_i32 = arith.constant 0 : i32
    %c0_i32_0 = arith.constant 0 : i32
    %c0_i32_1 = arith.constant 0 : i32
    return %c0_i32, %c0_i32_0 : i32, i32
  }
  func.func @transform_4(%arg0: i32) -> (i32, i32) {
    %c0_i32 = arith.constant 0 : i32
    %c0_i32_0 = arith.constant 0 : i32
    return %arg0, %c0_i32 : i32, i32
  }
  func.func @transform_5(%arg0: i32) -> (i32, i32) {
    %c0_i32 = arith.constant 0 : i32
    %c0_i32_0 = arith.constant 0 : i32
    return %arg0, %c0_i32 : i32, i32
  }
}

module attributes {stable_mosaic.version = 11 : i64} {
  func.func @_mm_kernel(%arg0: i32, %arg1: memref<128x128xbf16, #tpu.memory_space<vmem>>, %arg2: memref<128x256xbf16, #tpu.memory_space<vmem>>, %arg3: memref<1x256xf32, #tpu.memory_space<vmem>>, %arg4: memref<1x256xf32, #tpu.memory_space<vmem>>, %arg5: memref<128x256xf32, #tpu.memory_space<vmem>>) attributes {dimension_semantics = [#tpu.dimension_semantics<parallel>], iteration_bounds = array<i64: 2>, scalar_prefetch = 0 : i64, scratch_operands = 0 : i64, tpu.core_type = #tpu.core_type<tc>, window_params = [{transform_indices = @transform_0, window_bounds = array<i64: 128, 128>}, {pipeline_mode = #tpu.pipeline_mode<synchronous>, transform_indices = @transform_1, window_bounds = array<i64: 128, 256>}, {pipeline_mode = #tpu.pipeline_mode<synchronous>, transform_indices = @transform_2, window_bounds = array<i64: 1, 256>}, {pipeline_mode = #tpu.pipeline_mode<synchronous>, transform_indices = @transform_3, window_bounds = array<i64: 1, 256>}, {transform_indices = @transform_4, window_bounds = array<i64: 128, 256>}]} {
    %c0 = arith.constant 0 : index
    %c0_0 = arith.constant 0 : index
    %0 = vector.load %arg1[%c0, %c0_0] : memref<128x128xbf16, #tpu.memory_space<vmem>>, vector<128x128xbf16>
    %c0_1 = arith.constant 0 : index
    %c0_2 = arith.constant 0 : index
    %1 = vector.load %arg2[%c0_1, %c0_2] : memref<128x256xbf16, #tpu.memory_space<vmem>>, vector<128x256xbf16>
    %cst = arith.constant dense<0.000000e+00> : vector<128x256xf32>
    %2 = tpu.matmul %0, %1, %cst {dimension_numbers = #tpu.dot_dimension_numbers<[1], [0], [0], [1], [0, 0, 1, 1], [], []>} : vector<128x128xbf16>, vector<128x256xbf16>, vector<128x256xf32> -> vector<128x256xf32>
    %c0_3 = arith.constant 0 : index
    %c0_4 = arith.constant 0 : index
    %3 = vector.load %arg3[%c0_3, %c0_4] : memref<1x256xf32, #tpu.memory_space<vmem>>, vector<1x256xf32>
    %4 = vector.broadcast %3 : vector<1x256xf32> to vector<128x256xf32>
    %5 = arith.mulf %2, %4 : vector<128x256xf32>
    %c0_5 = arith.constant 0 : index
    %c0_6 = arith.constant 0 : index
    %6 = vector.load %arg4[%c0_5, %c0_6] : memref<1x256xf32, #tpu.memory_space<vmem>>, vector<1x256xf32>
    %7 = vector.broadcast %6 : vector<1x256xf32> to vector<128x256xf32>
    %8 = arith.addf %5, %7 : vector<128x256xf32>
    %c0_7 = arith.constant 0 : index
    %c0_8 = arith.constant 0 : index
    %9 = vector.load %arg5[%c0_7, %c0_8] : memref<128x256xf32, #tpu.memory_space<vmem>>, vector<128x256xf32>
    tpu.vector_store %arg5[%c0_7, %c0_8], %8 {strides = array<i32>} : memref<128x256xf32, #tpu.memory_space<vmem>>, vector<128x256xf32>,
    return
  }
  func.func @transform_0(%arg0: i32) -> (i32, i32) {
    %c0_i32 = arith.constant 0 : i32
    %c0_i32_0 = arith.constant 0 : i32
    return %arg0, %c0_i32 : i32, i32
  }
  func.func @transform_1(%arg0: i32) -> (i32, i32) {
    %c0_i32 = arith.constant 0 : i32
    %c0_i32_0 = arith.constant 0 : i32
    %c0_i32_1 = arith.constant 0 : i32
    return %c0_i32, %c0_i32_0 : i32, i32
  }
  func.func @transform_2(%arg0: i32) -> (i32, i32) {
    %c0_i32 = arith.constant 0 : i32
    %c0_i32_0 = arith.constant 0 : i32
    %c0_i32_1 = arith.constant 0 : i32
    return %c0_i32, %c0_i32_0 : i32, i32
  }
  func.func @transform_3(%arg0: i32) -> (i32, i32) {
    %c0_i32 = arith.constant 0 : i32
    %c0_i32_0 = arith.constant 0 : i32
    %c0_i32_1 = arith.constant 0 : i32
    return %c0_i32, %c0_i32_0 : i32, i32
  }
  func.func @transform_4(%arg0: i32) -> (i32, i32) {
    %c0_i32 = arith.constant 0 : i32
    %c0_i32_0 = arith.constant 0 : i32
    return %arg0, %c0_i32 : i32, i32
  }
}

module attributes {stable_mosaic.version = 11 : i64} {
  func.func @_mm_kernel(%arg0: i32, %arg1: memref<128x128xbf16, #tpu.memory_space<vmem>>, %arg2: memref<128x128xbf16, #tpu.memory_space<vmem>>, %arg3: memref<1x128xf32, #tpu.memory_space<vmem>>, %arg4: memref<1x128xf32, #tpu.memory_space<vmem>>, %arg5: memref<128x128xf32, #tpu.memory_space<vmem>>) attributes {dimension_semantics = [#tpu.dimension_semantics<parallel>], iteration_bounds = array<i64: 2>, scalar_prefetch = 0 : i64, scratch_operands = 0 : i64, tpu.core_type = #tpu.core_type<tc>, window_params = [{transform_indices = @transform_0, window_bounds = array<i64: 128, 128>}, {pipeline_mode = #tpu.pipeline_mode<synchronous>, transform_indices = @transform_1, window_bounds = array<i64: 128, 128>}, {pipeline_mode = #tpu.pipeline_mode<synchronous>, transform_indices = @transform_2, window_bounds = array<i64: 1, 128>}, {pipeline_mode = #tpu.pipeline_mode<synchronous>, transform_indices = @transform_3, window_bounds = array<i64: 1, 128>}, {transform_indices = @transform_4, window_bounds = array<i64: 128, 128>}]} {
    %c0 = arith.constant 0 : index
    %c0_0 = arith.constant 0 : index
    %0 = vector.load %arg1[%c0, %c0_0] : memref<128x128xbf16, #tpu.memory_space<vmem>>, vector<128x128xbf16>
    %c0_1 = arith.constant 0 : index
    %c0_2 = arith.constant 0 : index
    %1 = vector.load %arg2[%c0_1, %c0_2] : memref<128x128xbf16, #tpu.memory_space<vmem>>, vector<128x128xbf16>
    %cst = arith.constant dense<0.000000e+00> : vector<128x128xf32>
    %2 = tpu.matmul %0, %1, %cst {dimension_numbers = #tpu.dot_dimension_numbers<[1], [0], [0], [1], [0, 0, 1, 1], [], []>} : vector<128x128xbf16>, vector<128x128xbf16>, vector<128x128xf32> -> vector<128x128xf32>
    %c0_3 = arith.constant 0 : index
    %c0_4 = arith.constant 0 : index
    %3 = vector.load %arg3[%c0_3, %c0_4] : memref<1x128xf32, #tpu.memory_space<vmem>>, vector<1x128xf32>
    %4 = vector.broadcast %3 : vector<1x128xf32> to vector<128x128xf32>
    %5 = arith.mulf %2, %4 : vector<128x128xf32>
    %c0_5 = arith.constant 0 : index
    %c0_6 = arith.constant 0 : index
    %6 = vector.load %arg4[%c0_5, %c0_6] : memref<1x128xf32, #tpu.memory_space<vmem>>, vector<1x128xf32>
    %7 = vector.broadcast %6 : vector<1x128xf32> to vector<128x128xf32>
    %8 = arith.addf %5, %7 : vector<128x128xf32>
    %c0_7 = arith.constant 0 : index
    %c0_8 = arith.constant 0 : index
    %9 = vector.load %arg5[%c0_7, %c0_8] : memref<128x128xf32, #tpu.memory_space<vmem>>, vector<128x128xf32>
    tpu.vector_store %arg5[%c0_7, %c0_8], %8 {strides = array<i32>} : memref<128x128xf32, #tpu.memory_space<vmem>>, vector<128x128xf32>,
    return
  }
  func.func @transform_0(%arg0: i32) -> (i32, i32) {
    %c0_i32 = arith.constant 0 : i32
    %c0_i32_0 = arith.constant 0 : i32
    return %arg0, %c0_i32 : i32, i32
  }
  func.func @transform_1(%arg0: i32) -> (i32, i32) {
    %c0_i32 = arith.constant 0 : i32
    %c0_i32_0 = arith.constant 0 : i32
    %c0_i32_1 = arith.constant 0 : i32
    return %c0_i32, %c0_i32_0 : i32, i32
  }
  func.func @transform_2(%arg0: i32) -> (i32, i32) {
    %c0_i32 = arith.constant 0 : i32
    %c0_i32_0 = arith.constant 0 : i32
    %c0_i32_1 = arith.constant 0 : i32
    return %c0_i32, %c0_i32_0 : i32, i32
  }
  func.func @transform_3(%arg0: i32) -> (i32, i32) {
    %c0_i32 = arith.constant 0 : i32
    %c0_i32_0 = arith.constant 0 : i32
    %c0_i32_1 = arith.constant 0 : i32
    return %c0_i32, %c0_i32_0 : i32, i32
  }
  func.func @transform_4(%arg0: i32) -> (i32, i32) {
    %c0_i32 = arith.constant 0 : i32
    %c0_i32_0 = arith.constant 0 : i32
    return %arg0, %c0_i32 : i32, i32
  }
}

module attributes {stable_mosaic.version = 11 : i64} {
  func.func @_mm_kernel(%arg0: i32, %arg1: memref<256x256xbf16, #tpu.memory_space<vmem>>, %arg2: memref<256x32xbf16, #tpu.memory_space<vmem>>, %arg3: memref<1x32xf32, #tpu.memory_space<vmem>>, %arg4: memref<1x32xf32, #tpu.memory_space<vmem>>, %arg5: memref<256x32xf32, #tpu.memory_space<vmem>>) attributes {dimension_semantics = [#tpu.dimension_semantics<parallel>], iteration_bounds = array<i64: 2>, scalar_prefetch = 0 : i64, scratch_operands = 0 : i64, tpu.core_type = #tpu.core_type<tc>, window_params = [{transform_indices = @transform_0, window_bounds = array<i64: 256, 256>}, {pipeline_mode = #tpu.pipeline_mode<synchronous>, transform_indices = @transform_1, window_bounds = array<i64: 256, 32>}, {pipeline_mode = #tpu.pipeline_mode<synchronous>, transform_indices = @transform_2, window_bounds = array<i64: 1, 32>}, {pipeline_mode = #tpu.pipeline_mode<synchronous>, transform_indices = @transform_3, window_bounds = array<i64: 1, 32>}, {transform_indices = @transform_4, window_bounds = array<i64: 256, 32>}]} {
    %c0 = arith.constant 0 : index
    %c0_0 = arith.constant 0 : index
    %0 = vector.load %arg1[%c0, %c0_0] : memref<256x256xbf16, #tpu.memory_space<vmem>>, vector<256x256xbf16>
    %c0_1 = arith.constant 0 : index
    %c0_2 = arith.constant 0 : index
    %1 = vector.load %arg2[%c0_1, %c0_2] : memref<256x32xbf16, #tpu.memory_space<vmem>>, vector<256x32xbf16>
    %cst = arith.constant dense<0.000000e+00> : vector<256x32xf32>
    %2 = tpu.matmul %0, %1, %cst {dimension_numbers = #tpu.dot_dimension_numbers<[1], [0], [0], [1], [0, 0, 1, 1], [], []>} : vector<256x256xbf16>, vector<256x32xbf16>, vector<256x32xf32> -> vector<256x32xf32>
    %c0_3 = arith.constant 0 : index
    %c0_4 = arith.constant 0 : index
    %3 = vector.load %arg3[%c0_3, %c0_4] : memref<1x32xf32, #tpu.memory_space<vmem>>, vector<1x32xf32>
    %4 = vector.broadcast %3 : vector<1x32xf32> to vector<256x32xf32>
    %5 = arith.mulf %2, %4 : vector<256x32xf32>
    %c0_5 = arith.constant 0 : index
    %c0_6 = arith.constant 0 : index
    %6 = vector.load %arg4[%c0_5, %c0_6] : memref<1x32xf32, #tpu.memory_space<vmem>>, vector<1x32xf32>
    %7 = vector.broadcast %6 : vector<1x32xf32> to vector<256x32xf32>
    %8 = arith.addf %5, %7 : vector<256x32xf32>
    %c0_7 = arith.constant 0 : index
    %c0_8 = arith.constant 0 : index
    %9 = vector.load %arg5[%c0_7, %c0_8] : memref<256x32xf32, #tpu.memory_space<vmem>>, vector<256x32xf32>
    tpu.vector_store %arg5[%c0_7, %c0_8], %8 {strides = array<i32>} : memref<256x32xf32, #tpu.memory_space<vmem>>, vector<256x32xf32>,
    return
  }
  func.func @transform_0(%arg0: i32) -> (i32, i32) {
    %c0_i32 = arith.constant 0 : i32
    %c0_i32_0 = arith.constant 0 : i32
    return %arg0, %c0_i32 : i32, i32
  }
  func.func @transform_1(%arg0: i32) -> (i32, i32) {
    %c0_i32 = arith.constant 0 : i32
    %c0_i32_0 = arith.constant 0 : i32
    %c0_i32_1 = arith.constant 0 : i32
    return %c0_i32, %c0_i32_0 : i32, i32
  }
  func.func @transform_2(%arg0: i32) -> (i32, i32) {
    %c0_i32 = arith.constant 0 : i32
    %c0_i32_0 = arith.constant 0 : i32
    %c0_i32_1 = arith.constant 0 : i32
    return %c0_i32, %c0_i32_0 : i32, i32
  }
  func.func @transform_3(%arg0: i32) -> (i32, i32) {
    %c0_i32 = arith.constant 0 : i32
    %c0_i32_0 = arith.constant 0 : i32
    %c0_i32_1 = arith.constant 0 : i32
    return %c0_i32, %c0_i32_0 : i32, i32
  }
  func.func @transform_4(%arg0: i32) -> (i32, i32) {
    %c0_i32 = arith.constant 0 : i32
    %c0_i32_0 = arith.constant 0 : i32
    return %arg0, %c0_i32 : i32, i32
  }
}

</mosaic_0001>

<bundles_post_ra>
// kernel: spatial_encoder_forward.13
= control target key start
LH: loop header
LB: loop body
LE: loop exit
PB: predicated region body
PF: predicated region fallthrough
CT: control target
= control target key end

     0   :  { %s576_s15 = smov 0   ;;  %s723_s0 = inlined_call_operand.vmem [shape: f32[2,9,9,64], index: 0, kind: input, shape index: {}]   ;;  %s724_s1 = inlined_call_operand.vmem [shape: f32[2,9,9,64], index: 1, kind: input, shape index: {}]   ;;  %s725_s2 = inlined_call_operand.vmem [shape: f32[2,9,9,64], index: 2, kind: input, shape index: {}]   ;;  %s726_s3 = inlined_call_operand.vmem [shape: f32[2,9,9,64], index: 3, kind: input, shape index: {}]   ;;  %s727_s4 = inlined_call_operand.vmem [shape: f32[2,8,8,64], index: 4, kind: output, shape index: {}]  }
   0x1 LB: > { %s496_s16 = sadd.s32 4294967295, %s549_s15   ;;  %p500_p0 = scmp.ge.s32.totalorder %s549_s15, 1  ;;  %s549_s15 = sphi %s576_s15, %s14_s15  }
   0x2   : > { %p192_p1 = scmp.lt.s32.totalorder %s549_s15, 3 }
   0x4   : > { %p193_p2 = pnand %p500_p0, %p192_p1 }
   0x5   : > { %p233_p3 = scmp.lt.s32.totalorder (!%p193_p2), %s496_s16, 1  ;;  %vm396_vm0 = vcmask (!%p193_p2), 523264  }
   0x6   : > { %196 = sbr.rel (%p193_p2) target bundleno = 52 (0x34), region = 36 }
   0xd   : > { %s729_s16 = smov (!%p233_p3, %s496_s16), 1 }
   0xe   : > { %s534_s17 = smul.u32 144, %s729_s16  ;;  %s533_s30 = sshll.u32 %s729_s16, 6 }
   0xf   : > { %s677_s7 = scalar_lea.vmem %s727_s4, %s533_s30 }
  0x10   : > { %s590_s20 = scalar_lea.vmem %s723_s0, %s534_s17  ;;  %s595_s23 = scalar_lea.vmem %s724_s1, %s534_s17 }
  0x11   : > { %s600_s26 = scalar_lea.vmem %s725_s2, %s534_s17  ;;  %s605_s29 = scalar_lea.vmem %s726_s3, %s534_s17  ;;  %v258_v0 = vld [vmem:[%s590_s20] sm:$0xff]  ;;  %v507_v5 = vld [vmem:[%s590_s20 + $0x10] sm:$0xff] }
  0x12   : > { %v266_v1 = vld [vmem:[%s595_s23] sm:$0xff]  ;;  %v613_v6 = vld [vmem:[%s595_s23 + $0x10] sm:$0xff] }
  0x13   : > { %v282_v2 = vld [vmem:[%s590_s20 + $0x1] sm:$0xff]  ;;  %v274_v3 = vmax.f32 %v258_v0, %v266_v1  ;;  %v616_v7 = vld [vmem:[%s590_s20 + $0x11] sm:$0xff]  ;;  %v275_v10 = vmax.f32 %v507_v5, %v613_v6 }
  0x14   : > { %v298_v4 = vld [vmem:[%s600_s26] sm:$0xff]  ;;  %v299_v11 = vld [vmem:[%s600_s26 + $0x10] sm:$0xff] }
  0x15   : > { %v290_v8 = vmax.f32 %v274_v3, %v282_v2  ;;  %v314_v9 = vld [vmem:[%s605_s29] sm:$0xff]  ;;  %v291_v17 = vmax.f32 %v275_v10, %v616_v7  ;;  %v315_v18 = vld [vmem:[%s605_s29 + $0x10] sm:$0xff] }
  0x16   : > { %v508_v12 = vld [vmem:[%s590_s20 + $0x20] sm:$0xff]  ;;  %v509_v21 = vld [vmem:[%s590_s20 + $0x30] sm:$0xff] }
  0x17   : > { %v623_v13 = vld [vmem:[%s595_s23 + $0x20] sm:$0xff]  ;;  %v306_v15 = vmax.f32 %v290_v8, %v298_v4  ;;  %v635_v22 = vld [vmem:[%s595_s23 + $0x30] sm:$0xff]  ;;  %v307_v25 = vmax.f32 %v291_v17, %v299_v11 }
  0x18   : > { %v626_v14 = vld [vmem:[%s590_s20 + $0x21] sm:$0xff]  ;;  %v276_v19 = vmax.f32 %v508_v12, %v623_v13  ;;  %v638_v23 = vld [vmem:[%s590_s20 + $0x31] sm:$0xff]  ;;  %v277_v29 = vmax.f32 %v509_v21, %v635_v22 }
  0x19   : > { %v330_v16 = vld [vmem:[%s600_s26 + $0x1] sm:$0xff]  ;;  %v322_v24 = vmax.f32 %v306_v15, %v314_v9  ;;  %v331_v26 = vld [vmem:[%s600_s26 + $0x11] sm:$0xff]  ;;  %v323_v34 = vmax.f32 %v307_v25, %v315_v18 }
  0x1a   : > { %v300_v20 = vld [vmem:[%s600_s26 + $0x20] sm:$0xff]  ;;  %v292_v27 = vmax.f32 %v276_v19, %v626_v14  ;;  %v301_v30 = vld [vmem:[%s600_s26 + $0x30] sm:$0xff]  ;;  %v293_v37 = vmax.f32 %v277_v29, %v638_v23 }
  0x1b   : > { %v316_v28 = vld [vmem:[%s605_s29 + $0x20] sm:$0xff]  ;;  %v338_v33 = vmax.f32 %v322_v24, %v330_v16  ;;  %v317_v39 = vld [vmem:[%s605_s29 + $0x30] sm:$0xff]  ;;  %v339_v44 = vmax.f32 %v323_v34, %v331_v26 }
  0x1c   : > { %v510_v31 = vld [vmem:[%s590_s20 + $0x40] sm:$0xff]  ;;  %v308_v35 = vmax.f32 %v292_v27, %v300_v20  ;;  %v511_v41 = vld [vmem:[%s590_s20 + $0x50] sm:$0xff]  ;;  %v309_v46 = vmax.f32 %v293_v37, %v301_v30 }
  0x1d   : > { %v647_v32 = vld [vmem:[%s595_s23 + $0x40] sm:$0xff]  ;;  %v658_v42 = vld [vmem:[%s595_s23 + $0x50] sm:$0xff]  ;;  %v355_v43 = vmax.f32 %v338_v33, %v507_v5  ;;  %v356_v55 = vmax.f32 %v339_v44, %v508_v12 }
  0x1e   : > { %v332_v36 = vld [vmem:[%s600_s26 + $0x21] sm:$0xff]  ;;  %v278_v40 = vmax.f32 %v510_v31, %v647_v32  ;;  %v324_v45 = vmax.f32 %v308_v35, %v316_v28  ;;  %v527_v48 = vld [vmem:[%s590_s20 + $0x51] sm:$0xff]  ;;  %v279_v51 = vmax.f32 %v511_v41, %v658_v42  ;;  %v325_v57 = vmax.f32 %v309_v46, %v317_v39 }
  0x1f   : > { %v652_v38 = vld [vmem:[%s590_s20 + $0x41] sm:$0xff]  ;;  %v333_v49 = vld [vmem:[%s600_s26 + $0x31] sm:$0xff]  ;;  %v372_v54 = vmax.f32 %v355_v43, %v613_v6  ;;  %v373_v4 = vmax.f32 %v356_v55, %v623_v13 }
  0x20   : > { %v302_v47 = vld [vmem:[%s600_s26 + $0x40] sm:$0xff]  ;;  %v294_v50 = vmax.f32 %v278_v40, %v652_v38  ;;  %v340_v56 = vmax.f32 %v324_v45, %v332_v36  ;;  %v303_v59 = vld [vmem:[%s600_s26 + $0x50] sm:$0xff]  ;;  %v295_v63 = vmax.f32 %v279_v51, %v527_v48  ;;  %v341_v6 = vmax.f32 %v325_v57, %v333_v49 }
  0x21   : > { %v512_v52 = vld [vmem:[%s590_s20 + $0x60] sm:$0xff]  ;;  %v513_v1 = vld [vmem:[%s590_s20 + $0x70] sm:$0xff]  ;;  %v388_v3 = vmax.f32 %v372_v54, %v616_v7  ;;  %v389_v7 = vmax.f32 %v373_v4, %v626_v14 }
  0x22   : > { %v668_v53 = vld [vmem:[%s595_s23 + $0x60] sm:$0xff]  ;;  %v310_v61 = vmax.f32 %v294_v50, %v302_v47  ;;  %v521_v2 = vld [vmem:[%s595_s23 + $0x70] sm:$0xff]  ;;  %v357_v5 = vmax.f32 %v340_v56, %v509_v21  ;;  %v311_v12 = vmax.f32 %v295_v63, %v303_v59  ;;  %v358_v13 = vmax.f32 %v341_v6, %v510_v31 }
  0x23   : > { %v318_v58 = vld [vmem:[%s605_s29 + $0x40] sm:$0xff]  ;;  %v280_v0 = vmax.f32 %v512_v52, %v668_v53  ;;  %v319_v8 = vld [vmem:[%s605_s29 + $0x50] sm:$0xff]  ;;  %v281_v16 = vmax.f32 %v513_v1, %v521_v2  ;;  %397 = vst.msk [vmem:[%s677_s7] sm:$0xff] %vm396_vm0, %v388_v3  ;;  %398 = vst.msk [vmem:[%s677_s7 + $0x8] sm:$0xff] %vm396_vm0, %v389_v7 }
  0x24   : > { %v528_v60 = vld [vmem:[%s590_s20 + $0x61] sm:$0xff]  ;;  %v529_v10 = vld [vmem:[%s590_s20 + $0x71] sm:$0xff]  ;;  %v326_v11 = vmax.f32 %v310_v61, %v318_v58  ;;  %v374_v17 = vmax.f32 %v357_v5, %v635_v22  ;;  %v327_v24 = vmax.f32 %v311_v12, %v319_v8  ;;  %v375_v14 = vmax.f32 %v358_v13, %v647_v32 }
  0x25   : > { %v334_v62 = vld [vmem:[%s600_s26 + $0x41] sm:$0xff]  ;;  %v296_v15 = vmax.f32 %v280_v0, %v528_v60  ;;  %v335_v18 = vld [vmem:[%s600_s26 + $0x51] sm:$0xff]  ;;  %v297_v26 = vmax.f32 %v281_v16, %v529_v10 }
  0x26   : > { %v304_v9 = vld [vmem:[%s600_s26 + $0x60] sm:$0xff]  ;;  %v305_v20 = vld [vmem:[%s600_s26 + $0x70] sm:$0xff]  ;;  %v342_v21 = vmax.f32 %v326_v11, %v334_v62  ;;  %v390_v27 = vmax.f32 %v374_v17, %v638_v23  ;;  %v343_v30 = vmax.f32 %v327_v24, %v335_v18  ;;  %v391_v34 = vmax.f32 %v375_v14, %v652_v38 }
  0x27   : > { %v320_v19 = vld [vmem:[%s605_s29 + $0x60] sm:$0xff]  ;;  %v312_v25 = vmax.f32 %v296_v15, %v304_v9  ;;  %v321_v22 = vld [vmem:[%s605_s29 + $0x70] sm:$0xff]  ;;  %v313_v33 = vmax.f32 %v297_v26, %v305_v20 }
  0x28   : > { %v336_v28 = vld [vmem:[%s600_s26 + $0x61] sm:$0xff]  ;;  %v359_v29 = vmax.f32 %v342_v21, %v511_v41  ;;  %399 = vst.msk [vmem:[%s677_s7 + $0x10] sm:$0xff] %vm396_vm0, %v390_v27  ;;  %v337_v35 = vld [vmem:[%s600_s26 + $0x71] sm:$0xff]  ;;  %v360_v23 = vmax.f32 %v343_v30, %v512_v52  ;;  %400 = vst.msk [vmem:[%s677_s7 + $0x18] sm:$0xff] %vm396_vm0, %v391_v34 }
  0x29   : > { %v328_v31 = vmax.f32 %v312_v25, %v320_v19  ;;  %v329_v32 = vmax.f32 %v313_v33, %v321_v22  ;;  %v514_v39 = vld [vmem:[%s590_s20 + $0x80] sm:$0xff] }
  0x2a   : > { %v376_v36 = vmax.f32 %v359_v29, %v658_v42  ;;  %v377_v41 = vmax.f32 %v360_v23, %v668_v53  ;;  %v522_v45 = vld [vmem:[%s595_s23 + $0x80] sm:$0xff] }
  0x2b   : > { %v344_v37 = vmax.f32 %v328_v31, %v336_v28  ;;  %v345_v44 = vmax.f32 %v329_v32, %v337_v35  ;;  %v530_v47 = vld [vmem:[%s590_s20 + $0x81] sm:$0xff] }
  0x2c   : > { %v392_v40 = vmax.f32 %v376_v36, %v527_v48  ;;  %v393_v38 = vmax.f32 %v377_v41, %v528_v60 }
  0x2d   : > { %v361_v43 = vmax.f32 %v344_v37, %v513_v1  ;;  %v362_v42 = vmax.f32 %v345_v44, %v514_v39 }
  0x2e   : > { %401 = vst.msk [vmem:[%s677_s7 + $0x20] sm:$0xff] %vm396_vm0, %v392_v40  ;;  %402 = vst.msk [vmem:[%s677_s7 + $0x28] sm:$0xff] %vm396_vm0, %v393_v38 }
  0x2f   : > { %v378_v46 = vmax.f32 %v361_v43, %v521_v2  ;;  %v379_v50 = vmax.f32 %v362_v42, %v522_v45 }
  0x31   : > { %v394_v49 = vmax.f32 %v378_v46, %v529_v10  ;;  %v395_v51 = vmax.f32 %v379_v50, %v530_v47 }
  0x33   : > { %403 = vst.msk [vmem:[%s677_s7 + $0x30] sm:$0xff] %vm396_vm0, %v394_v49  ;;  %404 = vst.msk [vmem:[%s677_s7 + $0x38] sm:$0xff] %vm396_vm0, %v395_v51 }
  0x34 PF: > { %s14_s15 = sadd.s32 1, %s549_s15  }
  0x35   : > { %p11_p4 = scmp.ge.s32.totalorder %s14_s15, 4  }
  0x37   :  { %13 = sbr.rel (!%p11_p4) target bundleno = 1 (0x1), region = 77 }

// kernel: spatial_encoder_forward.12
= control target key start
LH: loop header
LB: loop body
LE: loop exit
PB: predicated region body
PF: predicated region fallthrough
CT: control target
= control target key end

     0   :  { %s1181_s15 = smov 0   ;;  %s1427_s0 = inlined_call_operand.vmem [shape: bf16[512,256], index: 0, kind: input, shape index: {}]   ;;  %s1428_s1 = inlined_call_operand.vmem [shape: bf16[256,64], index: 1, kind: input, shape index: {}]   ;;  %s1429_s2 = inlined_call_operand.vmem [shape: f32[1,64], index: 2, kind: input, shape index: {}]   ;;  %s1430_s3 = inlined_call_operand.vmem [shape: f32[1,64], index: 3, kind: input, shape index: {}]   ;;  %s1431_s4 = inlined_call_operand.vmem [shape: f32[512,64], index: 4, kind: output, shape index: {}]  }
   0x1 LB: > { %s885_s16 = sadd.s32 4294967295, %s1154_s15   ;;  %p889_p0 = scmp.ge.s32.totalorder %s1154_s15, 1  ;;  %s1154_s15 = sphi %s1181_s15, %s14_s15  }
   0x2   : > { %p164_p1 = scmp.lt.s32.totalorder %s1154_s15, 3 }
   0x4   : > { %p165_p2 = pnand %p889_p0, %p164_p1 }
   0x5   : > { %v1084_v0 = vld [vmem:[%s1428_s1 + $0x40] sm:$0xff] (!%p165_p2)   ;;  %s890_s19 = sshll.u32 (!%p165_p2), %s885_s16, 5  ;;  %v1086_v2 = vld [vmem:[%s1428_s1 + $0x48] sm:$0xff] (!%p165_p2)   ;;  %v1088_v4 = vld [vmem:[%s1428_s1 + $0x50] sm:$0xff] (!%p165_p2)   ;;  %vm796_vm0 = vcmask (!%p165_p2), 523264  }
   0x6   : > { %168 = sbr.rel (%p165_p2) target bundleno = 319 (0x13f), region = 36  ;;  %v1085_v1 = vld [vmem:[%s1428_s1] sm:$0xff] (!%p165_p2)   ;;  %948 = vmatprep.subr.bf16.mxu0 (!%p165_p2), %v1084_v0  ;;  %1060 = vmatprep.subr.bf16.mxu1 (!%p165_p2), %v1084_v0  ;;  %v1087_v3 = vld [vmem:[%s1428_s1 + $0x8] sm:$0xff] (!%p165_p2)   ;;  %p192_p3 = scmp.lt.s32.totalorder (!%p165_p2), %s890_s19, 63  ;;  %v1089_v5 = vld [vmem:[%s1428_s1 + $0x10] sm:$0xff] (!%p165_p2)  }
   0x7   : > { %949 = vmatpush3.bf16.msra.mxu0 (!%p165_p2), %v1085_v1  ;;  %1068 = vmatpush3.bf16.msra.mxu1 (!%p165_p2), %v1085_v1  ;;  %v1090_v6 = vld [vmem:[%s1428_s1 + $0x58] sm:$0xff] (!%p165_p2)   ;;  %v1092_v8 = vld [vmem:[%s1428_s1 + $0x60] sm:$0xff] (!%p165_p2)   ;;  %v1094_v10 = vld [vmem:[%s1428_s1 + $0x68] sm:$0xff] (!%p165_p2)  }
   0x8   : > { %950 = vmatprep.subr.bf16.mxu0 (!%p165_p2), %v1086_v2  ;;  %1061 = vmatprep.subr.bf16.mxu1 (!%p165_p2), %v1086_v2  ;;  %v1091_v7 = vld [vmem:[%s1428_s1 + $0x18] sm:$0xff] (!%p165_p2)   ;;  %v1093_v9 = vld [vmem:[%s1428_s1 + $0x20] sm:$0xff] (!%p165_p2)   ;;  %v1095_v13 = vld [vmem:[%s1428_s1 + $0x28] sm:$0xff] (!%p165_p2)  }
   0x9   : > { %v1096_v14 = vld [vmem:[%s1428_s1 + $0x70] sm:$0xff] (!%p165_p2)   ;;  %v1098_v16 = vld [vmem:[%s1428_s1 + $0x78] sm:$0xff] (!%p165_p2)   ;;  %v1282_v51 = vld [vmem:[%s1429_s2] ss:$0 sm:$0xff] (!%p165_p2) }
   0xa   : > { %v1097_v15 = vld [vmem:[%s1428_s1 + $0x30] sm:$0xff] (!%p165_p2)   ;;  %v1099_v17 = vld [vmem:[%s1428_s1 + $0x38] sm:$0xff] (!%p165_p2)   ;;  %v1287_v57 = vld [vmem:[%s1430_s3] ss:$0 sm:$0xff] (!%p165_p2) }
   0xb   : > { %951 = vmatpush3.bf16.msra.mxu0 (!%p165_p2), %v1087_v3  ;;  %1069 = vmatpush3.bf16.msra.mxu1 (!%p165_p2), %v1087_v3 }
   0xc   : > { %952 = vmatprep.subr.bf16.mxu0 (!%p165_p2), %v1088_v4  ;;  %1062 = vmatprep.subr.bf16.mxu1 (!%p165_p2), %v1088_v4 }
   0xd   : > { %s1433_s19 = smov (!%p192_p3, %s890_s19), 63 }
   0xe   : > { %s947_s8 = sshll.u32 %s1433_s19, 3 }
   0xf   : > { %953 = vmatpush3.bf16.msra.mxu0 %v1089_v5  ;;  %1070 = vmatpush3.bf16.msra.mxu1 %v1089_v5  ;;  %s1224_s13 = scalar_lea.vmem %s1427_s0, %s947_s8  ;;  %s1300_s11 = scalar_lea.vmem %s1431_s4, %s947_s8 }
  0x10   : > { %954 = vmatprep.subr.bf16.mxu0 %v1090_v6  ;;  %1063 = vmatprep.subr.bf16.mxu1 %v1090_v6  ;;  %v1102_v11 = vld [vmem:[%s1224_s13 + $0x4] ss:$8 sps:$4 sm:$0xff]   ;;  %v1100_v18 = vld [vmem:[%s1224_s13] ss:$8 sps:$4 sm:$0xff]   ;;  %v1106_v20 = vld [vmem:[%s1224_s13 + $0x14] ss:$8 sps:$4 sm:$0xff]  }
  0x11   : > { %v1105_v12 = vld [vmem:[%s1224_s13 + $0x84] ss:$8 sps:$4 sm:$0xff]   ;;  %557 = vmatprep.mubr.bf16.mxu0 %v1102_v11  ;;  %v1103_v19 = vld [vmem:[%s1224_s13 + $0x80] ss:$8 sps:$4 sm:$0xff]   ;;  %v1108_v21 = vld [vmem:[%s1224_s13 + $0x94] ss:$8 sps:$4 sm:$0xff]  }
  0x12   : > { %621 = vmatprep.mubr.bf16.mxu1 %v1105_v12  ;;  %v1110_v22 = vld [vmem:[%s1224_s13 + $0x10] ss:$8 sps:$4 sm:$0xff]   ;;  %v1112_v24 = vld [vmem:[%s1224_s13 + $0x24] ss:$8 sps:$4 sm:$0xff]   ;;  %v1116_v26 = vld [vmem:[%s1224_s13 + $0x20] ss:$8 sps:$4 sm:$0xff]  }
  0x13   : > { %955 = vmatpush3.bf16.msra.mxu0 %v1091_v7  ;;  %1071 = vmatpush3.bf16.msra.mxu1 %v1091_v7  ;;  %v1111_v23 = vld [vmem:[%s1224_s13 + $0x90] ss:$8 sps:$4 sm:$0xff]   ;;  %v1114_v25 = vld [vmem:[%s1224_s13 + $0xa4] ss:$8 sps:$4 sm:$0xff]   ;;  %v1117_v27 = vld [vmem:[%s1224_s13 + $0xa0] ss:$8 sps:$4 sm:$0xff]  }
  0x14   : > { %956 = vmatprep.subr.bf16.mxu0 %v1092_v8  ;;  %1064 = vmatprep.subr.bf16.mxu1 %v1092_v8  ;;  %v1118_v28 = vld [vmem:[%s1224_s13 + $0x34] ss:$8 sps:$4 sm:$0xff]   ;;  %v1122_v30 = vld [vmem:[%s1224_s13 + $0x30] ss:$8 sps:$4 sm:$0xff]   ;;  %v1124_v32 = vld [vmem:[%s1224_s13 + $0x44] ss:$8 sps:$4 sm:$0xff]  }
  0x15   : > { %v1120_v29 = vld [vmem:[%s1224_s13 + $0xb4] ss:$8 sps:$4 sm:$0xff]   ;;  %v1123_v31 = vld [vmem:[%s1224_s13 + $0xb0] ss:$8 sps:$4 sm:$0xff]   ;;  %v1126_v33 = vld [vmem:[%s1224_s13 + $0xc4] ss:$8 sps:$4 sm:$0xff]  }
  0x16   : > { %v1128_v34 = vld [vmem:[%s1224_s13 + $0x40] ss:$8 sps:$4 sm:$0xff]   ;;  %v1130_v36 = vld [vmem:[%s1224_s13 + $0x54] ss:$8 sps:$4 sm:$0xff]   ;;  %v1134_v38 = vld [vmem:[%s1224_s13 + $0x50] ss:$8 sps:$4 sm:$0xff]  }
  0x17   : > { %957 = vmatpush3.bf16.msra.mxu0 %v1093_v9  ;;  %1072 = vmatpush3.bf16.msra.mxu1 %v1093_v9  ;;  %v1129_v35 = vld [vmem:[%s1224_s13 + $0xc0] ss:$8 sps:$4 sm:$0xff]   ;;  %v1132_v37 = vld [vmem:[%s1224_s13 + $0xd4] ss:$8 sps:$4 sm:$0xff]   ;;  %v1135_v39 = vld [vmem:[%s1224_s13 + $0xd0] ss:$8 sps:$4 sm:$0xff]  }
  0x18   : > { %958 = vmatprep.subr.bf16.mxu0 %v1094_v10  ;;  %1065 = vmatprep.subr.bf16.mxu1 %v1094_v10  ;;  %v1136_v40 = vld [vmem:[%s1224_s13 + $0x64] ss:$8 sps:$4 sm:$0xff]   ;;  %v1140_v42 = vld [vmem:[%s1224_s13 + $0x60] ss:$8 sps:$4 sm:$0xff]   ;;  %v1142_v44 = vld [vmem:[%s1224_s13 + $0x74] ss:$8 sps:$4 sm:$0xff]  }
  0x19   : > { %v1138_v41 = vld [vmem:[%s1224_s13 + $0xe4] ss:$8 sps:$4 sm:$0xff]   ;;  %v1141_v43 = vld [vmem:[%s1224_s13 + $0xe0] ss:$8 sps:$4 sm:$0xff]   ;;  %v1144_v45 = vld [vmem:[%s1224_s13 + $0xf4] ss:$8 sps:$4 sm:$0xff]  }
  0x1a   : > { %v1146_v46 = vld [vmem:[%s1224_s13 + $0x70] ss:$8 sps:$4 sm:$0xff]  }
  0x1b   : > { %959 = vmatpush3.bf16.msra.mxu0 %v1095_v13  ;;  %1073 = vmatpush3.bf16.msra.mxu1 %v1095_v13  ;;  %v1147_v47 = vld [vmem:[%s1224_s13 + $0xf0] ss:$8 sps:$4 sm:$0xff]  }
  0x1c   : > { %960 = vmatprep.subr.bf16.mxu0 %v1096_v14  ;;  %1066 = vmatprep.subr.bf16.mxu1 %v1096_v14 }
  0x1f   : > { %961 = vmatpush3.bf16.msra.mxu0 %v1097_v15  ;;  %1074 = vmatpush3.bf16.msra.mxu1 %v1097_v15 }
  0x20   : > { %962 = vmatprep.subr.bf16.mxu0 %v1098_v16  ;;  %1067 = vmatprep.subr.bf16.mxu1 %v1098_v16 }
  0x23   : > { %963 = vmatpush3.bf16.msra.mxu0 %v1099_v17  ;;  %1075 = vmatpush3.bf16.msra.mxu1 %v1099_v17 }
  0x26   : > { %558 = vmatmul.mubr.bf16.vlgmr.msra.gmra.mrb[0].mxu0 %v1100_v18  ;;  %622 = vmatmul.mubr.bf16.vlgmr.msra.gmra.mrb[0].mxu1 %v1103_v19 }
  0x27   : > { %565 = vmatprep.mubr.bf16.mxu0 %v1106_v20  ;;  %629 = vmatprep.mubr.bf16.mxu1 %v1108_v21 }
  0x2e   : > { %566 = vmatmul.mubr.bf16.gmra.mrb[4].mxu0 %v1110_v22  ;;  %630 = vmatmul.mubr.bf16.gmra.mrb[4].mxu1 %v1111_v23 }
  0x2f   : > { %573 = vmatprep.mubr.bf16.mxu0 %v1112_v24  ;;  %637 = vmatprep.mubr.bf16.mxu1 %v1114_v25 }
  0x36   : > { %574 = vmatmul.mubr.bf16.gmra.mrb[8].mxu0 %v1116_v26  ;;  %638 = vmatmul.mubr.bf16.gmra.mrb[8].mxu1 %v1117_v27 }
  0x37   : > { %581 = vmatprep.mubr.bf16.mxu0 %v1118_v28  ;;  %645 = vmatprep.mubr.bf16.mxu1 %v1120_v29 }
  0x3e   : > { %582 = vmatmul.mubr.bf16.gmra.mrb[12].mxu0 %v1122_v30  ;;  %646 = vmatmul.mubr.bf16.gmra.mrb[12].mxu1 %v1123_v31 }
  0x3f   : > { %589 = vmatprep.mubr.bf16.mxu0 %v1124_v32  ;;  %653 = vmatprep.mubr.bf16.mxu1 %v1126_v33 }
  0x46   : > { %590 = vmatmul.mubr.bf16.gmra.mrb[16].mxu0 %v1128_v34  ;;  %654 = vmatmul.mubr.bf16.gmra.mrb[16].mxu1 %v1129_v35 }
  0x47   : > { %597 = vmatprep.mubr.bf16.mxu0 %v1130_v36  ;;  %661 = vmatprep.mubr.bf16.mxu1 %v1132_v37 }
  0x4e   : > { %598 = vmatmul.mubr.bf16.gmra.mrb[20].mxu0 %v1134_v38  ;;  %662 = vmatmul.mubr.bf16.gmra.mrb[20].mxu1 %v1135_v39 }
  0x4f   : > { %605 = vmatprep.mubr.bf16.mxu0 %v1136_v40  ;;  %669 = vmatprep.mubr.bf16.mxu1 %v1138_v41 }
  0x56   : > { %606 = vmatmul.mubr.bf16.gmra.mrb[24].mxu0 %v1140_v42  ;;  %670 = vmatmul.mubr.bf16.gmra.mrb[24].mxu1 %v1141_v43 }
  0x57   : > { %613 = vmatprep.mubr.bf16.mxu0 %v1142_v44  ;;  %677 = vmatprep.mubr.bf16.mxu1 %v1144_v45 }
  0x5e   : > { %614 = vmatmul.mubr.bf16.gmra.mrb[28].mxu0 %v1146_v46  ;;  %678 = vmatmul.mubr.bf16.gmra.mrb[28].mxu1 %v1147_v47 }
  0xf9   : > { %v964_v48 = vpop.f32.mrb[0].mxu0  ;;  %v1012_v49 = vpop.f32.mrb[0].mxu1 }
  0xfa   : > { %v965_v50 = vpop.f32.mrb[1].mxu0  ;;  %v1013_v52 = vpop.f32.mrb[1].mxu1 }
  0xfb   : > { %v966_v53 = vadd.f32 %v965_v50, %v964_v48  ;;  %v1014_v54 = vadd.f32 %v1013_v52, %v1012_v49  ;;  %v967_v55 = vpop.f32.mrb[2].mxu0  ;;  %v1015_v56 = vpop.f32.mrb[2].mxu1 }
  0xfc   : > { %v968_v58 = vpop.f32.mrb[3].mxu0  ;;  %v1016_v59 = vpop.f32.mrb[3].mxu1 }
  0xfd   : > { %v693_v60 = vmul.f32 %v966_v53, %v1282_v51  ;;  %v709_v61 = vmul.f32 %v1014_v54, %v1282_v51  ;;  %v969_v62 = vadd.f32 %v968_v58, %v967_v55  ;;  %v1017_v63 = vadd.f32 %v1016_v59, %v1015_v56 }
  0xff   : > { %v732_v0 = vadd.f32 %v1287_v57, %v693_v60  ;;  %v748_v1 = vadd.f32 %v1287_v57, %v709_v61  ;;  %v694_v2 = vmul.f32 %v969_v62, %v1282_v51  ;;  %v710_v3 = vmul.f32 %v1017_v63, %v1282_v51 }
 0x101   : > { %v764_v4 = vmax.f32 %v732_v0, 0.0  ;;  %v780_v5 = vmax.f32 %v748_v1, 0.0  ;;  %v733_v6 = vadd.f32 %v1287_v57, %v694_v2  ;;  %v749_v7 = vadd.f32 %v1287_v57, %v710_v3  ;;  %v970_v8 = vpop.f32.mrb[4].mxu0  ;;  %v1018_v9 = vpop.f32.mrb[4].mxu1 }
 0x102   : > { %v971_v10 = vpop.f32.mrb[5].mxu0  ;;  %v1019_v11 = vpop.f32.mrb[5].mxu1 }
 0x103   : > { %797 = vst.msk [vmem:[%s1300_s11] sm:$0xff] %vm796_vm0, %v764_v4  ;;  %813 = vst.msk [vmem:[%s1300_s11 + $0x80] sm:$0xff] %vm796_vm0, %v780_v5  ;;  %v765_v12 = vmax.f32 %v733_v6, 0.0  ;;  %v781_v13 = vmax.f32 %v749_v7, 0.0  ;;  %v972_v14 = vadd.f32 %v971_v10, %v970_v8  ;;  %v1020_v15 = vadd.f32 %v1019_v11, %v1018_v9  ;;  %v973_v16 = vpop.f32.mrb[6].mxu0  ;;  %v1021_v17 = vpop.f32.mrb[6].mxu1 }
 0x104   : > { %v974_v18 = vpop.f32.mrb[7].mxu0  ;;  %v1022_v19 = vpop.f32.mrb[7].mxu1 }
 0x105   : > { %798 = vst.msk [vmem:[%s1300_s11 + $0x8] sm:$0xff] %vm796_vm0, %v765_v12  ;;  %814 = vst.msk [vmem:[%s1300_s11 + $0x88] sm:$0xff] %vm796_vm0, %v781_v13  ;;  %v695_v20 = vmul.f32 %v972_v14, %v1282_v51  ;;  %v711_v21 = vmul.f32 %v1020_v15, %v1282_v51  ;;  %v975_v22 = vadd.f32 %v974_v18, %v973_v16 }
 0x106   : > { %v1023_v23 = vadd.f32 %v1022_v19, %v1021_v17 }
 0x107   : > { %v734_v24 = vadd.f32 %v1287_v57, %v695_v20  ;;  %v750_v25 = vadd.f32 %v1287_v57, %v711_v21  ;;  %v696_v26 = vmul.f32 %v975_v22, %v1282_v51 }
 0x108   : > { %v712_v27 = vmul.f32 %v1023_v23, %v1282_v51 }
 0x109   : > { %v766_v28 = vmax.f32 %v734_v24, 0.0  ;;  %v782_v29 = vmax.f32 %v750_v25, 0.0  ;;  %v735_v30 = vadd.f32 %v1287_v57, %v696_v26  ;;  %v976_v32 = vpop.f32.mrb[8].mxu0  ;;  %v1024_v33 = vpop.f32.mrb[8].mxu1 }
 0x10a   : > { %v751_v31 = vadd.f32 %v1287_v57, %v712_v27  ;;  %v977_v34 = vpop.f32.mrb[9].mxu0  ;;  %v1025_v35 = vpop.f32.mrb[9].mxu1 }
 0x10b   : > { %799 = vst.msk [vmem:[%s1300_s11 + $0x10] sm:$0xff] %vm796_vm0, %v766_v28  ;;  %815 = vst.msk [vmem:[%s1300_s11 + $0x90] sm:$0xff] %vm796_vm0, %v782_v29  ;;  %v767_v36 = vmax.f32 %v735_v30, 0.0  ;;  %v978_v38 = vadd.f32 %v977_v34, %v976_v32  ;;  %v1026_v39 = vadd.f32 %v1025_v35, %v1024_v33  ;;  %v979_v40 = vpop.f32.mrb[10].mxu0  ;;  %v1027_v41 = vpop.f32.mrb[10].mxu1 }
 0x10c   : > { %v783_v37 = vmax.f32 %v751_v31, 0.0  ;;  %v980_v42 = vpop.f32.mrb[11].mxu0  ;;  %v1028_v43 = vpop.f32.mrb[11].mxu1 }
 0x10d   : > { %800 = vst.msk [vmem:[%s1300_s11 + $0x18] sm:$0xff] %vm796_vm0, %v767_v36  ;;  %v697_v44 = vmul.f32 %v978_v38, %v1282_v51  ;;  %v713_v45 = vmul.f32 %v1026_v39, %v1282_v51  ;;  %v981_v46 = vadd.f32 %v980_v42, %v979_v40  ;;  %v1029_v47 = vadd.f32 %v1028_v43, %v1027_v41 }
 0x10e   : > { %816 = vst.msk [vmem:[%s1300_s11 + $0x98] sm:$0xff] %vm796_vm0, %v783_v37 }
 0x10f   : > { %v736_v48 = vadd.f32 %v1287_v57, %v697_v44  ;;  %v752_v49 = vadd.f32 %v1287_v57, %v713_v45  ;;  %v698_v50 = vmul.f32 %v981_v46, %v1282_v51  ;;  %v714_v52 = vmul.f32 %v1029_v47, %v1282_v51 }
 0x111   : > { %v768_v53 = vmax.f32 %v736_v48, 0.0  ;;  %v784_v54 = vmax.f32 %v752_v49, 0.0  ;;  %v737_v55 = vadd.f32 %v1287_v57, %v698_v50  ;;  %v753_v56 = vadd.f32 %v1287_v57, %v714_v52  ;;  %v982_v58 = vpop.f32.mrb[12].mxu0  ;;  %v1030_v59 = vpop.f32.mrb[12].mxu1 }
 0x112   : > { %v983_v60 = vpop.f32.mrb[13].mxu0  ;;  %v1031_v61 = vpop.f32.mrb[13].mxu1 }
 0x113   : > { %801 = vst.msk [vmem:[%s1300_s11 + $0x20] sm:$0xff] %vm796_vm0, %v768_v53  ;;  %817 = vst.msk [vmem:[%s1300_s11 + $0xa0] sm:$0xff] %vm796_vm0, %v784_v54  ;;  %v769_v62 = vmax.f32 %v737_v55, 0.0  ;;  %v785_v63 = vmax.f32 %v753_v56, 0.0  ;;  %v984_v0 = vadd.f32 %v983_v60, %v982_v58  ;;  %v1032_v1 = vadd.f32 %v1031_v61, %v1030_v59  ;;  %v985_v2 = vpop.f32.mrb[14].mxu0  ;;  %v1033_v3 = vpop.f32.mrb[14].mxu1 }
 0x114   : > { %v986_v4 = vpop.f32.mrb[15].mxu0  ;;  %v1034_v5 = vpop.f32.mrb[15].mxu1 }
 0x115   : > { %802 = vst.msk [vmem:[%s1300_s11 + $0x28] sm:$0xff] %vm796_vm0, %v769_v62  ;;  %818 = vst.msk [vmem:[%s1300_s11 + $0xa8] sm:$0xff] %vm796_vm0, %v785_v63  ;;  %v699_v6 = vmul.f32 %v984_v0, %v1282_v51  ;;  %v715_v7 = vmul.f32 %v1032_v1, %v1282_v51  ;;  %v987_v8 = vadd.f32 %v986_v4, %v985_v2 }
 0x116   : > { %v1035_v9 = vadd.f32 %v1034_v5, %v1033_v3 }
 0x117   : > { %v738_v10 = vadd.f32 %v1287_v57, %v699_v6  ;;  %v754_v11 = vadd.f32 %v1287_v57, %v715_v7  ;;  %v700_v12 = vmul.f32 %v987_v8, %v1282_v51 }
 0x118   : > { %v716_v13 = vmul.f32 %v1035_v9, %v1282_v51 }
 0x119   : > { %v770_v14 = vmax.f32 %v738_v10, 0.0  ;;  %v786_v15 = vmax.f32 %v754_v11, 0.0  ;;  %v739_v16 = vadd.f32 %v1287_v57, %v700_v12  ;;  %v988_v18 = vpop.f32.mrb[16].mxu0  ;;  %v1036_v19 = vpop.f32.mrb[16].mxu1 }
 0x11a   : > { %v755_v17 = vadd.f32 %v1287_v57, %v716_v13  ;;  %v989_v20 = vpop.f32.mrb[17].mxu0  ;;  %v1037_v21 = vpop.f32.mrb[17].mxu1 }
 0x11b   : > { %803 = vst.msk [vmem:[%s1300_s11 + $0x30] sm:$0xff] %vm796_vm0, %v770_v14  ;;  %819 = vst.msk [vmem:[%s1300_s11 + $0xb0] sm:$0xff] %vm796_vm0, %v786_v15  ;;  %v771_v22 = vmax.f32 %v739_v16, 0.0  ;;  %v990_v24 = vadd.f32 %v989_v20, %v988_v18  ;;  %v1038_v25 = vadd.f32 %v1037_v21, %v1036_v19  ;;  %v991_v26 = vpop.f32.mrb[18].mxu0  ;;  %v1039_v27 = vpop.f32.mrb[18].mxu1 }
 0x11c   : > { %v787_v23 = vmax.f32 %v755_v17, 0.0  ;;  %v992_v28 = vpop.f32.mrb[19].mxu0  ;;  %v1040_v29 = vpop.f32.mrb[19].mxu1 }
 0x11d   : > { %804 = vst.msk [vmem:[%s1300_s11 + $0x38] sm:$0xff] %vm796_vm0, %v771_v22  ;;  %v701_v30 = vmul.f32 %v990_v24, %v1282_v51  ;;  %v717_v31 = vmul.f32 %v1038_v25, %v1282_v51  ;;  %v993_v32 = vadd.f32 %v992_v28, %v991_v26  ;;  %v1041_v33 = vadd.f32 %v1040_v29, %v1039_v27 }
 0x11e   : > { %820 = vst.msk [vmem:[%s1300_s11 + $0xb8] sm:$0xff] %vm796_vm0, %v787_v23 }
 0x11f   : > { %v740_v34 = vadd.f32 %v1287_v57, %v701_v30  ;;  %v756_v35 = vadd.f32 %v1287_v57, %v717_v31  ;;  %v702_v36 = vmul.f32 %v993_v32, %v1282_v51  ;;  %v718_v37 = vmul.f32 %v1041_v33, %v1282_v51 }
 0x121   : > { %v772_v38 = vmax.f32 %v740_v34, 0.0  ;;  %v788_v39 = vmax.f32 %v756_v35, 0.0  ;;  %v741_v40 = vadd.f32 %v1287_v57, %v702_v36  ;;  %v757_v41 = vadd.f32 %v1287_v57, %v718_v37  ;;  %v994_v42 = vpop.f32.mrb[20].mxu0  ;;  %v1042_v43 = vpop.f32.mrb[20].mxu1 }
 0x122   : > { %v995_v44 = vpop.f32.mrb[21].mxu0  ;;  %v1043_v45 = vpop.f32.mrb[21].mxu1 }
 0x123   : > { %805 = vst.msk [vmem:[%s1300_s11 + $0x40] sm:$0xff] %vm796_vm0, %v772_v38  ;;  %821 = vst.msk [vmem:[%s1300_s11 + $0xc0] sm:$0xff] %vm796_vm0, %v788_v39  ;;  %v773_v46 = vmax.f32 %v741_v40, 0.0  ;;  %v789_v47 = vmax.f32 %v757_v41, 0.0  ;;  %v996_v48 = vadd.f32 %v995_v44, %v994_v42  ;;  %v1044_v49 = vadd.f32 %v1043_v45, %v1042_v43  ;;  %v997_v50 = vpop.f32.mrb[22].mxu0  ;;  %v1045_v52 = vpop.f32.mrb[22].mxu1 }
 0x124   : > { %v998_v53 = vpop.f32.mrb[23].mxu0  ;;  %v1046_v54 = vpop.f32.mrb[23].mxu1 }
 0x125   : > { %806 = vst.msk [vmem:[%s1300_s11 + $0x48] sm:$0xff] %vm796_vm0, %v773_v46  ;;  %822 = vst.msk [vmem:[%s1300_s11 + $0xc8] sm:$0xff] %vm796_vm0, %v789_v47  ;;  %v703_v55 = vmul.f32 %v996_v48, %v1282_v51  ;;  %v719_v56 = vmul.f32 %v1044_v49, %v1282_v51  ;;  %v999_v58 = vadd.f32 %v998_v53, %v997_v50 }
 0x126   : > { %v1047_v59 = vadd.f32 %v1046_v54, %v1045_v52 }
 0x127   : > { %v742_v60 = vadd.f32 %v1287_v57, %v703_v55  ;;  %v758_v61 = vadd.f32 %v1287_v57, %v719_v56  ;;  %v704_v62 = vmul.f32 %v999_v58, %v1282_v51 }
 0x128   : > { %v720_v63 = vmul.f32 %v1047_v59, %v1282_v51 }
 0x129   : > { %v774_v0 = vmax.f32 %v742_v60, 0.0  ;;  %v790_v1 = vmax.f32 %v758_v61, 0.0  ;;  %v743_v2 = vadd.f32 %v1287_v57, %v704_v62  ;;  %v1000_v4 = vpop.f32.mrb[24].mxu0  ;;  %v1048_v5 = vpop.f32.mrb[24].mxu1 }
 0x12a   : > { %v759_v3 = vadd.f32 %v1287_v57, %v720_v63  ;;  %v1001_v6 = vpop.f32.mrb[25].mxu0  ;;  %v1049_v7 = vpop.f32.mrb[25].mxu1 }
 0x12b   : > { %807 = vst.msk [vmem:[%s1300_s11 + $0x50] sm:$0xff] %vm796_vm0, %v774_v0  ;;  %823 = vst.msk [vmem:[%s1300_s11 + $0xd0] sm:$0xff] %vm796_vm0, %v790_v1  ;;  %v775_v8 = vmax.f32 %v743_v2, 0.0  ;;  %v1002_v10 = vadd.f32 %v1001_v6, %v1000_v4  ;;  %v1050_v11 = vadd.f32 %v1049_v7, %v1048_v5  ;;  %v1003_v12 = vpop.f32.mrb[26].mxu0  ;;  %v1051_v13 = vpop.f32.mrb[26].mxu1 }
 0x12c   : > { %v791_v9 = vmax.f32 %v759_v3, 0.0  ;;  %v1004_v14 = vpop.f32.mrb[27].mxu0  ;;  %v1052_v15 = vpop.f32.mrb[27].mxu1 }
 0x12d   : > { %808 = vst.msk [vmem:[%s1300_s11 + $0x58] sm:$0xff] %vm796_vm0, %v775_v8  ;;  %v705_v16 = vmul.f32 %v1002_v10, %v1282_v51  ;;  %v721_v17 = vmul.f32 %v1050_v11, %v1282_v51  ;;  %v1005_v18 = vadd.f32 %v1004_v14, %v1003_v12  ;;  %v1053_v19 = vadd.f32 %v1052_v15, %v1051_v13 }
 0x12e   : > { %824 = vst.msk [vmem:[%s1300_s11 + $0xd8] sm:$0xff] %vm796_vm0, %v791_v9 }
 0x12f   : > { %v744_v20 = vadd.f32 %v1287_v57, %v705_v16  ;;  %v760_v21 = vadd.f32 %v1287_v57, %v721_v17  ;;  %v706_v22 = vmul.f32 %v1005_v18, %v1282_v51  ;;  %v722_v23 = vmul.f32 %v1053_v19, %v1282_v51 }
 0x131   : > { %v776_v24 = vmax.f32 %v744_v20, 0.0  ;;  %v792_v25 = vmax.f32 %v760_v21, 0.0  ;;  %v745_v26 = vadd.f32 %v1287_v57, %v706_v22  ;;  %v761_v27 = vadd.f32 %v1287_v57, %v722_v23  ;;  %v1006_v28 = vpop.f32.mrb[28].mxu0  ;;  %v1054_v29 = vpop.f32.mrb[28].mxu1 }
 0x132   : > { %v1007_v30 = vpop.f32.mrb[29].mxu0  ;;  %v1055_v31 = vpop.f32.mrb[29].mxu1 }
 0x133   : > { %809 = vst.msk [vmem:[%s1300_s11 + $0x60] sm:$0xff] %vm796_vm0, %v776_v24  ;;  %825 = vst.msk [vmem:[%s1300_s11 + $0xe0] sm:$0xff] %vm796_vm0, %v792_v25  ;;  %v777_v32 = vmax.f32 %v745_v26, 0.0  ;;  %v793_v33 = vmax.f32 %v761_v27, 0.0  ;;  %v1008_v34 = vadd.f32 %v1007_v30, %v1006_v28  ;;  %v1056_v35 = vadd.f32 %v1055_v31, %v1054_v29  ;;  %v1009_v36 = vpop.f32.mrb[30].mxu0  ;;  %v1057_v37 = vpop.f32.mrb[30].mxu1 }
 0x134   : > { %v1010_v38 = vpop.f32.mrb[31].mxu0  ;;  %v1058_v39 = vpop.f32.mrb[31].mxu1 }
 0x135   : > { %810 = vst.msk [vmem:[%s1300_s11 + $0x68] sm:$0xff] %vm796_vm0, %v777_v32  ;;  %826 = vst.msk [vmem:[%s1300_s11 + $0xe8] sm:$0xff] %vm796_vm0, %v793_v33  ;;  %v707_v40 = vmul.f32 %v1008_v34, %v1282_v51  ;;  %v723_v41 = vmul.f32 %v1056_v35, %v1282_v51  ;;  %v1011_v42 = vadd.f32 %v1010_v38, %v1009_v36 }
 0x136   : > { %v1059_v43 = vadd.f32 %v1058_v39, %v1057_v37 }
 0x137   : > { %v746_v44 = vadd.f32 %v1287_v57, %v707_v40  ;;  %v762_v45 = vadd.f32 %v1287_v57, %v723_v41  ;;  %v708_v46 = vmul.f32 %v1011_v42, %v1282_v51 }
 0x138   : > { %v724_v47 = vmul.f32 %v1059_v43, %v1282_v51 }
 0x139   : > { %v778_v48 = vmax.f32 %v746_v44, 0.0  ;;  %v794_v49 = vmax.f32 %v762_v45, 0.0  ;;  %v747_v50 = vadd.f32 %v1287_v57, %v708_v46 }
 0x13a   : > { %v763_v52 = vadd.f32 %v1287_v57, %v724_v47 }
 0x13b   : > { %811 = vst.msk [vmem:[%s1300_s11 + $0x70] sm:$0xff] %vm796_vm0, %v778_v48  ;;  %827 = vst.msk [vmem:[%s1300_s11 + $0xf0] sm:$0xff] %vm796_vm0, %v794_v49  ;;  %v779_v53 = vmax.f32 %v747_v50, 0.0 }
 0x13c   : > { %v795_v54 = vmax.f32 %v763_v52, 0.0 }
 0x13d   : > { %812 = vst.msk [vmem:[%s1300_s11 + $0x78] sm:$0xff] %vm796_vm0, %v779_v53 }
 0x13e   : > { %828 = vst.msk [vmem:[%s1300_s11 + $0xf8] sm:$0xff] %vm796_vm0, %v795_v54 }
 0x13f PF: > { %s14_s15 = sadd.s32 1, %s1154_s15  }
 0x140   : > { %p11_p4 = scmp.ge.s32.totalorder %s14_s15, 4  }
 0x142   :  { %13 = sbr.rel (!%p11_p4) target bundleno = 1 (0x1), region = 66 }

// kernel: spatial_encoder_forward.14
= control target key start
LH: loop header
LB: loop body
LE: loop exit
PB: predicated region body
PF: predicated region fallthrough
CT: control target
= control target key end

     0   :  { %s3810_s24 = smov 0   ;;  %s4426_s0 = inlined_call_operand.vmem [shape: f32[2,10,10,64], index: 0, kind: input, shape index: {}]   ;;  %s4427_s1 = inlined_call_operand.vmem [shape: bf16[9,64,64], index: 1, kind: input, shape index: {}]   ;;  %s4428_s2 = inlined_call_operand.vmem [shape: f32[1,64], index: 2, kind: input, shape index: {}]   ;;  %s4429_s3 = inlined_call_operand.vmem [shape: f32[1,64], index: 3, kind: input, shape index: {}]   ;;  %s4430_s4 = inlined_call_operand.vmem [shape: bf16[9,64,64], index: 4, kind: input, shape index: {}]   ;;  %s4431_s5 = inlined_call_operand.vmem [shape: f32[1,64], index: 5, kind: input, shape index: {}]   ;;  %s4432_s6 = inlined_call_operand.vmem [shape: f32[1,64], index: 6, kind: input, shape index: {}]   ;;  %s4433_s7 = inlined_call_operand.vmem [shape: f32[128,64], index: 7, kind: output, shape index: {}]  }
   0x1 LB: > { %s3816_s25 = sadd.s32 4294967295, %s3767_s24   ;;  %p2781_p0 = scmp.ge.s32.totalorder %s3767_s24, 1  ;;  %s3767_s24 = sphi %s3810_s24, %s17_s24  }
   0x2   : > { %p237_p1 = scmp.lt.s32.totalorder %s3767_s24, 3 }
   0x4   : > { %p238_p2 = pnand %p2781_p0, %p237_p1 }
   0x5   : > { %v3689_v0 = vld [vmem:[%s4427_s1 + $0x20] sm:$0xff] (!%p238_p2)   ;;  %p269_p3 = scmp.lt.s32.totalorder (!%p238_p2), %s3816_s25, 1  ;;  %v3690_v1 = vld [vmem:[%s4427_s1 + $0x28] sm:$0xff] (!%p238_p2)   ;;  %v3691_v2 = vld [vmem:[%s4427_s1 + $0x30] sm:$0xff] (!%p238_p2)   ;;  %vm346_vm0 = vcmask (!%p238_p2), 523264   ;;  %vm1476_vm1 = vcmask (!%p238_p2), 517120  }
   0x6   : > { %241 = sbr.rel (%p238_p2) target bundleno = 741 (0x2e5), region = 48  ;;  %3263 = vmatprep.subr.bf16.mxu0 (!%p238_p2), %v3689_v0  ;;  %v3692_v5 = vld [vmem:[%s4427_s1 + $0x38] sm:$0xff] (!%p238_p2)   ;;  %v3693_v7 = vld [vmem:[%s4427_s1] sm:$0xff] (!%p238_p2)   ;;  %v3694_v14 = vld [vmem:[%s4427_s1 + $0x8] sm:$0xff] (!%p238_p2)   ;;  %s2783_s16 = sshll.u32 (!%p238_p2), %s3816_s25, 3 }
   0x7   : > { %3264 = vmatpush3.bf16.msra.mxu0 (!%p238_p2), %v3689_v0  ;;  %v3695_v16 = vld [vmem:[%s4427_s1 + $0x10] sm:$0xff] (!%p238_p2)   ;;  %v3696_v22 = vld [vmem:[%s4427_s1 + $0x18] sm:$0xff] (!%p238_p2)   ;;  %v3697_v25 = vld [vmem:[%s4427_s1 + $0x40] sm:$0xff] (!%p238_p2)   ;;  %p275_p4 = scmp.lt.s32.totalorder (!%p238_p2), %s2783_s16, 15 }
   0x8   : > { %3265 = vmatprep.subr.bf16.mxu0 (!%p238_p2), %v3690_v1  ;;  %v3698_v30 = vld [vmem:[%s4427_s1 + $0x48] sm:$0xff] (!%p238_p2)   ;;  %v3699_v33 = vld [vmem:[%s4427_s1 + $0x50] sm:$0xff] (!%p238_p2)   ;;  %v3700_v38 = vld [vmem:[%s4427_s1 + $0x58] sm:$0xff] (!%p238_p2)  }
   0x9   : > { %v3701_v41 = vld [vmem:[%s4427_s1 + $0x60] sm:$0xff] (!%p238_p2)   ;;  %v3702_v45 = vld [vmem:[%s4427_s1 + $0x68] sm:$0xff] (!%p238_p2)   ;;  %v3703_v49 = vld [vmem:[%s4427_s1 + $0x70] sm:$0xff] (!%p238_p2)  }
   0xa   : > { %v3704_v51 = vld [vmem:[%s4427_s1 + $0x78] sm:$0xff] (!%p238_p2)   ;;  %v3705_v53 = vld [vmem:[%s4427_s1 + $0x80] sm:$0xff] (!%p238_p2)   ;;  %v3706_v55 = vld [vmem:[%s4427_s1 + $0x88] sm:$0xff] (!%p238_p2)  }
   0xb   : > { %3266 = vmatpush3.bf16.msra.mxu0 (!%p238_p2), %v3690_v1  ;;  %v3707_v58 = vld [vmem:[%s4427_s1 + $0x90] sm:$0xff] (!%p238_p2)   ;;  %v3708_v61 = vld [vmem:[%s4427_s1 + $0x98] sm:$0xff] (!%p238_p2)   ;;  %v3709_v62 = vld [vmem:[%s4427_s1 + $0xa0] sm:$0xff] (!%p238_p2)  }
   0xc   : > { %3267 = vmatprep.subr.bf16.mxu0 (!%p238_p2), %v3691_v2  ;;  %v3710_v1 = vld [vmem:[%s4427_s1 + $0xa8] sm:$0xff] (!%p238_p2)  }
   0xd   : > { %s270_s30 = scalar_select %p269_p3, %s3816_s25, 1 }
   0xe   : > { %s4435_s16 = smov (!%p275_p4, %s2783_s16), 15 }
   0xf   : > { %s3679_s10 = smul.u32 160, %s270_s30  ;;  %3268 = vmatpush3.bf16.msra.mxu0 %v3691_v2  ;;  %s2784_s21 = sshll.u32 %s4435_s16, 3 }
  0x10   : > { %3269 = vmatprep.subr.bf16.mxu0 %v3692_v5  ;;  %s4401_s23 = scalar_lea.vmem %s4433_s7, %s2784_s21 }
  0x11   : > { %s3834_s13 = scalar_lea.vmem %s4426_s0, %s3679_s10 }
  0x12   : > { %v301_v3 = vld [vmem:[%s3834_s13 + $0x1] sm:$0xff]  ;;  %v3838_v4 = vld [vmem:[%s3834_s13 + $0x11] sm:$0xff] }
  0x13   : > { %v309_v6 = vpack.c.bf16 %v3838_v4, %v301_v3  ;;  %v3849_v8 = vld [vmem:[%s3834_s13 + $0x21] sm:$0xff]  ;;  %v3852_v9 = vld [vmem:[%s3834_s13 + $0x31] sm:$0xff]  ;;  %3270 = vmatpush3.bf16.msra.mxu0 %v3692_v5 }
  0x14   : > { %v3855_v10 = vld [vmem:[%s3834_s13 + $0x41] sm:$0xff]  ;;  %v3858_v11 = vld [vmem:[%s3834_s13 + $0x51] sm:$0xff]  ;;  %v3862_v12 = vpack.c.bf16 %v3852_v9, %v3849_v8  ;;  %3279 = vmatprep.subr.bf16.mxu0 %v3693_v7  ;;  %v794_v60 = vpack.c.bf16 %v3849_v8, %v3838_v4 }
  0x15   : > { %3271 = vmatprep.mubr.msk.bf16.mxu0 %vm346_vm0, %v309_v6  ;;  %v3866_v13 = vpack.c.bf16 %v3858_v11, %v3855_v10  ;;  %v3874_v15 = vld [vmem:[%s3834_s13 + $0x61] sm:$0xff]  ;;  %v3882_v17 = vld [vmem:[%s3834_s13 + $0x71] sm:$0xff]  ;;  %v795_v63 = vpack.c.bf16 %v3855_v10, %v3852_v9 }
  0x16   : > { %3272 = vmatmul.mubr.msk.bf16.vlgmr.msra.gmra.mrb[0].mxu0 %vm346_vm0, %v3862_v12  ;;  %v281_v18 = vld [vmem:[%s3834_s13] sm:$0xff]  ;;  %v3886_v19 = vld [vmem:[%s3834_s13 + $0x10] sm:$0xff]  ;;  %v3890_v20 = vpack.c.bf16 %v3882_v17, %v3874_v15  ;;  %v796_v0 = vpack.c.bf16 %v3874_v15, %v3858_v11  ;;  %v3712_v6 = vld [vmem:[%s4427_s1 + $0xb8] sm:$0xff]  }
  0x17   : > { %3280 = vmatpush3.bf16.msra.mxu0 %v3693_v7  ;;  %3275 = vmatprep.mubr.msk.bf16.mxu0 %vm346_vm0, %v3866_v13  ;;  %v289_v21 = vpack.c.bf16 %v3886_v19, %v281_v18  ;;  %v283_v23 = vld [vmem:[%s3834_s13 + $0x20] sm:$0xff]  ;;  %v3898_v24 = vld [vmem:[%s3834_s13 + $0x30] sm:$0xff]  ;;  %v3714_v10 = vld [vmem:[%s4427_s1 + $0xc8] sm:$0xff]  }
  0x18   : > { %3281 = vmatprep.subr.bf16.mxu0 %v3694_v14  ;;  %v285_v26 = vld [vmem:[%s3834_s13 + $0x40] sm:$0xff]  ;;  %v286_v27 = vld [vmem:[%s3834_s13 + $0x50] sm:$0xff]  ;;  %v3909_v28 = vpack.c.bf16 %v3898_v24, %v283_v23  ;;  %v664_v52 = vpack.c.bf16 %v283_v23, %v3886_v19  ;;  %v3718_v18 = vld [vmem:[%s4427_s1 + $0xe8] sm:$0xff]  }
  0x19   : > { %v3911_v29 = vpack.c.bf16 %v286_v27, %v285_v26  ;;  %v287_v31 = vld [vmem:[%s3834_s13 + $0x60] sm:$0xff]  ;;  %v288_v32 = vld [vmem:[%s3834_s13 + $0x70] sm:$0xff]  ;;  %v665_v54 = vpack.c.bf16 %v285_v26, %v3898_v24  ;;  %v3720_v23 = vld [vmem:[%s4427_s1 + $0xf8] sm:$0xff]  }
  0x1a   : > { %v525_v34 = vld [vmem:[%s3834_s13 + $0x2] sm:$0xff]  ;;  %v3927_v35 = vld [vmem:[%s3834_s13 + $0x12] sm:$0xff]  ;;  %v3929_v36 = vpack.c.bf16 %v288_v32, %v287_v31  ;;  %v666_v56 = vpack.c.bf16 %v287_v31, %v286_v27 }
  0x1b   : > { %3282 = vmatpush3.bf16.msra.mxu0 %v3694_v14  ;;  %v533_v37 = vpack.c.bf16 %v3927_v35, %v525_v34  ;;  %v3936_v39 = vld [vmem:[%s3834_s13 + $0x22] sm:$0xff]  ;;  %v3941_v40 = vld [vmem:[%s3834_s13 + $0x32] sm:$0xff] }
  0x1c   : > { %3283 = vmatprep.subr.bf16.mxu0 %v3695_v16  ;;  %v3948_v42 = vld [vmem:[%s3834_s13 + $0x42] sm:$0xff]  ;;  %v3951_v43 = vld [vmem:[%s3834_s13 + $0x52] sm:$0xff]  ;;  %v3955_v44 = vpack.c.bf16 %v3941_v40, %v3936_v39  ;;  %v924_v5 = vpack.c.bf16 %v3936_v39, %v3927_v35  ;;  %v2969_v35 = vld [vmem:[%s4428_s2] ss:$0 sm:$0xff] }
  0x1d   : > { %v3962_v46 = vpack.c.bf16 %v3951_v43, %v3948_v42  ;;  %v3965_v47 = vld [vmem:[%s3834_s13 + $0x62] sm:$0xff]  ;;  %v3968_v48 = vld [vmem:[%s3834_s13 + $0x72] sm:$0xff]  ;;  %v925_v8 = vpack.c.bf16 %v3948_v42, %v3941_v40 }
  0x1e   : > { %3276 = vmatmul.mubr.msk.bf16.gmra.mrb[4].mxu0 %vm346_vm0, %v3890_v20  ;;  %v3979_v50 = vpack.c.bf16 %v3968_v48, %v3965_v47  ;;  %v3996_v57 = vld [vmem:[%s3834_s13 + $0x80] sm:$0xff]  ;;  %v3711_v3 = vld [vmem:[%s4427_s1 + $0xb0] sm:$0xff]   ;;  %v926_v9 = vpack.c.bf16 %v3965_v47, %v3951_v43  ;;  %v3726_v31 = vld [vmem:[%s4430_s4 + $0x28] sm:$0xff]  }
  0x1f   : > { %3284 = vmatpush3.bf16.msra.mxu0 %v3695_v16  ;;  %3287 = vmatprep.mubr.msk.bf16.mxu0 %vm346_vm0, %v289_v21  ;;  %v667_v59 = vpack.c.bf16 %v3996_v57, %v288_v32  ;;  %v4024_v2 = vld [vmem:[%s3834_s13 + $0x81] sm:$0xff]  ;;  %v3715_v14 = vld [vmem:[%s4427_s1 + $0xd0] sm:$0xff]   ;;  %v3716_v16 = vld [vmem:[%s4427_s1 + $0xd8] sm:$0xff]  }
  0x20   : > { %3285 = vmatprep.subr.bf16.mxu0 %v3696_v22  ;;  %v797_v4 = vpack.c.bf16 %v4024_v2, %v3882_v17  ;;  %v3713_v7 = vld [vmem:[%s4427_s1 + $0xc0] sm:$0xff]   ;;  %v2904_v19 = vld [vmem:[%s3834_s13 + $0x90] sm:$0xff] }
  0x21   : > { %v2880_v11 = vld [vmem:[%s3834_s13 + $0x82] sm:$0xff]  ;;  %v3719_v21 = vld [vmem:[%s4427_s1 + $0xf0] sm:$0xff]  }
  0x22   : > { %v927_v15 = vpack.c.bf16 %v2880_v11, %v3968_v48  ;;  %v3717_v17 = vld [vmem:[%s4427_s1 + $0xe0] sm:$0xff]   ;;  %v3723_v26 = vld [vmem:[%s4427_s1 + $0x110] sm:$0xff]  }
  0x23   : > { %3286 = vmatpush3.bf16.msra.mxu0 %v3696_v22  ;;  %v1058_v22 = vpack.c.bf16 %v2904_v19, %v3996_v57  ;;  %v3721_v24 = vld [vmem:[%s4427_s1 + $0x100] sm:$0xff]   ;;  %v3727_v32 = vld [vmem:[%s4430_s4 + $0x30] sm:$0xff]  }
  0x24   : > { %3295 = vmatprep.subr.bf16.mxu0 %v3697_v25  ;;  %v3729_v34 = vld [vmem:[%s4430_s4] sm:$0xff]  }
  0x26   : > { %3288 = vmatmul.mubr.msk.bf16.vlgmr.msra.gmra.mrb[0].mxu0 %vm346_vm0, %v3909_v28 }
  0x27   : > { %3296 = vmatpush3.bf16.msra.mxu0 %v3697_v25  ;;  %3291 = vmatprep.mubr.msk.bf16.mxu0 %vm346_vm0, %v3911_v29  ;;  %v3722_v25 = vld [vmem:[%s4427_s1 + $0x108] sm:$0xff]  }
  0x28   : > { %3297 = vmatprep.subr.bf16.mxu0 %v3698_v30 }
  0x2b   : > { %3298 = vmatpush3.bf16.msra.mxu0 %v3698_v30  ;;  %v3769_v30 = vmov 0.0  }
  0x2c   : > { %3299 = vmatprep.subr.bf16.mxu0 %v3699_v33  ;;  %1482 = vst.msk [vmem:[#allocation2 + $0x30] sm:$0xff] %vm346_vm0, %v3769_v30  ;;  %1475 = vst.msk [vmem:[#allocation2] sm:$0xff] %vm346_vm0, %v3769_v30 }
  0x2d   : > { %1483 = vst.msk [vmem:[#allocation2 + $0x38] sm:$0x3] %vm1476_vm1, %v3769_v30  ;;  %1477 = vst.msk [vmem:[#allocation2 + $0x8] sm:$0x3] %vm1476_vm1, %v3769_v30 }
  0x2e   : > { %3292 = vmatmul.mubr.msk.bf16.gmra.mrb[4].mxu0 %vm346_vm0, %v3929_v36  ;;  %1478 = vst.msk [vmem:[#allocation2 + $0x10] sm:$0xff] %vm346_vm0, %v3769_v30  ;;  %1480 = vst.msk [vmem:[#allocation2 + $0x20] sm:$0xff] %vm346_vm0, %v3769_v30 }
  0x2f   : > { %3300 = vmatpush3.bf16.msra.mxu0 %v3699_v33  ;;  %3303 = vmatprep.mubr.msk.bf16.mxu0 %vm346_vm0, %v533_v37  ;;  %1479 = vst.msk [vmem:[#allocation2 + $0x18] sm:$0x3] %vm1476_vm1, %v3769_v30  ;;  %1481 = vst.msk [vmem:[#allocation2 + $0x28] sm:$0x3] %vm1476_vm1, %v3769_v30  ;;  %v3728_v33 = vld [vmem:[%s4430_s4 + $0x38] sm:$0xff]  }
  0x30   : > { %3301 = vmatprep.subr.bf16.mxu0 %v3700_v38  ;;  %1484 = vst.msk [vmem:[#allocation2 + $0x40] sm:$0xff] %vm346_vm0, %v3769_v30  ;;  %1486 = vst.msk [vmem:[#allocation2 + $0x50] sm:$0xff] %vm346_vm0, %v3769_v30  ;;  %v2970_v37 = vld [vmem:[%s4429_s3] ss:$0 sm:$0xff] }
  0x31   : > { %1485 = vst.msk [vmem:[#allocation2 + $0x48] sm:$0x3] %vm1476_vm1, %v3769_v30  ;;  %1487 = vst.msk [vmem:[#allocation2 + $0x58] sm:$0x3] %vm1476_vm1, %v3769_v30 }
  0x32   : > { %1488 = vst.msk [vmem:[#allocation2 + $0x60] sm:$0xff] %vm346_vm0, %v3769_v30  ;;  %1490 = vst.msk [vmem:[#allocation2 + $0x70] sm:$0xff] %vm346_vm0, %v3769_v30 }
  0x33   : > { %3302 = vmatpush3.bf16.msra.mxu0 %v3700_v38  ;;  %1489 = vst.msk [vmem:[#allocation2 + $0x68] sm:$0x3] %vm1476_vm1, %v3769_v30  ;;  %1491 = vst.msk [vmem:[#allocation2 + $0x78] sm:$0x3] %vm1476_vm1, %v3769_v30 }
  0x34   : > { %3311 = vmatprep.subr.bf16.mxu0 %v3701_v41  ;;  %1492 = vst.msk [vmem:[#allocation2 + $0x80] sm:$0xff] %vm346_vm0, %v3769_v30  ;;  %1494 = vst.msk [vmem:[#allocation2 + $0x90] sm:$0xff] %vm346_vm0, %v3769_v30 }
  0x35   : > { %1493 = vst.msk [vmem:[#allocation2 + $0x88] sm:$0x3] %vm1476_vm1, %v3769_v30  ;;  %1495 = vst.msk [vmem:[#allocation2 + $0x98] sm:$0x3] %vm1476_vm1, %v3769_v30 }
  0x36   : > { %3304 = vmatmul.mubr.msk.bf16.vlgmr.msra.gmra.mrb[0].mxu0 %vm346_vm0, %v3955_v44 }
  0x37   : > { %3312 = vmatpush3.bf16.msra.mxu0 %v3701_v41  ;;  %3307 = vmatprep.mubr.msk.bf16.mxu0 %vm346_vm0, %v3962_v46 }
  0x38   : > { %3313 = vmatprep.subr.bf16.mxu0 %v3702_v45 }
  0x3b   : > { %3314 = vmatpush3.bf16.msra.mxu0 %v3702_v45 }
  0x3c   : > { %3315 = vmatprep.subr.bf16.mxu0 %v3703_v49 }
  0x3e   : > { %3308 = vmatmul.mubr.msk.bf16.gmra.mrb[4].mxu0 %vm346_vm0, %v3979_v50 }
  0x3f   : > { %3316 = vmatpush3.bf16.msra.mxu0 %v3703_v49  ;;  %3319 = vmatprep.mubr.msk.bf16.mxu0 %vm346_vm0, %v664_v52 }
  0x40   : > { %3317 = vmatprep.subr.bf16.mxu0 %v3704_v51 }
  0x43   : > { %3318 = vmatpush3.bf16.msra.mxu0 %v3704_v51 }
  0x44   : > { %3327 = vmatprep.subr.bf16.mxu0 %v3705_v53 }
  0x46   : > { %3320 = vmatmul.mubr.msk.bf16.vlgmr.msra.gmra.mrb[0].mxu0 %vm346_vm0, %v665_v54 }
  0x47   : > { %3328 = vmatpush3.bf16.msra.mxu0 %v3705_v53  ;;  %3323 = vmatprep.mubr.msk.bf16.mxu0 %vm346_vm0, %v666_v56 }
  0x48   : > { %3329 = vmatprep.subr.bf16.mxu0 %v3706_v55 }
  0x4b   : > { %3330 = vmatpush3.bf16.msra.mxu0 %v3706_v55 }
  0x4c   : > { %3331 = vmatprep.subr.bf16.mxu0 %v3707_v58 }
  0x4e   : > { %3324 = vmatmul.mubr.msk.bf16.gmra.mrb[4].mxu0 %vm346_vm0, %v667_v59 }
  0x4f   : > { %3332 = vmatpush3.bf16.msra.mxu0 %v3707_v58  ;;  %3335 = vmatprep.mubr.msk.bf16.mxu0 %vm346_vm0, %v794_v60 }
  0x50   : > { %3333 = vmatprep.subr.bf16.mxu0 %v3708_v61 }
  0x53   : > { %3334 = vmatpush3.bf16.msra.mxu0 %v3708_v61 }
  0x54   : > { %3343 = vmatprep.subr.bf16.mxu0 %v3709_v62 }
  0x56   : > { %3336 = vmatmul.mubr.msk.bf16.vlgmr.msra.gmra.mrb[0].mxu0 %vm346_vm0, %v795_v63 }
  0x57   : > { %3344 = vmatpush3.bf16.msra.mxu0 %v3709_v62  ;;  %3339 = vmatprep.mubr.msk.bf16.mxu0 %vm346_vm0, %v796_v0 }
  0x58   : > { %3345 = vmatprep.subr.bf16.mxu0 %v3710_v1 }
  0x5b   : > { %3346 = vmatpush3.bf16.msra.mxu0 %v3710_v1  ;;  %v1525_v1 = vld [vmem:[#allocation2 + $0x1] sm:$0xff] }
  0x5c   : > { %3347 = vmatprep.subr.bf16.mxu0 %v3711_v3 }
  0x5e   : > { %3340 = vmatmul.mubr.msk.bf16.gmra.mrb[4].mxu0 %vm346_vm0, %v797_v4 }
  0x5f   : > { %3348 = vmatpush3.bf16.msra.mxu0 %v3711_v3  ;;  %3351 = vmatprep.mubr.msk.bf16.mxu0 %vm346_vm0, %v924_v5 }
  0x60   : > { %3349 = vmatprep.subr.bf16.mxu0 %v3712_v6 }
  0x63   : > { %3350 = vmatpush3.bf16.msra.mxu0 %v3712_v6 }
  0x64   : > { %3359 = vmatprep.subr.bf16.mxu0 %v3713_v7 }
  0x66   : > { %3352 = vmatmul.mubr.msk.bf16.vlgmr.msra.gmra.mrb[0].mxu0 %vm346_vm0, %v925_v8 }
  0x67   : > { %3360 = vmatpush3.bf16.msra.mxu0 %v3713_v7  ;;  %3355 = vmatprep.mubr.msk.bf16.mxu0 %vm346_vm0, %v926_v9 }
  0x68   : > { %3361 = vmatprep.subr.bf16.mxu0 %v3714_v10 }
  0x6b   : > { %3362 = vmatpush3.bf16.msra.mxu0 %v3714_v10 }
  0x6c   : > { %3363 = vmatprep.subr.bf16.mxu0 %v3715_v14 }
  0x6e   : > { %3356 = vmatmul.mubr.msk.bf16.gmra.mrb[4].mxu0 %vm346_vm0, %v927_v15 }
  0x6f   : > { %3364 = vmatpush3.bf16.msra.mxu0 %v3715_v14  ;;  %3367 = vmatprep.mubr.msk.bf16.mxu0 %vm346_vm0, %v3909_v28  ;;  %v3724_v28 = vld [vmem:[%s4427_s1 + $0x118] sm:$0xff]   ;;  %v3731_v14 = vld [vmem:[%s4430_s4 + $0x10] sm:$0xff]  }
  0x70   : > { %3365 = vmatprep.subr.bf16.mxu0 %v3716_v16 }
  0x73   : > { %3366 = vmatpush3.bf16.msra.mxu0 %v3716_v16 }
  0x74   : > { %3375 = vmatprep.subr.bf16.mxu0 %v3717_v17 }
  0x76   : > { %3368 = vmatmul.mubr.msk.bf16.vlgmr.msra.gmra.mrb[0].mxu0 %vm346_vm0, %v3911_v29  ;;  %v3725_v29 = vld [vmem:[%s4430_s4 + $0x20] sm:$0xff]  }
  0x77   : > { %3376 = vmatpush3.bf16.msra.mxu0 %v3717_v17  ;;  %3371 = vmatprep.mubr.msk.bf16.mxu0 %vm346_vm0, %v3929_v36 }
  0x78   : > { %3377 = vmatprep.subr.bf16.mxu0 %v3718_v18  ;;  %3407 = vmatprep.subr.bf16.mxu1 %v3725_v29 }
  0x79   : > { %3408 = vmatpush3.bf16.msra.mxu1 %v3725_v29  ;;  %v3734_v29 = vld [vmem:[%s4430_s4 + $0x48] sm:$0xff]  }
  0x7a   : > { %3409 = vmatprep.subr.bf16.mxu1 %v3726_v31 }
  0x7b   : > { %3378 = vmatpush3.bf16.msra.mxu0 %v3718_v18  ;;  %v1505_v18 = vld [vmem:[#allocation2] sm:$0xff] }
  0x7c   : > { %3379 = vmatprep.subr.bf16.mxu0 %v3719_v21 }
  0x7d   : > { %3410 = vmatpush3.bf16.msra.mxu1 %v3726_v31  ;;  %v3735_v31 = vld [vmem:[%s4430_s4 + $0x50] sm:$0xff]  }
  0x7e   : > { %3372 = vmatmul.mubr.msk.bf16.gmra.mrb[4].mxu0 %vm346_vm0, %v1058_v22  ;;  %3411 = vmatprep.subr.bf16.mxu1 %v3727_v32 }
  0x7f   : > { %3380 = vmatpush3.bf16.msra.mxu0 %v3719_v21  ;;  %3383 = vmatprep.mubr.msk.bf16.mxu0 %vm346_vm0, %v3862_v12  ;;  %v2928_v12 = vld [vmem:[%s3834_s13 + $0x91] sm:$0xff] }
  0x80   : > { %3381 = vmatprep.subr.bf16.mxu0 %v3720_v23  ;;  %v1188_v27 = vpack.c.bf16 %v2928_v12, %v4024_v2  ;;  %v3733_v12 = vld [vmem:[%s4430_s4 + $0x40] sm:$0xff]  }
  0x81   : > { %3412 = vmatpush3.bf16.msra.mxu1 %v3727_v32 }
  0x82   : > { %3413 = vmatprep.subr.bf16.mxu1 %v3728_v33 }
  0x83   : > { %3382 = vmatpush3.bf16.msra.mxu0 %v3720_v23 }
  0x84   : > { %3391 = vmatprep.subr.bf16.mxu0 %v3721_v24 }
  0x85   : > { %3414 = vmatpush3.bf16.msra.mxu1 %v3728_v33  ;;  %v1748_v33 = vld [vmem:[#allocation2 + $0x2] sm:$0xff] }
  0x86   : > { %3384 = vmatmul.mubr.msk.bf16.vlgmr.msra.gmra.mrb[0].mxu0 %vm346_vm0, %v3866_v13  ;;  %v2952_v13 = vld [vmem:[%s3834_s13 + $0x92] sm:$0xff]  ;;  %3423 = vmatprep.subr.bf16.mxu1 %v3729_v34 }
  0x87   : > { %3392 = vmatpush3.bf16.msra.mxu0 %v3721_v24  ;;  %3387 = vmatprep.mubr.msk.bf16.mxu0 %vm346_vm0, %v3890_v20  ;;  %v1318_v20 = vpack.c.bf16 %v2952_v13, %v2880_v11  ;;  %v3730_v11 = vld [vmem:[%s4430_s4 + $0x8] sm:$0xff]   ;;  %v3732_v24 = vld [vmem:[%s4430_s4 + $0x18] sm:$0xff]  }
  0x88   : > { %3393 = vmatprep.subr.bf16.mxu0 %v3722_v25 }
  0x8b   : > { %3394 = vmatpush3.bf16.msra.mxu0 %v3722_v25 }
  0x8c   : > { %3395 = vmatprep.subr.bf16.mxu0 %v3723_v26 }
  0x8e   : > { %3388 = vmatmul.mubr.msk.bf16.gmra.mrb[4].mxu0 %vm346_vm0, %v1188_v27 }
  0x8f   : > { %3396 = vmatpush3.bf16.msra.mxu0 %v3723_v26  ;;  %3399 = vmatprep.mubr.msk.bf16.mxu0 %vm346_vm0, %v3955_v44 }
  0x90   : > { %3397 = vmatprep.subr.bf16.mxu0 %v3724_v28 }
  0x93   : > { %3398 = vmatpush3.bf16.msra.mxu0 %v3724_v28 }
  0x96   : > { %3400 = vmatmul.mubr.msk.bf16.vlgmr.msra.gmra.mrb[0].mxu0 %vm346_vm0, %v3962_v46 }
  0x97   : > { %3403 = vmatprep.mubr.msk.bf16.mxu0 %vm346_vm0, %v3979_v50 }
  0x9e   : > { %3404 = vmatmul.mubr.msk.bf16.gmra.mrb[4].mxu0 %vm346_vm0, %v1318_v20 }
 0x169   : > { %v3401_v36 = vpop.f32.mrb[0].mxu0 }
 0x16a   : > { %v1446_v38 = vmul.f32 %v3401_v36, %v2969_v35  ;;  %v1398_v39 = vpop.f32.mrb[1].mxu0 }
 0x16b   : > { %v1444_v40 = vmul.f32 %v2969_v35, %v1398_v39  ;;  %v3402_v41 = vpop.f32.mrb[2].mxu0  ;;  %v3737_v39 = vld [vmem:[%s4430_s4 + $0x60] sm:$0xff]  }
 0x16c   : > { %v1461_v42 = vadd.f32 %v2970_v37, %v1446_v38  ;;  %v1447_v43 = vmul.f32 %v3402_v41, %v2969_v35  ;;  %v1401_v44 = vpop.f32.mrb[3].mxu0 }
 0x16d   : > { %v1459_v45 = vadd.f32 %v2970_v37, %v1444_v40  ;;  %v1445_v46 = vmul.f32 %v2969_v35, %v1401_v44 }
 0x16e   : > { %v1469_v47 = vmax.f32 %v1461_v42, 0.0  ;;  %v1462_v48 = vadd.f32 %v2970_v37, %v1447_v43 }
 0x16f   : > { %v1467_v49 = vmax.f32 %v1459_v45, 0.0  ;;  %v1460_v50 = vadd.f32 %v2970_v37, %v1445_v46  ;;  %v3738_v45 = vld [vmem:[%s4430_s4 + $0x68] sm:$0xff]  }
 0x170   : > { %1499 = vst.msk [vmem:[#allocation2 + $0x31] sm:$0xff] %vm346_vm0, %v1469_v47  ;;  %v1470_v51 = vmax.f32 %v1462_v48, 0.0  ;;  %v3739_v47 = vld [vmem:[%s4430_s4 + $0x70] sm:$0xff]  }
 0x171   : > { %1497 = vst.msk [vmem:[#allocation2 + $0x11] sm:$0xff] %vm346_vm0, %v1467_v49  ;;  %v1468_v52 = vmax.f32 %v1460_v50, 0.0  ;;  %v3405_v53 = vpop.f32.mrb[4].mxu0 }
 0x172   : > { %1500 = vst.msk [vmem:[#allocation2 + $0x41] sm:$0xff] %vm346_vm0, %v1470_v51  ;;  %v1450_v54 = vmul.f32 %v3405_v53, %v2969_v35  ;;  %v1414_v55 = vpop.f32.mrb[5].mxu0  ;;  %v3740_v51 = vld [vmem:[%s4430_s4 + $0x78] sm:$0xff]   ;;  %v3741_v53 = vld [vmem:[%s4430_s4 + $0x80] sm:$0xff]  }
 0x173   : > { %1498 = vst.msk [vmem:[#allocation2 + $0x21] sm:$0xff] %vm346_vm0, %v1468_v52  ;;  %v1448_v56 = vmul.f32 %v2969_v35, %v1414_v55  ;;  %v3406_v57 = vpop.f32.mrb[6].mxu0  ;;  %v3742_v55 = vld [vmem:[%s4430_s4 + $0x88] sm:$0xff]  }
 0x174   : > { %v1465_v58 = vadd.f32 %v2970_v37, %v1450_v54  ;;  %v1451_v59 = vmul.f32 %v3406_v57, %v2969_v35  ;;  %v1417_v60 = vpop.f32.mrb[7].mxu0  ;;  %v3743_v57 = vld [vmem:[%s4430_s4 + $0x90] sm:$0xff]  }
 0x175   : > { %v1463_v61 = vadd.f32 %v2970_v37, %v1448_v56  ;;  %v1449_v62 = vmul.f32 %v2969_v35, %v1417_v60  ;;  %v3744_v60 = vld [vmem:[%s4430_s4 + $0x98] sm:$0xff]  }
 0x176   : > { %v1473_v63 = vmax.f32 %v1465_v58, 0.0  ;;  %v1466_v0 = vadd.f32 %v2970_v37, %v1451_v59 }
 0x177   : > { %v1471_v2 = vmax.f32 %v1463_v61, 0.0  ;;  %v1464_v3 = vadd.f32 %v2970_v37, %v1449_v62  ;;  %v4162_v9 = vld [vmem:[#allocation2 + $0x31] sm:$0xff]  ;;  %v3745_v62 = vld [vmem:[%s4430_s4 + $0xa0] sm:$0xff]  }
 0x178   : > { %1503 = vst.msk [vmem:[#allocation2 + $0x71] sm:$0xff] %vm346_vm0, %v1473_v63  ;;  %v1474_v4 = vmax.f32 %v1466_v0, 0.0  ;;  %v4155_v5 = vld [vmem:[#allocation2 + $0x11] sm:$0xff]  ;;  %v3746_v0 = vld [vmem:[%s4430_s4 + $0xa8] sm:$0xff]  }
 0x179   : > { %1501 = vst.msk [vmem:[#allocation2 + $0x51] sm:$0xff] %vm346_vm0, %v1471_v2  ;;  %v1472_v6 = vmax.f32 %v1464_v3, 0.0  ;;  %v1533_v7 = vpack.c.bf16 %v4155_v5, %v1525_v1  ;;  %v4178_v15 = vld [vmem:[#allocation2 + $0x41] sm:$0xff]  ;;  %v4186_v19 = vld [vmem:[#allocation2 + $0x10] sm:$0xff]  ;;  %v3736_v37 = vld [vmem:[%s4430_s4 + $0x58] sm:$0xff]  }
 0x17a   : > { %1504 = vst.msk [vmem:[#allocation2 + $0x81] sm:$0xff] %vm346_vm0, %v1474_v4  ;;  %v4160_v8 = vld [vmem:[#allocation2 + $0x21] sm:$0xff]  ;;  %v1513_v25 = vpack.c.bf16 %v4186_v19, %v1505_v18  ;;  %v1508_v28 = vld [vmem:[#allocation2 + $0x30] sm:$0xff]  ;;  %v2017_v63 = vpack.c.bf16 %v4178_v15, %v4162_v9  ;;  %v3752_v18 = vld [vmem:[%s4430_s4 + $0xd8] sm:$0xff]  }
 0x17b   : > { %1502 = vst.msk [vmem:[#allocation2 + $0x61] sm:$0xff] %vm346_vm0, %v1472_v6  ;;  %3415 = vmatprep.mubr.msk.bf16.mxu1 %vm346_vm0, %v1533_v7  ;;  %v4168_v10 = vpack.c.bf16 %v4162_v9, %v4160_v8  ;;  %v1507_v26 = vld [vmem:[#allocation2 + $0x20] sm:$0xff]  ;;  %v4240_v42 = vld [vmem:[#allocation2 + $0x32] sm:$0xff]  ;;  %v2016_v61 = vpack.c.bf16 %v4160_v8, %v4155_v5  ;;  %v3750_v9 = vld [vmem:[%s4430_s4 + $0xc8] sm:$0xff]  }
 0x17c   : > { %v4208_v13 = vpack.c.bf16 %v1508_v28, %v1507_v26  ;;  %v1509_v20 = vld [vmem:[#allocation2 + $0x40] sm:$0xff]  ;;  %v1886_v52 = vpack.c.bf16 %v1507_v26, %v4186_v19  ;;  %v3747_v2 = vld [vmem:[%s4430_s4 + $0xb0] sm:$0xff]   ;;  %v3748_v5 = vld [vmem:[%s4430_s4 + $0xb8] sm:$0xff]  }
 0x17d   : > { %3416 = vmatmul.mubr.msk.bf16.vlgmr.msra.gmra.mrb[0].mxu1 %vm346_vm0, %v4168_v10  ;;  %v4236_v40 = vld [vmem:[#allocation2 + $0x22] sm:$0xff]  ;;  %v1887_v54 = vpack.c.bf16 %v1509_v20, %v1508_v28  ;;  %v2406_v28 = vld [vmem:[#allocation2 + $0x91] sm:$0xff] }
 0x17e   : > { %3424 = vmatpush3.bf16.msra.mxu1 %v3729_v34  ;;  %v4222_v34 = vld [vmem:[#allocation2 + $0x12] sm:$0xff]  ;;  %v4244_v43 = vpack.c.bf16 %v4240_v42, %v4236_v40  ;;  %v4246_v44 = vld [vmem:[#allocation2 + $0x42] sm:$0xff] }
 0x17f   : > { %3425 = vmatprep.subr.bf16.mxu1 %v3730_v11  ;;  %v4190_v22 = vld [vmem:[#allocation2 + $0x71] sm:$0xff]  ;;  %v1756_v38 = vpack.c.bf16 %v4222_v34, %v1748_v33  ;;  %v2146_v6 = vpack.c.bf16 %v4236_v40, %v4222_v34  ;;  %v3749_v7 = vld [vmem:[%s4430_s4 + $0xc0] sm:$0xff]   ;;  %v2147_v8 = vpack.c.bf16 %v4246_v44, %v4240_v42 }
 0x180   : > { %v4180_v16 = vld [vmem:[#allocation2 + $0x51] sm:$0xff]  ;;  %v3753_v19 = vld [vmem:[%s4430_s4 + $0xe0] sm:$0xff]  }
 0x181   : > { %v4184_v17 = vpack.c.bf16 %v4180_v16, %v4178_v15  ;;  %v1510_v27 = vld [vmem:[#allocation2 + $0x50] sm:$0xff]  ;;  %v4285_v58 = vld [vmem:[#allocation2 + $0x80] sm:$0xff] }
 0x182   : > { %3426 = vmatpush3.bf16.msra.mxu1 %v3730_v11  ;;  %v4188_v21 = vld [vmem:[#allocation2 + $0x61] sm:$0xff]  ;;  %v4213_v30 = vpack.c.bf16 %v1510_v27, %v1509_v20  ;;  %v1512_v35 = vld [vmem:[#allocation2 + $0x70] sm:$0xff]  ;;  %v3760_v20 = vld [vmem:[%s4430_s4 + $0x118] sm:$0xff]  }
 0x183   : > { %3419 = vmatprep.mubr.msk.bf16.mxu1 %vm346_vm0, %v4184_v17  ;;  %v4196_v23 = vpack.c.bf16 %v4190_v22, %v4188_v21  ;;  %3427 = vmatprep.subr.bf16.mxu1 %v3731_v14  ;;  %v1511_v32 = vld [vmem:[#allocation2 + $0x60] sm:$0xff]  ;;  %v4238_v41 = vld [vmem:[#allocation2 + $0x52] sm:$0xff]  ;;  %v1889_v59 = vpack.c.bf16 %v4285_v58, %v1512_v35  ;;  %v2018_v1 = vpack.c.bf16 %v4188_v21, %v4180_v16  ;;  %v3754_v21 = vld [vmem:[%s4430_s4 + $0xe8] sm:$0xff]  }
 0x184   : > { %v4224_v36 = vpack.c.bf16 %v1512_v35, %v1511_v32  ;;  %v4253_v46 = vpack.c.bf16 %v4238_v41, %v4246_v44  ;;  %v1754_v48 = vld [vmem:[#allocation2 + $0x62] sm:$0xff]  ;;  %v4262_v49 = vld [vmem:[#allocation2 + $0x72] sm:$0xff]  ;;  %v1888_v56 = vpack.c.bf16 %v1511_v32, %v1510_v27 }
 0x185   : > { %3420 = vmatmul.mubr.msk.bf16.gmra.mrb[4].mxu1 %vm346_vm0, %v4196_v23  ;;  %v4265_v50 = vpack.c.bf16 %v4262_v49, %v1754_v48  ;;  %v4310_v3 = vld [vmem:[#allocation2 + $0x81] sm:$0xff]  ;;  %v2148_v11 = vpack.c.bf16 %v1754_v48, %v4238_v41  ;;  %v3109_v34 = vld [vmem:[%s3834_s13 + $0x31] sm:$0xff] }
 0x186   : > { %3428 = vmatpush3.bf16.msra.mxu1 %v3731_v14  ;;  %3431 = vmatprep.mubr.msk.bf16.mxu1 %vm346_vm0, %v1513_v25  ;;  %v2019_v4 = vpack.c.bf16 %v4310_v3, %v4190_v22  ;;  %v3751_v14 = vld [vmem:[%s4430_s4 + $0xd0] sm:$0xff]   ;;  %v2145_v15 = vld [vmem:[#allocation2 + $0x82] sm:$0xff] }
 0x187   : > { %3429 = vmatprep.subr.bf16.mxu1 %v3732_v24  ;;  %v2149_v16 = vpack.c.bf16 %v2145_v15, %v4262_v49  ;;  %v3755_v22 = vld [vmem:[%s4430_s4 + $0xf0] sm:$0xff]   ;;  %v3757_v26 = vld [vmem:[%s4430_s4 + $0x100] sm:$0xff]   ;;  %v3758_v27 = vld [vmem:[%s4430_s4 + $0x108] sm:$0xff]  }
 0x188   : > { %v3110_v42 = vld [vmem:[%s3834_s13 + $0x41] sm:$0xff] }
 0x18a   : > { %3430 = vmatpush3.bf16.msra.mxu1 %v3732_v24  ;;  %v2276_v24 = vld [vmem:[#allocation2 + $0x90] sm:$0xff] }
 0x18b   : > { %3439 = vmatprep.subr.bf16.mxu1 %v3733_v12  ;;  %v2280_v25 = vpack.c.bf16 %v2276_v24, %v4285_v58  ;;  %v3113_v58 = vld [vmem:[%s3834_s13 + $0x71] sm:$0xff] }
 0x18d   : > { %3432 = vmatmul.mubr.msk.bf16.vlgmr.msra.gmra.mrb[0].mxu1 %vm346_vm0, %v4208_v13 }
 0x18e   : > { %3435 = vmatprep.mubr.msk.bf16.mxu1 %vm346_vm0, %v4213_v30  ;;  %3440 = vmatpush3.bf16.msra.mxu1 %v3733_v12  ;;  %v3756_v12 = vld [vmem:[%s4430_s4 + $0xf8] sm:$0xff]  }
 0x18f   : > { %3441 = vmatprep.subr.bf16.mxu1 %v3734_v29 }
 0x192   : > { %3442 = vmatpush3.bf16.msra.mxu1 %v3734_v29  ;;  %v3115_v29 = vld [vmem:[%s4431_s5] ss:$0 sm:$0xff] }
 0x193   : > { %3443 = vmatprep.subr.bf16.mxu1 %v3735_v31 }
 0x195   : > { %3436 = vmatmul.mubr.msk.bf16.gmra.mrb[4].mxu1 %vm346_vm0, %v4224_v36 }
 0x196   : > { %3444 = vmatpush3.bf16.msra.mxu1 %v3735_v31  ;;  %3447 = vmatprep.mubr.msk.bf16.mxu1 %vm346_vm0, %v1756_v38  ;;  %v3116_v31 = vld [vmem:[%s4432_s6] ss:$0 sm:$0xff]  ;;  %v3107_v38 = vld [vmem:[%s3834_s13 + $0x11] sm:$0xff] }
 0x197   : > { %3445 = vmatprep.subr.bf16.mxu1 %v3736_v37 }
 0x19a   : > { %3446 = vmatpush3.bf16.msra.mxu1 %v3736_v37 }
 0x19b   : > { %3455 = vmatprep.subr.bf16.mxu1 %v3737_v39 }
 0x19d   : > { %3448 = vmatmul.mubr.msk.bf16.vlgmr.msra.gmra.mrb[0].mxu1 %vm346_vm0, %v4244_v43 }
 0x19e   : > { %3451 = vmatprep.mubr.msk.bf16.mxu1 %vm346_vm0, %v4253_v46  ;;  %3456 = vmatpush3.bf16.msra.mxu1 %v3737_v39 }
 0x19f   : > { %3457 = vmatprep.subr.bf16.mxu1 %v3738_v45 }
 0x1a2   : > { %3458 = vmatpush3.bf16.msra.mxu1 %v3738_v45 }
 0x1a3   : > { %3459 = vmatprep.subr.bf16.mxu1 %v3739_v47 }
 0x1a5   : > { %3452 = vmatmul.mubr.msk.bf16.gmra.mrb[4].mxu1 %vm346_vm0, %v4265_v50 }
 0x1a6   : > { %3460 = vmatpush3.bf16.msra.mxu1 %v3739_v47  ;;  %3463 = vmatprep.mubr.msk.bf16.mxu1 %vm346_vm0, %v1886_v52 }
 0x1a7   : > { %3461 = vmatprep.subr.bf16.mxu1 %v3740_v51 }
 0x1aa   : > { %3462 = vmatpush3.bf16.msra.mxu1 %v3740_v51 }
 0x1ab   : > { %3471 = vmatprep.subr.bf16.mxu1 %v3741_v53 }
 0x1ad   : > { %3464 = vmatmul.mubr.msk.bf16.vlgmr.msra.gmra.mrb[0].mxu1 %vm346_vm0, %v1887_v54 }
 0x1ae   : > { %3467 = vmatprep.mubr.msk.bf16.mxu1 %vm346_vm0, %v1888_v56  ;;  %3472 = vmatpush3.bf16.msra.mxu1 %v3741_v53 }
 0x1af   : > { %3473 = vmatprep.subr.bf16.mxu1 %v3742_v55 }
 0x1b2   : > { %3474 = vmatpush3.bf16.msra.mxu1 %v3742_v55 }
 0x1b3   : > { %3475 = vmatprep.subr.bf16.mxu1 %v3743_v57 }
 0x1b5   : > { %3468 = vmatmul.mubr.msk.bf16.gmra.mrb[4].mxu1 %vm346_vm0, %v1889_v59 }
 0x1b6   : > { %3476 = vmatpush3.bf16.msra.mxu1 %v3743_v57  ;;  %3479 = vmatprep.mubr.msk.bf16.mxu1 %vm346_vm0, %v2016_v61 }
 0x1b7   : > { %3477 = vmatprep.subr.bf16.mxu1 %v3744_v60 }
 0x1ba   : > { %3478 = vmatpush3.bf16.msra.mxu1 %v3744_v60 }
 0x1bb   : > { %3487 = vmatprep.subr.bf16.mxu1 %v3745_v62 }
 0x1bd   : > { %3480 = vmatmul.mubr.msk.bf16.vlgmr.msra.gmra.mrb[0].mxu1 %vm346_vm0, %v2017_v63 }
 0x1be   : > { %3483 = vmatprep.mubr.msk.bf16.mxu1 %vm346_vm0, %v2018_v1  ;;  %3488 = vmatpush3.bf16.msra.mxu1 %v3745_v62  ;;  %v3111_v62 = vld [vmem:[%s3834_s13 + $0x51] sm:$0xff] }
 0x1bf   : > { %3489 = vmatprep.subr.bf16.mxu1 %v3746_v0 }
 0x1c2   : > { %3490 = vmatpush3.bf16.msra.mxu1 %v3746_v0 }
 0x1c3   : > { %3491 = vmatprep.subr.bf16.mxu1 %v3747_v2 }
 0x1c5   : > { %3484 = vmatmul.mubr.msk.bf16.gmra.mrb[4].mxu1 %vm346_vm0, %v2019_v4 }
 0x1c6   : > { %3492 = vmatpush3.bf16.msra.mxu1 %v3747_v2  ;;  %3495 = vmatprep.mubr.msk.bf16.mxu1 %vm346_vm0, %v2146_v6  ;;  %v3114_v2 = vld [vmem:[%s3834_s13 + $0x81] sm:$0xff] }
 0x1c7   : > { %3493 = vmatprep.subr.bf16.mxu1 %v3748_v5  ;;  %v3112_v6 = vld [vmem:[%s3834_s13 + $0x61] sm:$0xff] }
 0x1ca   : > { %3494 = vmatpush3.bf16.msra.mxu1 %v3748_v5 }
 0x1cb   : > { %3503 = vmatprep.subr.bf16.mxu1 %v3749_v7 }
 0x1cd   : > { %3496 = vmatmul.mubr.msk.bf16.vlgmr.msra.gmra.mrb[0].mxu1 %vm346_vm0, %v2147_v8 }
 0x1ce   : > { %3499 = vmatprep.mubr.msk.bf16.mxu1 %vm346_vm0, %v2148_v11  ;;  %3504 = vmatpush3.bf16.msra.mxu1 %v3749_v7 }
 0x1cf   : > { %3505 = vmatprep.subr.bf16.mxu1 %v3750_v9 }
 0x1d2   : > { %3506 = vmatpush3.bf16.msra.mxu1 %v3750_v9 }
 0x1d3   : > { %3507 = vmatprep.subr.bf16.mxu1 %v3751_v14 }
 0x1d5   : > { %3500 = vmatmul.mubr.msk.bf16.gmra.mrb[4].mxu1 %vm346_vm0, %v2149_v16 }
 0x1d6   : > { %3508 = vmatpush3.bf16.msra.mxu1 %v3751_v14  ;;  %3511 = vmatprep.mubr.msk.bf16.mxu1 %vm346_vm0, %v4208_v13  ;;  %v2410_v13 = vpack.c.bf16 %v2406_v28, %v4310_v3 }
 0x1d7   : > { %3509 = vmatprep.subr.bf16.mxu1 %v3752_v18 }
 0x1da   : > { %3510 = vmatpush3.bf16.msra.mxu1 %v3752_v18 }
 0x1db   : > { %3519 = vmatprep.subr.bf16.mxu1 %v3753_v19 }
 0x1dd   : > { %3512 = vmatmul.mubr.msk.bf16.vlgmr.msra.gmra.mrb[0].mxu1 %vm346_vm0, %v4213_v30 }
 0x1de   : > { %3515 = vmatprep.mubr.msk.bf16.mxu1 %vm346_vm0, %v4224_v36  ;;  %3520 = vmatpush3.bf16.msra.mxu1 %v3753_v19 }
 0x1df   : > { %3521 = vmatprep.subr.bf16.mxu1 %v3754_v21 }
 0x1e2   : > { %3522 = vmatpush3.bf16.msra.mxu1 %v3754_v21 }
 0x1e3   : > { %3523 = vmatprep.subr.bf16.mxu1 %v3755_v22 }
 0x1e5   : > { %3516 = vmatmul.mubr.msk.bf16.gmra.mrb[4].mxu1 %vm346_vm0, %v2280_v25 }
 0x1e6   : > { %3524 = vmatpush3.bf16.msra.mxu1 %v3755_v22  ;;  %3527 = vmatprep.mubr.msk.bf16.mxu1 %vm346_vm0, %v4168_v10  ;;  %v3759_v10 = vld [vmem:[%s4430_s4 + $0x110] sm:$0xff]  }
 0x1e7   : > { %3525 = vmatprep.subr.bf16.mxu1 %v3756_v12 }
 0x1ea   : > { %3526 = vmatpush3.bf16.msra.mxu1 %v3756_v12 }
 0x1eb   : > { %3535 = vmatprep.subr.bf16.mxu1 %v3757_v26 }
 0x1ed   : > { %3528 = vmatmul.mubr.msk.bf16.vlgmr.msra.gmra.mrb[0].mxu1 %vm346_vm0, %v4184_v17  ;;  %v2536_v17 = vld [vmem:[#allocation2 + $0x92] sm:$0xff] }
 0x1ee   : > { %3531 = vmatprep.mubr.msk.bf16.mxu1 %vm346_vm0, %v4196_v23  ;;  %3536 = vmatpush3.bf16.msra.mxu1 %v3757_v26  ;;  %v2540_v23 = vpack.c.bf16 %v2536_v17, %v2145_v15 }
 0x1ef   : > { %3537 = vmatprep.subr.bf16.mxu1 %v3758_v27 }
 0x1f2   : > { %3538 = vmatpush3.bf16.msra.mxu1 %v3758_v27 }
 0x1f3   : > { %3539 = vmatprep.subr.bf16.mxu1 %v3759_v10 }
 0x1f5   : > { %3532 = vmatmul.mubr.msk.bf16.gmra.mrb[4].mxu1 %vm346_vm0, %v2410_v13 }
 0x1f6   : > { %3540 = vmatpush3.bf16.msra.mxu1 %v3759_v10  ;;  %3543 = vmatprep.mubr.msk.bf16.mxu1 %vm346_vm0, %v4244_v43 }
 0x1f7   : > { %3541 = vmatprep.subr.bf16.mxu1 %v3760_v20 }
 0x1fa   : > { %3542 = vmatpush3.bf16.msra.mxu1 %v3760_v20 }
 0x1fd   : > { %3544 = vmatmul.mubr.msk.bf16.vlgmr.msra.gmra.mrb[0].mxu1 %vm346_vm0, %v4253_v46  ;;  %v3108_v46 = vld [vmem:[%s3834_s13 + $0x21] sm:$0xff] }
 0x1fe   : > { %3547 = vmatprep.mubr.msk.bf16.mxu1 %vm346_vm0, %v4265_v50 }
 0x205   : > { %3548 = vmatmul.mubr.msk.bf16.gmra.mrb[4].mxu1 %vm346_vm0, %v2540_v23 }
 0x2d0   : > { %v3545_v30 = vpop.f32.mrb[0].mxu1 }
 0x2d1   : > { %v2676_v32 = vmul.f32 %v3545_v30, %v3115_v29  ;;  %v2620_v33 = vpop.f32.mrb[1].mxu1 }
 0x2d2   : > { %v2674_v35 = vmul.f32 %v3115_v29, %v2620_v33  ;;  %v3546_v36 = vpop.f32.mrb[2].mxu1 }
 0x2d3   : > { %v2691_v37 = vadd.f32 %v3116_v31, %v2676_v32  ;;  %v2677_v39 = vmul.f32 %v3546_v36, %v3115_v29  ;;  %v2623_v40 = vpop.f32.mrb[3].mxu1 }
 0x2d4   : > { %v2689_v41 = vadd.f32 %v3116_v31, %v2674_v35  ;;  %v2675_v43 = vmul.f32 %v3115_v29, %v2623_v40 }
 0x2d5   : > { %v2699_v44 = vadd.f32 %v3109_v34, %v2691_v37  ;;  %v2692_v45 = vadd.f32 %v3116_v31, %v2677_v39 }
 0x2d6   : > { %v2697_v47 = vadd.f32 %v3107_v38, %v2689_v41  ;;  %v2690_v48 = vadd.f32 %v3116_v31, %v2675_v43 }
 0x2d7   : > { %v2707_v49 = vmax.f32 %v2699_v44, 0.0  ;;  %v2700_v50 = vadd.f32 %v3110_v42, %v2692_v45 }
 0x2d8   : > { %v2705_v51 = vmax.f32 %v2697_v47, 0.0  ;;  %v2698_v52 = vadd.f32 %v3108_v46, %v2690_v48  ;;  %v3549_v53 = vpop.f32.mrb[4].mxu1 }
 0x2d9   : > { %2715 = vst.msk [vmem:[%s4401_s23 + $0x10] sm:$0xff] %vm346_vm0, %v2707_v49  ;;  %v2708_v54 = vmax.f32 %v2700_v50, 0.0  ;;  %v2680_v55 = vmul.f32 %v3549_v53, %v3115_v29  ;;  %v2636_v56 = vpop.f32.mrb[5].mxu1 }
 0x2da   : > { %2713 = vst.msk [vmem:[%s4401_s23] sm:$0xff] %vm346_vm0, %v2705_v51  ;;  %v2706_v57 = vmax.f32 %v2698_v52, 0.0  ;;  %v2678_v59 = vmul.f32 %v3115_v29, %v2636_v56  ;;  %v3550_v60 = vpop.f32.mrb[6].mxu1 }
 0x2db   : > { %2716 = vst.msk [vmem:[%s4401_s23 + $0x18] sm:$0xff] %vm346_vm0, %v2708_v54  ;;  %v2695_v61 = vadd.f32 %v3116_v31, %v2680_v55  ;;  %v2681_v63 = vmul.f32 %v3550_v60, %v3115_v29  ;;  %v2639_v0 = vpop.f32.mrb[7].mxu1 }
 0x2dc   : > { %2714 = vst.msk [vmem:[%s4401_s23 + $0x8] sm:$0xff] %vm346_vm0, %v2706_v57  ;;  %v2693_v1 = vadd.f32 %v3116_v31, %v2678_v59  ;;  %v2679_v3 = vmul.f32 %v3115_v29, %v2639_v0 }
 0x2dd   : > { %v2703_v4 = vadd.f32 %v3113_v58, %v2695_v61  ;;  %v2696_v5 = vadd.f32 %v3116_v31, %v2681_v63 }
 0x2de   : > { %v2701_v7 = vadd.f32 %v3111_v62, %v2693_v1  ;;  %v2694_v8 = vadd.f32 %v3116_v31, %v2679_v3 }
 0x2df   : > { %v2711_v9 = vmax.f32 %v2703_v4, 0.0  ;;  %v2704_v11 = vadd.f32 %v3114_v2, %v2696_v5 }
 0x2e0   : > { %v2709_v14 = vmax.f32 %v2701_v7, 0.0  ;;  %v2702_v15 = vadd.f32 %v3112_v6, %v2694_v8 }
 0x2e1   : > { %2719 = vst.msk [vmem:[%s4401_s23 + $0x30] sm:$0xff] %vm346_vm0, %v2711_v9  ;;  %v2712_v16 = vmax.f32 %v2704_v11, 0.0 }
 0x2e2   : > { %2717 = vst.msk [vmem:[%s4401_s23 + $0x20] sm:$0xff] %vm346_vm0, %v2709_v14  ;;  %v2710_v18 = vmax.f32 %v2702_v15, 0.0 }
 0x2e3   : > { %2720 = vst.msk [vmem:[%s4401_s23 + $0x38] sm:$0xff] %vm346_vm0, %v2712_v16 }
 0x2e4   : > { %2718 = vst.msk [vmem:[%s4401_s23 + $0x28] sm:$0xff] %vm346_vm0, %v2710_v18 }
 0x2e5 PF: > { %s17_s24 = sadd.s32 1, %s3767_s24  }
 0x2e6   : > { %p14_p5 = scmp.ge.s32.totalorder %s17_s24, 4  }
 0x2e8   :  { %16 = sbr.rel (!%p14_p5) target bundleno = 1 (0x1), region = 98 }

// kernel: spatial_encoder_forward.16
= control target key start
LH: loop header
LB: loop body
LE: loop exit
PB: predicated region body
PF: predicated region fallthrough
CT: control target
= control target key end

     0   :  { %s968_s1 = inlined_call_operand.vmem [shape: bf16[640,128], index: 1, kind: input, shape index: {}]   ;;  %s969_s0 = inlined_call_operand.vmem [shape: bf16[32,640], index: 0, kind: input, shape index: {}]   ;;  %s970_s2 = inlined_call_operand.vmem [shape: f32[1,128], index: 2, kind: input, shape index: {}]   ;;  %s971_s3 = inlined_call_operand.vmem [shape: f32[1,128], index: 3, kind: input, shape index: {}]   ;;  %s972_s4 = inlined_call_operand.vmem [shape: f32[32,128], index: 4, kind: output, shape index: {}]  }
   0x1   :  { %v721_v0 = vld [vmem:[%s968_s1 + $0x40] sm:$0xff]   ;;  %v725_v4 = vld [vmem:[%s968_s1 + $0x48] sm:$0xff]   ;;  %v729_v8 = vld [vmem:[%s968_s1 + $0x50] sm:$0xff]  }
   0x2   :  { %v722_v1 = vld [vmem:[%s968_s1 + $0xc0] sm:$0xff]   ;;  %635 = vmatprep.subr.bf16.mxu0 %v721_v0  ;;  %v726_v5 = vld [vmem:[%s968_s1 + $0xc8] sm:$0xff]   ;;  %v730_v9 = vld [vmem:[%s968_s1 + $0xd0] sm:$0xff]  }
   0x3   :  { %v723_v2 = vld [vmem:[%s968_s1] sm:$0xff]   ;;  %663 = vmatprep.subr.bf16.mxu1 %v722_v1  ;;  %v727_v6 = vld [vmem:[%s968_s1 + $0x8] sm:$0xff]   ;;  %v731_v10 = vld [vmem:[%s968_s1 + $0x10] sm:$0xff]  }
   0x4   :  { %v724_v3 = vld [vmem:[%s968_s1 + $0x80] sm:$0xff]   ;;  %636 = vmatpush3.bf16.msra.mxu0 %v723_v2  ;;  %v728_v7 = vld [vmem:[%s968_s1 + $0x88] sm:$0xff]   ;;  %v732_v11 = vld [vmem:[%s968_s1 + $0x90] sm:$0xff]  }
   0x5   :  { %664 = vmatpush3.bf16.msra.mxu1 %v724_v3  ;;  %637 = vmatprep.subr.bf16.mxu0 %v725_v4  ;;  %v733_v12 = vld [vmem:[%s968_s1 + $0x58] sm:$0xff]   ;;  %v737_v16 = vld [vmem:[%s968_s1 + $0x60] sm:$0xff]   ;;  %v741_v20 = vld [vmem:[%s968_s1 + $0x68] sm:$0xff]  }
   0x6   :  { %665 = vmatprep.subr.bf16.mxu1 %v726_v5  ;;  %v734_v13 = vld [vmem:[%s968_s1 + $0xd8] sm:$0xff]   ;;  %v738_v17 = vld [vmem:[%s968_s1 + $0xe0] sm:$0xff]   ;;  %v742_v21 = vld [vmem:[%s968_s1 + $0xe8] sm:$0xff]  }
   0x7   :  { %v735_v14 = vld [vmem:[%s968_s1 + $0x18] sm:$0xff]   ;;  %v739_v18 = vld [vmem:[%s968_s1 + $0x20] sm:$0xff]   ;;  %v743_v22 = vld [vmem:[%s968_s1 + $0x28] sm:$0xff]  }
   0x8   :  { %638 = vmatpush3.bf16.msra.mxu0 %v727_v6  ;;  %v736_v15 = vld [vmem:[%s968_s1 + $0x98] sm:$0xff]   ;;  %v740_v19 = vld [vmem:[%s968_s1 + $0xa0] sm:$0xff]   ;;  %v744_v23 = vld [vmem:[%s968_s1 + $0xa8] sm:$0xff]  }
   0x9   :  { %666 = vmatpush3.bf16.msra.mxu1 %v728_v7  ;;  %639 = vmatprep.subr.bf16.mxu0 %v729_v8  ;;  %v745_v24 = vld [vmem:[%s968_s1 + $0x70] sm:$0xff]   ;;  %v749_v28 = vld [vmem:[%s968_s1 + $0x78] sm:$0xff]   ;;  %v758_v35 = vld [vmem:[%s969_s0 + $0xc] ss:$20 sps:$4 sm:$0xff]  }
   0xa   :  { %667 = vmatprep.subr.bf16.mxu1 %v730_v9  ;;  %v746_v25 = vld [vmem:[%s968_s1 + $0xf0] sm:$0xff]   ;;  %v750_v29 = vld [vmem:[%s968_s1 + $0xf8] sm:$0xff]   ;;  %v759_v36 = vld [vmem:[%s968_s1 + $0x100] sm:$0xff]   ;;  %483 = vmatprep.mubr.bf16.mxu1 %v758_v35 }
   0xb   :  { %v747_v26 = vld [vmem:[%s968_s1 + $0x30] sm:$0xff]   ;;  %v751_v30 = vld [vmem:[%s968_s1 + $0x38] sm:$0xff]   ;;  %v760_v37 = vld [vmem:[%s968_s1 + $0x108] sm:$0xff]  }
   0xc   :  { %640 = vmatpush3.bf16.msra.mxu0 %v731_v10  ;;  %v748_v27 = vld [vmem:[%s968_s1 + $0xb0] sm:$0xff]   ;;  %v752_v31 = vld [vmem:[%s968_s1 + $0xb8] sm:$0xff]   ;;  %v764_v39 = vld [vmem:[%s969_s0 + $0x2c] ss:$20 sps:$4 sm:$0xff]  }
   0xd   :  { %668 = vmatpush3.bf16.msra.mxu1 %v732_v11  ;;  %641 = vmatprep.subr.bf16.mxu0 %v733_v12  ;;  %v753_v32 = vld [vmem:[%s969_s0] ss:$20 sps:$4 sm:$0xff]   ;;  %v755_v33 = vld [vmem:[%s969_s0 + $0x4] ss:$20 sps:$4 sm:$0xff]   ;;  %v756_v34 = vld [vmem:[%s969_s0 + $0x8] ss:$20 sps:$4 sm:$0xff]  }
   0xe   :  { %669 = vmatprep.subr.bf16.mxu1 %v734_v13  ;;  %434 = vmatprep.mubr.bf16.mxu0 %v755_v33  ;;  %v761_v38 = vld [vmem:[%s968_s1 + $0x110] sm:$0xff]   ;;  %v762_v41 = vld [vmem:[%s968_s1 + $0x118] sm:$0xff]   ;;  %v763_v45 = vld [vmem:[%s968_s1 + $0x120] sm:$0xff]  }
   0xf   :  { %v766_v40 = vld [vmem:[%s969_s0 + $0x34] ss:$20 sps:$4 sm:$0xff]   ;;  %v770_v43 = vld [vmem:[%s969_s0 + $0x30] ss:$20 sps:$4 sm:$0xff]   ;;  %v772_v48 = vld [vmem:[%s968_s1 + $0x138] sm:$0xff]  }
  0x10   :  { %642 = vmatpush3.bf16.msra.mxu0 %v735_v14  ;;  %v769_v42 = vld [vmem:[%s969_s0 + $0x28] ss:$20 sps:$4 sm:$0xff]   ;;  %v773_v44 = vld [vmem:[%s969_s0 + $0x10] ss:$20 sps:$4 sm:$0xff]   ;;  %v774_v49 = vld [vmem:[%s969_s0 + $0x38] ss:$20 sps:$4 sm:$0xff]  }
  0x11   :  { %670 = vmatpush3.bf16.msra.mxu1 %v736_v15  ;;  %643 = vmatprep.subr.bf16.mxu0 %v737_v16  ;;  %v768_v46 = vld [vmem:[%s968_s1 + $0x128] sm:$0xff]   ;;  %v771_v47 = vld [vmem:[%s968_s1 + $0x130] sm:$0xff]   ;;  %v633_v15 = vld [vmem:[%s970_s2] ss:$0 sm:$0xff] }
  0x12   :  { %671 = vmatprep.subr.bf16.mxu1 %v738_v17 }
  0x14   :  { %644 = vmatpush3.bf16.msra.mxu0 %v739_v18  ;;  %v634_v18 = vld [vmem:[%s971_s3] ss:$0 sm:$0xff] }
  0x15   :  { %672 = vmatpush3.bf16.msra.mxu1 %v740_v19  ;;  %645 = vmatprep.subr.bf16.mxu0 %v741_v20 }
  0x16   :  { %673 = vmatprep.subr.bf16.mxu1 %v742_v21 }
  0x18   :  { %646 = vmatpush3.bf16.msra.mxu0 %v743_v22 }
  0x19   :  { %674 = vmatpush3.bf16.msra.mxu1 %v744_v23  ;;  %647 = vmatprep.subr.bf16.mxu0 %v745_v24 }
  0x1a   :  { %675 = vmatprep.subr.bf16.mxu1 %v746_v25 }
  0x1c   :  { %648 = vmatpush3.bf16.msra.mxu0 %v747_v26 }
  0x1d   :  { %676 = vmatpush3.bf16.msra.mxu1 %v748_v27  ;;  %649 = vmatprep.subr.bf16.mxu0 %v749_v28 }
  0x1e   :  { %677 = vmatprep.subr.bf16.mxu1 %v750_v29 }
  0x20   :  { %650 = vmatpush3.bf16.msra.mxu0 %v751_v30 }
  0x21   :  { %678 = vmatpush3.bf16.msra.mxu1 %v752_v31  ;;  %701 = vmatprep.subr.bf16.mxu0 %v759_v36 }
  0x23   :  { %435 = vmatmul.mubr.bf16.vlgmr.msra.gmra.mrb[0].mxu0 %v753_v32 }
  0x24   :  { %484 = vmatmul.mubr.bf16.vlgmr.msra.gmra.mrb[0].mxu1 %v756_v34  ;;  %702 = vmatpush3.bf16.msra.mxu0 %v759_v36 }
  0x25   :  { %703 = vmatprep.subr.bf16.mxu0 %v760_v37  ;;  %442 = vmatprep.mubr.bf16.mxu0 %v764_v39 }
  0x26   :  { %491 = vmatprep.mubr.bf16.mxu1 %v766_v40 }
  0x28   :  { %704 = vmatpush3.bf16.msra.mxu0 %v760_v37 }
  0x29   :  { %705 = vmatprep.subr.bf16.mxu0 %v761_v38 }
  0x2b   :  { %443 = vmatmul.mubr.bf16.gmra.mrb[4].mxu0 %v769_v42 }
  0x2c   :  { %492 = vmatmul.mubr.bf16.gmra.mrb[4].mxu1 %v770_v43  ;;  %706 = vmatpush3.bf16.msra.mxu0 %v761_v38 }
  0x2d   :  { %707 = vmatprep.subr.bf16.mxu0 %v762_v41  ;;  %717 = vmatprep.mubr.bf16.mxu0 %v773_v44 }
  0x30   :  { %708 = vmatpush3.bf16.msra.mxu0 %v762_v41 }
  0x31   :  { %709 = vmatprep.subr.bf16.mxu0 %v763_v45 }
  0x34   :  { %710 = vmatpush3.bf16.msra.mxu0 %v763_v45 }
  0x35   :  { %711 = vmatprep.subr.bf16.mxu0 %v768_v46 }
  0x38   :  { %712 = vmatpush3.bf16.msra.mxu0 %v768_v46 }
  0x39   :  { %713 = vmatprep.subr.bf16.mxu0 %v771_v47 }
  0x3c   :  { %714 = vmatpush3.bf16.msra.mxu0 %v771_v47 }
  0x3d   :  { %715 = vmatprep.subr.bf16.mxu0 %v772_v48 }
  0x40   :  { %716 = vmatpush3.bf16.msra.mxu0 %v772_v48 }
  0x43   :  { %718 = vmatmul.mubr.bf16.vlgmr.msra.gmra.mrb[8].mxu0 %v774_v49 }
  0xf6   :  { %v651_v50 = vpop.f32.mrb[0].mxu0 }
  0xf7   :  { %v679_v51 = vpop.f32.mrb[0].mxu1  ;;  %v652_v52 = vpop.f32.mrb[1].mxu0 }
  0xf8   :  { %v653_v53 = vadd.f32 %v652_v52, %v651_v50  ;;  %v680_v54 = vpop.f32.mrb[1].mxu1  ;;  %v654_v55 = vpop.f32.mrb[2].mxu0 }
  0xf9   :  { %v681_v56 = vadd.f32 %v680_v54, %v679_v51  ;;  %v682_v57 = vpop.f32.mrb[2].mxu1  ;;  %v655_v58 = vpop.f32.mrb[3].mxu0 }
  0xfa   :  { %v656_v59 = vadd.f32 %v655_v58, %v654_v55  ;;  %v683_v60 = vpop.f32.mrb[3].mxu1 }
  0xfb   :  { %v684_v61 = vadd.f32 %v683_v60, %v682_v57  ;;  %v486_v62 = vadd.f32 %v681_v56, %v653_v53 }
  0xfd   :  { %v489_v63 = vadd.f32 %v684_v61, %v656_v59 }
  0xfe   :  { %v657_v0 = vpop.f32.mrb[4].mxu0 }
  0xff   :  { %v685_v1 = vpop.f32.mrb[4].mxu1  ;;  %v658_v2 = vpop.f32.mrb[5].mxu0 }
 0x100   :  { %v659_v3 = vadd.f32 %v658_v2, %v657_v0  ;;  %v686_v4 = vpop.f32.mrb[5].mxu1  ;;  %v660_v5 = vpop.f32.mrb[6].mxu0 }
 0x101   :  { %v687_v6 = vadd.f32 %v686_v4, %v685_v1  ;;  %v688_v7 = vpop.f32.mrb[6].mxu1  ;;  %v661_v8 = vpop.f32.mrb[7].mxu0 }
 0x102   :  { %v662_v9 = vadd.f32 %v661_v8, %v660_v5  ;;  %v689_v10 = vpop.f32.mrb[7].mxu1 }
 0x103   :  { %v690_v11 = vadd.f32 %v689_v10, %v688_v7  ;;  %v494_v12 = vadd.f32 %v687_v6, %v659_v3 }
 0x105   :  { %v497_v13 = vadd.f32 %v690_v11, %v662_v9 }
 0x116   :  { %v719_v14 = vpop.f32.mrb[8].mxu0 }
 0x117   :  { %v543_v16 = vadd.f32 %v719_v14, %v494_v12  ;;  %v534_v17 = vpop.f32.mrb[9].mxu0 }
 0x118   :  { %v535_v19 = vadd.f32 %v534_v17, %v486_v62  ;;  %v720_v20 = vpop.f32.mrb[10].mxu0 }
 0x119   :  { %v558_v21 = vmul.f32 %v633_v15, %v543_v16  ;;  %v546_v22 = vadd.f32 %v720_v20, %v497_v13  ;;  %v537_v23 = vpop.f32.mrb[11].mxu0 }
 0x11a   :  { %v556_v24 = vmul.f32 %v633_v15, %v535_v19  ;;  %v538_v25 = vadd.f32 %v537_v23, %v489_v63 }
 0x11b   :  { %v569_v26 = vadd.f32 %v634_v18, %v558_v21  ;;  %v559_v27 = vmul.f32 %v633_v15, %v546_v22 }
 0x11c   :  { %v567_v28 = vadd.f32 %v634_v18, %v556_v24  ;;  %v557_v29 = vmul.f32 %v633_v15, %v538_v25 }
 0x11d   :  { %v573_v30 = vmax.f32 %v569_v26, 0.0  ;;  %v570_v31 = vadd.f32 %v634_v18, %v559_v27 }
 0x11e   :  { %v571_v32 = vmax.f32 %v567_v28, 0.0  ;;  %v568_v33 = vadd.f32 %v634_v18, %v557_v29 }
 0x11f   :  { %577 = vst [vmem:[%s972_s4 + $0x10] sm:$0xff] %v573_v30  ;;  %v574_v34 = vmax.f32 %v570_v31, 0.0 }
 0x120   :  { %575 = vst [vmem:[%s972_s4] sm:$0xff] %v571_v32  ;;  %v572_v35 = vmax.f32 %v568_v33, 0.0 }
 0x121   :  { %578 = vst [vmem:[%s972_s4 + $0x18] sm:$0xff] %v574_v34 }
 0x122   :  { %576 = vst [vmem:[%s972_s4 + $0x8] sm:$0xff] %v572_v35 }

// kernel: spatial_encoder_forward.17
= control target key start
LH: loop header
LB: loop body
LE: loop exit
PB: predicated region body
PF: predicated region fallthrough
CT: control target
= control target key end

     0   :  { %s302_s1 = inlined_call_operand.vmem [shape: bf16[128,128], index: 1, kind: input, shape index: {}]   ;;  %s303_s0 = inlined_call_operand.vmem [shape: bf16[32,128], index: 0, kind: input, shape index: {}]   ;;  %s304_s2 = inlined_call_operand.vmem [shape: f32[1,128], index: 2, kind: input, shape index: {}]   ;;  %s305_s3 = inlined_call_operand.vmem [shape: f32[1,128], index: 3, kind: input, shape index: {}]   ;;  %s306_s4 = inlined_call_operand.vmem [shape: f32[32,128], index: 4, kind: output, shape index: {}]  }
   0x1   :  { %v219_v0 = vld [vmem:[%s302_s1] sm:$0xff]   ;;  %v220_v1 = vld [vmem:[%s302_s1 + $0x8] sm:$0xff]   ;;  %v221_v2 = vld [vmem:[%s302_s1 + $0x10] sm:$0xff]  }
   0x2   :  { %199 = vmatprep.subr.bf16.mxu0 %v219_v0  ;;  %v222_v3 = vld [vmem:[%s302_s1 + $0x18] sm:$0xff]   ;;  %v227_v4 = vld [vmem:[%s303_s0] sm:$0xff]   ;;  %v224_v6 = vld [vmem:[%s302_s1 + $0x28] sm:$0xff]  }
   0x3   :  { %200 = vmatpush3.bf16.msra.mxu0 %v219_v0  ;;  %215 = vmatprep.mubr.bf16.mxu0 %v227_v4  ;;  %v223_v5 = vld [vmem:[%s302_s1 + $0x20] sm:$0xff]   ;;  %v225_v7 = vld [vmem:[%s302_s1 + $0x30] sm:$0xff]   ;;  %v226_v8 = vld [vmem:[%s302_s1 + $0x38] sm:$0xff]  }
   0x4   :  { %201 = vmatprep.subr.bf16.mxu0 %v220_v1  ;;  %v228_v9 = vld [vmem:[%s303_s0 + $0x8] sm:$0xff]   ;;  %v187_v10 = vld [vmem:[%s304_s2] ss:$0 sm:$0xff] }
   0x5   :  { %v188_v12 = vld [vmem:[%s305_s3] ss:$0 sm:$0xff] }
   0x7   :  { %202 = vmatpush3.bf16.msra.mxu0 %v220_v1 }
   0x8   :  { %203 = vmatprep.subr.bf16.mxu0 %v221_v2 }
   0xb   :  { %204 = vmatpush3.bf16.msra.mxu0 %v221_v2 }
   0xc   :  { %205 = vmatprep.subr.bf16.mxu0 %v222_v3 }
   0xf   :  { %206 = vmatpush3.bf16.msra.mxu0 %v222_v3 }
  0x10   :  { %207 = vmatprep.subr.bf16.mxu0 %v223_v5 }
  0x13   :  { %208 = vmatpush3.bf16.msra.mxu0 %v223_v5 }
  0x14   :  { %209 = vmatprep.subr.bf16.mxu0 %v224_v6 }
  0x17   :  { %210 = vmatpush3.bf16.msra.mxu0 %v224_v6 }
  0x18   :  { %211 = vmatprep.subr.bf16.mxu0 %v225_v7 }
  0x1b   :  { %212 = vmatpush3.bf16.msra.mxu0 %v225_v7 }
  0x1c   :  { %213 = vmatprep.subr.bf16.mxu0 %v226_v8 }
  0x1f   :  { %214 = vmatpush3.bf16.msra.mxu0 %v226_v8 }
  0x22   :  { %216 = vmatmul.mubr.bf16.vlgmr.msra.gmra.mrb[0].mxu0 %v228_v9 }
  0xf5   :  { %v217_v11 = vpop.f32.mrb[0].mxu0 }
  0xf6   :  { %v156_v13 = vmul.f32 %v217_v11, %v187_v10  ;;  %v132_v14 = vpop.f32.mrb[1].mxu0 }
  0xf7   :  { %v154_v15 = vmul.f32 %v187_v10, %v132_v14  ;;  %v218_v16 = vpop.f32.mrb[2].mxu0 }
  0xf8   :  { %v167_v17 = vadd.f32 %v188_v12, %v156_v13  ;;  %v157_v18 = vmul.f32 %v218_v16, %v187_v10  ;;  %v135_v19 = vpop.f32.mrb[3].mxu0 }
  0xf9   :  { %v165_v20 = vadd.f32 %v188_v12, %v154_v15  ;;  %v155_v21 = vmul.f32 %v187_v10, %v135_v19 }
  0xfa   :  { %171 = vst [vmem:[%s306_s4 + $0x10] sm:$0xff] %v167_v17  ;;  %v168_v22 = vadd.f32 %v188_v12, %v157_v18 }
  0xfb   :  { %169 = vst [vmem:[%s306_s4] sm:$0xff] %v165_v20  ;;  %v166_v23 = vadd.f32 %v188_v12, %v155_v21 }
  0xfc   :  { %172 = vst [vmem:[%s306_s4 + $0x18] sm:$0xff] %v168_v22 }
  0xfd   :  { %170 = vst [vmem:[%s306_s4 + $0x8] sm:$0xff] %v166_v23 }

// kernel: spatial_encoder_forward.19
= control target key start
LH: loop header
LB: loop body
LE: loop exit
PB: predicated region body
PF: predicated region fallthrough
CT: control target
= control target key end

     0   :  { %s1630_s1 = inlined_call_operand.vmem [shape: bf16[1152,128], index: 1, kind: input, shape index: {}]   ;;  %s1631_s0 = inlined_call_operand.vmem [shape: bf16[32,1152], index: 0, kind: input, shape index: {}]   ;;  %s1632_s2 = inlined_call_operand.vmem [shape: f32[1,128], index: 2, kind: input, shape index: {}]   ;;  %s1633_s3 = inlined_call_operand.vmem [shape: f32[1,128], index: 3, kind: input, shape index: {}]   ;;  %s1634_s4 = inlined_call_operand.vmem [shape: f32[32,128], index: 4, kind: output, shape index: {}]  }
   0x1   :  { %v1219_v0 = vld [vmem:[%s1630_s1 + $0x40] sm:$0xff]   ;;  %v1223_v4 = vld [vmem:[%s1630_s1 + $0x48] sm:$0xff]   ;;  %v1227_v8 = vld [vmem:[%s1630_s1 + $0x50] sm:$0xff]  }
   0x2   :  { %v1220_v1 = vld [vmem:[%s1630_s1 + $0xc0] sm:$0xff]   ;;  %1077 = vmatprep.subr.bf16.mxu0 %v1219_v0  ;;  %v1224_v5 = vld [vmem:[%s1630_s1 + $0xc8] sm:$0xff]   ;;  %v1228_v9 = vld [vmem:[%s1630_s1 + $0xd0] sm:$0xff]  }
   0x3   :  { %v1221_v2 = vld [vmem:[%s1630_s1] sm:$0xff]   ;;  %1105 = vmatprep.subr.bf16.mxu1 %v1220_v1  ;;  %v1225_v6 = vld [vmem:[%s1630_s1 + $0x8] sm:$0xff]   ;;  %v1229_v10 = vld [vmem:[%s1630_s1 + $0x10] sm:$0xff]  }
   0x4   :  { %v1222_v3 = vld [vmem:[%s1630_s1 + $0x80] sm:$0xff]   ;;  %1078 = vmatpush3.bf16.msra.mxu0 %v1221_v2  ;;  %v1226_v7 = vld [vmem:[%s1630_s1 + $0x88] sm:$0xff]   ;;  %v1230_v11 = vld [vmem:[%s1630_s1 + $0x90] sm:$0xff]  }
   0x5   :  { %1106 = vmatpush3.bf16.msra.mxu1 %v1222_v3  ;;  %1079 = vmatprep.subr.bf16.mxu0 %v1223_v4  ;;  %v1231_v12 = vld [vmem:[%s1630_s1 + $0x58] sm:$0xff]   ;;  %v1235_v16 = vld [vmem:[%s1630_s1 + $0x60] sm:$0xff]   ;;  %v1239_v20 = vld [vmem:[%s1630_s1 + $0x68] sm:$0xff]  }
   0x6   :  { %1107 = vmatprep.subr.bf16.mxu1 %v1224_v5  ;;  %v1232_v13 = vld [vmem:[%s1630_s1 + $0xd8] sm:$0xff]   ;;  %v1236_v17 = vld [vmem:[%s1630_s1 + $0xe0] sm:$0xff]   ;;  %v1240_v21 = vld [vmem:[%s1630_s1 + $0xe8] sm:$0xff]  }
   0x7   :  { %v1233_v14 = vld [vmem:[%s1630_s1 + $0x18] sm:$0xff]   ;;  %v1237_v18 = vld [vmem:[%s1630_s1 + $0x20] sm:$0xff]   ;;  %v1241_v22 = vld [vmem:[%s1630_s1 + $0x28] sm:$0xff]  }
   0x8   :  { %1080 = vmatpush3.bf16.msra.mxu0 %v1225_v6  ;;  %v1234_v15 = vld [vmem:[%s1630_s1 + $0x98] sm:$0xff]   ;;  %v1238_v19 = vld [vmem:[%s1630_s1 + $0xa0] sm:$0xff]   ;;  %v1242_v23 = vld [vmem:[%s1630_s1 + $0xa8] sm:$0xff]  }
   0x9   :  { %1108 = vmatpush3.bf16.msra.mxu1 %v1226_v7  ;;  %1081 = vmatprep.subr.bf16.mxu0 %v1227_v8  ;;  %v1243_v24 = vld [vmem:[%s1630_s1 + $0x70] sm:$0xff]   ;;  %v1247_v28 = vld [vmem:[%s1630_s1 + $0x78] sm:$0xff]   ;;  %v1251_v32 = vld [vmem:[%s1631_s0] ss:$36 sps:$4 sm:$0xff]  }
   0xa   :  { %1109 = vmatprep.subr.bf16.mxu1 %v1228_v9  ;;  %v1244_v25 = vld [vmem:[%s1630_s1 + $0xf0] sm:$0xff]   ;;  %v1248_v29 = vld [vmem:[%s1630_s1 + $0xf8] sm:$0xff]   ;;  %v1253_v33 = vld [vmem:[%s1631_s0 + $0x4] ss:$36 sps:$4 sm:$0xff]  }
   0xb   :  { %v1245_v26 = vld [vmem:[%s1630_s1 + $0x30] sm:$0xff]   ;;  %v1249_v30 = vld [vmem:[%s1630_s1 + $0x38] sm:$0xff]   ;;  %v1254_v34 = vld [vmem:[%s1631_s0 + $0x8] ss:$36 sps:$4 sm:$0xff]   ;;  %738 = vmatprep.mubr.bf16.mxu0 %v1253_v33 }
   0xc   :  { %1082 = vmatpush3.bf16.msra.mxu0 %v1229_v10  ;;  %v1246_v27 = vld [vmem:[%s1630_s1 + $0xb0] sm:$0xff]   ;;  %v1250_v31 = vld [vmem:[%s1630_s1 + $0xb8] sm:$0xff]   ;;  %v1257_v36 = vld [vmem:[%s1630_s1 + $0x140] sm:$0xff]  }
   0xd   :  { %1110 = vmatpush3.bf16.msra.mxu1 %v1230_v11  ;;  %1083 = vmatprep.subr.bf16.mxu0 %v1231_v12  ;;  %v1256_v35 = vld [vmem:[%s1631_s0 + $0xc] ss:$36 sps:$4 sm:$0xff]   ;;  %v1258_v37 = vld [vmem:[%s1630_s1 + $0x100] sm:$0xff]   ;;  %v1269_v48 = vld [vmem:[%s1630_s1 + $0x158] sm:$0xff]  }
   0xe   :  { %1111 = vmatprep.subr.bf16.mxu1 %v1232_v13  ;;  %787 = vmatprep.mubr.bf16.mxu1 %v1256_v35  ;;  %v1259_v38 = vld [vmem:[%s1630_s1 + $0x1c0] sm:$0xff]   ;;  %v1261_v40 = vld [vmem:[%s1630_s1 + $0x148] sm:$0xff]   ;;  %v1265_v44 = vld [vmem:[%s1630_s1 + $0x150] sm:$0xff]  }
   0xf   :  { %v1260_v39 = vld [vmem:[%s1630_s1 + $0x180] sm:$0xff]   ;;  %v1262_v41 = vld [vmem:[%s1630_s1 + $0x108] sm:$0xff]   ;;  %v1266_v45 = vld [vmem:[%s1630_s1 + $0x110] sm:$0xff]  }
  0x10   :  { %1084 = vmatpush3.bf16.msra.mxu0 %v1233_v14  ;;  %v1263_v42 = vld [vmem:[%s1630_s1 + $0x1c8] sm:$0xff]   ;;  %v1267_v46 = vld [vmem:[%s1630_s1 + $0x1d0] sm:$0xff]   ;;  %v1270_v49 = vld [vmem:[%s1630_s1 + $0x118] sm:$0xff]  }
  0x11   :  { %1112 = vmatpush3.bf16.msra.mxu1 %v1234_v15  ;;  %1085 = vmatprep.subr.bf16.mxu0 %v1235_v16  ;;  %v1264_v43 = vld [vmem:[%s1630_s1 + $0x188] sm:$0xff]   ;;  %v1268_v47 = vld [vmem:[%s1630_s1 + $0x190] sm:$0xff]   ;;  %v1271_v50 = vld [vmem:[%s1630_s1 + $0x1d8] sm:$0xff]  }
  0x12   :  { %1113 = vmatprep.subr.bf16.mxu1 %v1236_v17  ;;  %v1272_v51 = vld [vmem:[%s1630_s1 + $0x198] sm:$0xff]   ;;  %v1273_v52 = vld [vmem:[%s1630_s1 + $0x160] sm:$0xff]   ;;  %v1277_v56 = vld [vmem:[%s1630_s1 + $0x168] sm:$0xff]  }
  0x13   :  { %v1274_v53 = vld [vmem:[%s1630_s1 + $0x120] sm:$0xff]   ;;  %v1278_v57 = vld [vmem:[%s1631_s0 + $0x4c] ss:$36 sps:$4 sm:$0xff]   ;;  %v1280_v58 = vld [vmem:[%s1631_s0 + $0x54] ss:$36 sps:$4 sm:$0xff]  }
  0x14   :  { %1086 = vmatpush3.bf16.msra.mxu0 %v1237_v18  ;;  %v1275_v54 = vld [vmem:[%s1630_s1 + $0x1e0] sm:$0xff]   ;;  %v1282_v59 = vld [vmem:[%s1630_s1 + $0x128] sm:$0xff]   ;;  %v1284_v61 = vld [vmem:[%s1631_s0 + $0x50] ss:$36 sps:$4 sm:$0xff]  }
  0x15   :  { %1114 = vmatpush3.bf16.msra.mxu1 %v1238_v19  ;;  %1087 = vmatprep.subr.bf16.mxu0 %v1239_v20  ;;  %v1276_v55 = vld [vmem:[%s1630_s1 + $0x1a0] sm:$0xff]   ;;  %v1283_v60 = vld [vmem:[%s1631_s0 + $0x48] ss:$36 sps:$4 sm:$0xff]   ;;  %v1287_v0 = vld [vmem:[%s1630_s1 + $0x170] sm:$0xff]  }
  0x16   :  { %1115 = vmatprep.subr.bf16.mxu1 %v1240_v21  ;;  %v1285_v62 = vld [vmem:[%s1630_s1 + $0x1e8] sm:$0xff]   ;;  %v1288_v1 = vld [vmem:[%s1630_s1 + $0x130] sm:$0xff]   ;;  %v1291_v4 = vld [vmem:[%s1630_s1 + $0x178] sm:$0xff]  }
  0x17   :  { %v1286_v63 = vld [vmem:[%s1630_s1 + $0x1a8] sm:$0xff]   ;;  %v1289_v2 = vld [vmem:[%s1630_s1 + $0x1f0] sm:$0xff]   ;;  %v1292_v5 = vld [vmem:[%s1630_s1 + $0x138] sm:$0xff]  }
  0x18   :  { %1088 = vmatpush3.bf16.msra.mxu0 %v1241_v22  ;;  %v1290_v3 = vld [vmem:[%s1630_s1 + $0x1b0] sm:$0xff]   ;;  %v1293_v6 = vld [vmem:[%s1630_s1 + $0x1f8] sm:$0xff]   ;;  %v1298_v10 = vld [vmem:[%s1630_s1 + $0x200] sm:$0xff]  }
  0x19   :  { %1116 = vmatpush3.bf16.msra.mxu1 %v1242_v23  ;;  %1089 = vmatprep.subr.bf16.mxu0 %v1243_v24  ;;  %v1294_v7 = vld [vmem:[%s1631_s0 + $0x10] ss:$36 sps:$4 sm:$0xff]   ;;  %v1297_v9 = vld [vmem:[%s1630_s1 + $0x1b8] sm:$0xff]   ;;  %v1302_v13 = vld [vmem:[%s1630_s1 + $0x208] sm:$0xff]  }
  0x1a   :  { %1117 = vmatprep.subr.bf16.mxu1 %v1244_v25  ;;  %v1296_v8 = vld [vmem:[%s1631_s0 + $0x14] ss:$36 sps:$4 sm:$0xff]   ;;  %v1301_v12 = vld [vmem:[%s1631_s0 + $0x1c] ss:$36 sps:$4 sm:$0xff]   ;;  %v1307_v17 = vld [vmem:[%s1631_s0 + $0x64] ss:$36 sps:$4 sm:$0xff]  }
  0x1b   :  { %v1299_v11 = vld [vmem:[%s1631_s0 + $0x18] ss:$36 sps:$4 sm:$0xff]   ;;  %v1306_v16 = vld [vmem:[%s1630_s1 + $0x210] sm:$0xff]   ;;  %v1309_v18 = vld [vmem:[%s1631_s0 + $0x60] ss:$36 sps:$4 sm:$0xff]  }
  0x1c   :  { %1090 = vmatpush3.bf16.msra.mxu0 %v1245_v26  ;;  %v1303_v14 = vld [vmem:[%s1631_s0 + $0x5c] ss:$36 sps:$4 sm:$0xff]   ;;  %v1312_v22 = vld [vmem:[%s1630_s1 + $0x228] sm:$0xff]   ;;  %v1313_v23 = vld [vmem:[%s1630_s1 + $0x230] sm:$0xff]  }
  0x1d   :  { %1118 = vmatpush3.bf16.msra.mxu1 %v1246_v27  ;;  %1091 = vmatprep.subr.bf16.mxu0 %v1247_v28  ;;  %v1305_v15 = vld [vmem:[%s1631_s0 + $0x58] ss:$36 sps:$4 sm:$0xff]   ;;  %v1311_v20 = vld [vmem:[%s1630_s1 + $0x220] sm:$0xff]   ;;  %v1316_v25 = vld [vmem:[%s1631_s0 + $0x68] ss:$36 sps:$4 sm:$0xff]  }
  0x1e   :  { %1119 = vmatprep.subr.bf16.mxu1 %v1248_v29  ;;  %v1310_v19 = vld [vmem:[%s1630_s1 + $0x218] sm:$0xff]   ;;  %v1315_v21 = vld [vmem:[%s1631_s0 + $0x20] ss:$36 sps:$4 sm:$0xff]  }
  0x1f   :  { %v1314_v24 = vld [vmem:[%s1630_s1 + $0x238] sm:$0xff]  }
  0x20   :  { %1092 = vmatpush3.bf16.msra.mxu0 %v1249_v30 }
  0x21   :  { %1120 = vmatpush3.bf16.msra.mxu1 %v1250_v31  ;;  %1133 = vmatprep.subr.bf16.mxu0 %v1257_v36 }
  0x22   :  { %1161 = vmatprep.subr.bf16.mxu1 %v1259_v38 }
  0x23   :  { %739 = vmatmul.mubr.bf16.vlgmr.msra.gmra.mrb[0].mxu0 %v1251_v32 }
  0x24   :  { %788 = vmatmul.mubr.bf16.vlgmr.msra.gmra.mrb[0].mxu1 %v1254_v34  ;;  %1134 = vmatpush3.bf16.msra.mxu0 %v1258_v37 }
  0x25   :  { %1162 = vmatpush3.bf16.msra.mxu1 %v1260_v39  ;;  %1135 = vmatprep.subr.bf16.mxu0 %v1261_v40 }
  0x26   :  { %1163 = vmatprep.subr.bf16.mxu1 %v1263_v42  ;;  %746 = vmatprep.mubr.bf16.mxu0 %v1278_v57 }
  0x27   :  { %795 = vmatprep.mubr.bf16.mxu1 %v1280_v58 }
  0x28   :  { %1136 = vmatpush3.bf16.msra.mxu0 %v1262_v41 }
  0x29   :  { %1164 = vmatpush3.bf16.msra.mxu1 %v1264_v43  ;;  %1137 = vmatprep.subr.bf16.mxu0 %v1265_v44 }
  0x2a   :  { %1165 = vmatprep.subr.bf16.mxu1 %v1267_v46 }
  0x2b   :  { %747 = vmatmul.mubr.bf16.gmra.mrb[4].mxu0 %v1283_v60 }
  0x2c   :  { %1138 = vmatpush3.bf16.msra.mxu0 %v1266_v45  ;;  %796 = vmatmul.mubr.bf16.gmra.mrb[4].mxu1 %v1284_v61 }
  0x2d   :  { %1166 = vmatpush3.bf16.msra.mxu1 %v1268_v47  ;;  %1139 = vmatprep.subr.bf16.mxu0 %v1269_v48 }
  0x2e   :  { %1167 = vmatprep.subr.bf16.mxu1 %v1271_v50  ;;  %836 = vmatprep.mubr.bf16.mxu0 %v1296_v8 }
  0x2f   :  { %885 = vmatprep.mubr.bf16.mxu1 %v1301_v12 }
  0x30   :  { %1140 = vmatpush3.bf16.msra.mxu0 %v1270_v49 }
  0x31   :  { %1168 = vmatpush3.bf16.msra.mxu1 %v1272_v51  ;;  %1141 = vmatprep.subr.bf16.mxu0 %v1273_v52 }
  0x32   :  { %1169 = vmatprep.subr.bf16.mxu1 %v1275_v54 }
  0x34   :  { %1142 = vmatpush3.bf16.msra.mxu0 %v1274_v53 }
  0x35   :  { %1170 = vmatpush3.bf16.msra.mxu1 %v1276_v55  ;;  %1143 = vmatprep.subr.bf16.mxu0 %v1277_v56 }
  0x36   :  { %1171 = vmatprep.subr.bf16.mxu1 %v1285_v62 }
  0x38   :  { %1144 = vmatpush3.bf16.msra.mxu0 %v1282_v59 }
  0x39   :  { %1172 = vmatpush3.bf16.msra.mxu1 %v1286_v63  ;;  %1145 = vmatprep.subr.bf16.mxu0 %v1287_v0 }
  0x3a   :  { %1173 = vmatprep.subr.bf16.mxu1 %v1289_v2 }
  0x3c   :  { %1146 = vmatpush3.bf16.msra.mxu0 %v1288_v1 }
  0x3d   :  { %1174 = vmatpush3.bf16.msra.mxu1 %v1290_v3  ;;  %1147 = vmatprep.subr.bf16.mxu0 %v1291_v4 }
  0x3e   :  { %1175 = vmatprep.subr.bf16.mxu1 %v1293_v6 }
  0x40   :  { %1148 = vmatpush3.bf16.msra.mxu0 %v1292_v5 }
  0x41   :  { %1176 = vmatpush3.bf16.msra.mxu1 %v1297_v9  ;;  %1199 = vmatprep.subr.bf16.mxu0 %v1298_v10 }
  0x43   :  { %837 = vmatmul.mubr.bf16.vlgmr.msra.gmra.mrb[8].mxu0 %v1294_v7 }
  0x44   :  { %1200 = vmatpush3.bf16.msra.mxu0 %v1298_v10  ;;  %886 = vmatmul.mubr.bf16.vlgmr.msra.gmra.mrb[8].mxu1 %v1299_v11 }
  0x45   :  { %1201 = vmatprep.subr.bf16.mxu0 %v1302_v13  ;;  %844 = vmatprep.mubr.bf16.mxu0 %v1303_v14 }
  0x46   :  { %893 = vmatprep.mubr.bf16.mxu1 %v1307_v17 }
  0x48   :  { %1202 = vmatpush3.bf16.msra.mxu0 %v1302_v13 }
  0x49   :  { %1203 = vmatprep.subr.bf16.mxu0 %v1306_v16 }
  0x4b   :  { %845 = vmatmul.mubr.bf16.gmra.mrb[12].mxu0 %v1305_v15 }
  0x4c   :  { %1204 = vmatpush3.bf16.msra.mxu0 %v1306_v16  ;;  %894 = vmatmul.mubr.bf16.gmra.mrb[12].mxu1 %v1309_v18 }
  0x4d   :  { %1205 = vmatprep.subr.bf16.mxu0 %v1310_v19  ;;  %1215 = vmatprep.mubr.bf16.mxu0 %v1315_v21 }
  0x50   :  { %1206 = vmatpush3.bf16.msra.mxu0 %v1310_v19 }
  0x51   :  { %1207 = vmatprep.subr.bf16.mxu0 %v1311_v20 }
  0x54   :  { %1208 = vmatpush3.bf16.msra.mxu0 %v1311_v20 }
  0x55   :  { %1209 = vmatprep.subr.bf16.mxu0 %v1312_v22 }
  0x58   :  { %1210 = vmatpush3.bf16.msra.mxu0 %v1312_v22 }
  0x59   :  { %1211 = vmatprep.subr.bf16.mxu0 %v1313_v23 }
  0x5c   :  { %1212 = vmatpush3.bf16.msra.mxu0 %v1313_v23  ;;  %v1075_v23 = vld [vmem:[%s1632_s2] ss:$0 sm:$0xff] }
  0x5d   :  { %1213 = vmatprep.subr.bf16.mxu0 %v1314_v24 }
  0x60   :  { %1214 = vmatpush3.bf16.msra.mxu0 %v1314_v24 }
  0x63   :  { %1216 = vmatmul.mubr.bf16.vlgmr.msra.gmra.mrb[16].mxu0 %v1316_v25 }
  0xf6   :  { %v1093_v26 = vpop.f32.mrb[0].mxu0 }
  0xf7   :  { %v1121_v27 = vpop.f32.mrb[0].mxu1  ;;  %v1094_v28 = vpop.f32.mrb[1].mxu0 }
  0xf8   :  { %v1095_v29 = vadd.f32 %v1094_v28, %v1093_v26  ;;  %v1122_v30 = vpop.f32.mrb[1].mxu1  ;;  %v1096_v31 = vpop.f32.mrb[2].mxu0  ;;  %v1076_v26 = vld [vmem:[%s1633_s3] ss:$0 sm:$0xff] }
  0xf9   :  { %v1123_v32 = vadd.f32 %v1122_v30, %v1121_v27  ;;  %v1124_v33 = vpop.f32.mrb[2].mxu1  ;;  %v1097_v34 = vpop.f32.mrb[3].mxu0 }
  0xfa   :  { %v1098_v35 = vadd.f32 %v1097_v34, %v1096_v31  ;;  %v1125_v36 = vpop.f32.mrb[3].mxu1 }
  0xfb   :  { %v790_v37 = vadd.f32 %v1123_v32, %v1095_v29  ;;  %v1126_v38 = vadd.f32 %v1125_v36, %v1124_v33 }
  0xfd   :  { %v793_v39 = vadd.f32 %v1126_v38, %v1098_v35 }
  0xfe   :  { %v1099_v40 = vpop.f32.mrb[4].mxu0 }
  0xff   :  { %v1127_v41 = vpop.f32.mrb[4].mxu1  ;;  %v1100_v42 = vpop.f32.mrb[5].mxu0 }
 0x100   :  { %v1128_v43 = vpop.f32.mrb[5].mxu1  ;;  %v1101_v44 = vadd.f32 %v1100_v42, %v1099_v40  ;;  %v1102_v46 = vpop.f32.mrb[6].mxu0 }
 0x101   :  { %v1129_v45 = vadd.f32 %v1128_v43, %v1127_v41  ;;  %v1130_v47 = vpop.f32.mrb[6].mxu1  ;;  %v1103_v48 = vpop.f32.mrb[7].mxu0 }
 0x102   :  { %v1131_v49 = vpop.f32.mrb[7].mxu1  ;;  %v1104_v51 = vadd.f32 %v1103_v48, %v1102_v46 }
 0x103   :  { %v798_v50 = vadd.f32 %v1129_v45, %v1101_v44  ;;  %v1132_v52 = vadd.f32 %v1131_v49, %v1130_v47 }
 0x105   :  { %v801_v53 = vadd.f32 %v1132_v52, %v1104_v51 }
 0x116   :  { %v1149_v54 = vpop.f32.mrb[8].mxu0 }
 0x117   :  { %v1150_v55 = vpop.f32.mrb[9].mxu0  ;;  %v1177_v58 = vpop.f32.mrb[8].mxu1 }
 0x118   :  { %v1151_v56 = vadd.f32 %v1150_v55, %v1149_v54  ;;  %v1152_v57 = vpop.f32.mrb[10].mxu0  ;;  %v1178_v62 = vpop.f32.mrb[9].mxu1 }
 0x119   :  { %v1153_v59 = vpop.f32.mrb[11].mxu0  ;;  %v1179_v63 = vadd.f32 %v1178_v62, %v1177_v58  ;;  %v1180_v0 = vpop.f32.mrb[10].mxu1 }
 0x11a   :  { %v839_v60 = vadd.f32 %v1151_v56, %v790_v37  ;;  %v1154_v61 = vadd.f32 %v1153_v59, %v1152_v57  ;;  %v1181_v2 = vpop.f32.mrb[11].mxu1 }
 0x11b   :  { %v1182_v3 = vadd.f32 %v1181_v2, %v1180_v0 }
 0x11c   :  { %v842_v1 = vadd.f32 %v1154_v61, %v793_v39  ;;  %v888_v4 = vadd.f32 %v1179_v63, %v839_v60 }
 0x11e   :  { %v1155_v5 = vpop.f32.mrb[12].mxu0  ;;  %v891_v7 = vadd.f32 %v1182_v3, %v842_v1 }
 0x11f   :  { %v1156_v6 = vpop.f32.mrb[13].mxu0  ;;  %v1183_v10 = vpop.f32.mrb[12].mxu1 }
 0x120   :  { %v1157_v8 = vadd.f32 %v1156_v6, %v1155_v5  ;;  %v1158_v9 = vpop.f32.mrb[14].mxu0  ;;  %v1184_v14 = vpop.f32.mrb[13].mxu1 }
 0x121   :  { %v1159_v11 = vpop.f32.mrb[15].mxu0  ;;  %v1185_v15 = vadd.f32 %v1184_v14, %v1183_v10  ;;  %v1186_v16 = vpop.f32.mrb[14].mxu1 }
 0x122   :  { %v847_v12 = vadd.f32 %v1157_v8, %v798_v50  ;;  %v1160_v13 = vadd.f32 %v1159_v11, %v1158_v9  ;;  %v1187_v18 = vpop.f32.mrb[15].mxu1 }
 0x123   :  { %v1188_v19 = vadd.f32 %v1187_v18, %v1186_v16 }
 0x124   :  { %v850_v17 = vadd.f32 %v1160_v13, %v801_v53  ;;  %v896_v20 = vadd.f32 %v1185_v15, %v847_v12 }
 0x126   :  { %v899_v21 = vadd.f32 %v1188_v19, %v850_v17 }
 0x136   :  { %v1217_v22 = vpop.f32.mrb[16].mxu0 }
 0x137   :  { %v945_v24 = vadd.f32 %v1217_v22, %v896_v20  ;;  %v936_v25 = vpop.f32.mrb[17].mxu0 }
 0x138   :  { %v937_v27 = vadd.f32 %v936_v25, %v888_v4  ;;  %v1218_v28 = vpop.f32.mrb[18].mxu0 }
 0x139   :  { %v960_v29 = vmul.f32 %v1075_v23, %v945_v24  ;;  %v948_v30 = vadd.f32 %v1218_v28, %v899_v21  ;;  %v939_v31 = vpop.f32.mrb[19].mxu0 }
 0x13a   :  { %v958_v32 = vmul.f32 %v1075_v23, %v937_v27  ;;  %v940_v33 = vadd.f32 %v939_v31, %v891_v7 }
 0x13b   :  { %v971_v34 = vadd.f32 %v1076_v26, %v960_v29  ;;  %v961_v35 = vmul.f32 %v1075_v23, %v948_v30 }
 0x13c   :  { %v969_v36 = vadd.f32 %v1076_v26, %v958_v32  ;;  %v959_v37 = vmul.f32 %v1075_v23, %v940_v33 }
 0x13d   :  { %v975_v38 = vmax.f32 %v971_v34, 0.0  ;;  %v972_v39 = vadd.f32 %v1076_v26, %v961_v35 }
 0x13e   :  { %v973_v40 = vmax.f32 %v969_v36, 0.0  ;;  %v970_v41 = vadd.f32 %v1076_v26, %v959_v37 }
 0x13f   :  { %979 = vst [vmem:[%s1634_s4 + $0x10] sm:$0xff] %v975_v38  ;;  %v976_v42 = vmax.f32 %v972_v39, 0.0 }
 0x140   :  { %977 = vst [vmem:[%s1634_s4] sm:$0xff] %v973_v40  ;;  %v974_v43 = vmax.f32 %v970_v41, 0.0 }
 0x141   :  { %980 = vst [vmem:[%s1634_s4 + $0x18] sm:$0xff] %v976_v42 }
 0x142   :  { %978 = vst [vmem:[%s1634_s4 + $0x8] sm:$0xff] %v974_v43 }

// kernel: spatial_encoder_forward.18
= control target key start
LH: loop header
LB: loop body
LE: loop exit
PB: predicated region body
PF: predicated region fallthrough
CT: control target
= control target key end

     0   :  { %s1658_s1 = inlined_call_operand.vmem [shape: bf16[1152,128], index: 1, kind: input, shape index: {}]   ;;  %s1659_s0 = inlined_call_operand.vmem [shape: bf16[32,1152], index: 0, kind: input, shape index: {}]   ;;  %s1660_s2 = inlined_call_operand.vmem [shape: f32[1,128], index: 2, kind: input, shape index: {}]   ;;  %s1661_s3 = inlined_call_operand.vmem [shape: f32[1,128], index: 3, kind: input, shape index: {}]   ;;  %s1662_s4 = inlined_call_operand.vmem [shape: f32[32,128], index: 4, kind: input, shape index: {}]   ;;  %s1663_s5 = inlined_call_operand.vmem [shape: f32[32,128], index: 5, kind: output, shape index: {}]  }
   0x1   :  { %v1230_v0 = vld [vmem:[%s1658_s1 + $0x40] sm:$0xff]   ;;  %v1234_v4 = vld [vmem:[%s1658_s1 + $0x48] sm:$0xff]   ;;  %v1238_v8 = vld [vmem:[%s1658_s1 + $0x50] sm:$0xff]  }
   0x2   :  { %v1231_v1 = vld [vmem:[%s1658_s1 + $0xc0] sm:$0xff]   ;;  %1088 = vmatprep.subr.bf16.mxu0 %v1230_v0  ;;  %v1235_v5 = vld [vmem:[%s1658_s1 + $0xc8] sm:$0xff]   ;;  %v1239_v9 = vld [vmem:[%s1658_s1 + $0xd0] sm:$0xff]  }
   0x3   :  { %v1232_v2 = vld [vmem:[%s1658_s1] sm:$0xff]   ;;  %1116 = vmatprep.subr.bf16.mxu1 %v1231_v1  ;;  %v1236_v6 = vld [vmem:[%s1658_s1 + $0x8] sm:$0xff]   ;;  %v1240_v10 = vld [vmem:[%s1658_s1 + $0x10] sm:$0xff]  }
   0x4   :  { %v1233_v3 = vld [vmem:[%s1658_s1 + $0x80] sm:$0xff]   ;;  %1089 = vmatpush3.bf16.msra.mxu0 %v1232_v2  ;;  %v1237_v7 = vld [vmem:[%s1658_s1 + $0x88] sm:$0xff]   ;;  %v1241_v11 = vld [vmem:[%s1658_s1 + $0x90] sm:$0xff]  }
   0x5   :  { %1117 = vmatpush3.bf16.msra.mxu1 %v1233_v3  ;;  %1090 = vmatprep.subr.bf16.mxu0 %v1234_v4  ;;  %v1242_v12 = vld [vmem:[%s1658_s1 + $0x58] sm:$0xff]   ;;  %v1246_v16 = vld [vmem:[%s1658_s1 + $0x60] sm:$0xff]   ;;  %v1250_v20 = vld [vmem:[%s1658_s1 + $0x68] sm:$0xff]  }
   0x6   :  { %1118 = vmatprep.subr.bf16.mxu1 %v1235_v5  ;;  %v1243_v13 = vld [vmem:[%s1658_s1 + $0xd8] sm:$0xff]   ;;  %v1247_v17 = vld [vmem:[%s1658_s1 + $0xe0] sm:$0xff]   ;;  %v1251_v21 = vld [vmem:[%s1658_s1 + $0xe8] sm:$0xff]  }
   0x7   :  { %v1244_v14 = vld [vmem:[%s1658_s1 + $0x18] sm:$0xff]   ;;  %v1248_v18 = vld [vmem:[%s1658_s1 + $0x20] sm:$0xff]   ;;  %v1252_v22 = vld [vmem:[%s1658_s1 + $0x28] sm:$0xff]  }
   0x8   :  { %1091 = vmatpush3.bf16.msra.mxu0 %v1236_v6  ;;  %v1245_v15 = vld [vmem:[%s1658_s1 + $0x98] sm:$0xff]   ;;  %v1249_v19 = vld [vmem:[%s1658_s1 + $0xa0] sm:$0xff]   ;;  %v1253_v23 = vld [vmem:[%s1658_s1 + $0xa8] sm:$0xff]  }
   0x9   :  { %1119 = vmatpush3.bf16.msra.mxu1 %v1237_v7  ;;  %1092 = vmatprep.subr.bf16.mxu0 %v1238_v8  ;;  %v1254_v24 = vld [vmem:[%s1658_s1 + $0x70] sm:$0xff]   ;;  %v1258_v28 = vld [vmem:[%s1658_s1 + $0x78] sm:$0xff]   ;;  %v1262_v32 = vld [vmem:[%s1659_s0] ss:$36 sps:$4 sm:$0xff]  }
   0xa   :  { %1120 = vmatprep.subr.bf16.mxu1 %v1239_v9  ;;  %v1255_v25 = vld [vmem:[%s1658_s1 + $0xf0] sm:$0xff]   ;;  %v1259_v29 = vld [vmem:[%s1658_s1 + $0xf8] sm:$0xff]   ;;  %v1264_v33 = vld [vmem:[%s1659_s0 + $0x4] ss:$36 sps:$4 sm:$0xff]  }
   0xb   :  { %v1256_v26 = vld [vmem:[%s1658_s1 + $0x30] sm:$0xff]   ;;  %v1260_v30 = vld [vmem:[%s1658_s1 + $0x38] sm:$0xff]   ;;  %v1265_v34 = vld [vmem:[%s1659_s0 + $0x8] ss:$36 sps:$4 sm:$0xff]   ;;  %741 = vmatprep.mubr.bf16.mxu0 %v1264_v33 }
   0xc   :  { %1093 = vmatpush3.bf16.msra.mxu0 %v1240_v10  ;;  %v1257_v27 = vld [vmem:[%s1658_s1 + $0xb0] sm:$0xff]   ;;  %v1261_v31 = vld [vmem:[%s1658_s1 + $0xb8] sm:$0xff]   ;;  %v1268_v36 = vld [vmem:[%s1658_s1 + $0x140] sm:$0xff]  }
   0xd   :  { %1121 = vmatpush3.bf16.msra.mxu1 %v1241_v11  ;;  %1094 = vmatprep.subr.bf16.mxu0 %v1242_v12  ;;  %v1267_v35 = vld [vmem:[%s1659_s0 + $0xc] ss:$36 sps:$4 sm:$0xff]   ;;  %v1269_v37 = vld [vmem:[%s1658_s1 + $0x100] sm:$0xff]   ;;  %v1280_v48 = vld [vmem:[%s1658_s1 + $0x158] sm:$0xff]  }
   0xe   :  { %1122 = vmatprep.subr.bf16.mxu1 %v1243_v13  ;;  %790 = vmatprep.mubr.bf16.mxu1 %v1267_v35  ;;  %v1270_v38 = vld [vmem:[%s1658_s1 + $0x1c0] sm:$0xff]   ;;  %v1272_v40 = vld [vmem:[%s1658_s1 + $0x148] sm:$0xff]   ;;  %v1276_v44 = vld [vmem:[%s1658_s1 + $0x150] sm:$0xff]  }
   0xf   :  { %v1271_v39 = vld [vmem:[%s1658_s1 + $0x180] sm:$0xff]   ;;  %v1273_v41 = vld [vmem:[%s1658_s1 + $0x108] sm:$0xff]   ;;  %v1277_v45 = vld [vmem:[%s1658_s1 + $0x110] sm:$0xff]  }
  0x10   :  { %1095 = vmatpush3.bf16.msra.mxu0 %v1244_v14  ;;  %v1274_v42 = vld [vmem:[%s1658_s1 + $0x1c8] sm:$0xff]   ;;  %v1278_v46 = vld [vmem:[%s1658_s1 + $0x1d0] sm:$0xff]   ;;  %v1281_v49 = vld [vmem:[%s1658_s1 + $0x118] sm:$0xff]  }
  0x11   :  { %1123 = vmatpush3.bf16.msra.mxu1 %v1245_v15  ;;  %1096 = vmatprep.subr.bf16.mxu0 %v1246_v16  ;;  %v1275_v43 = vld [vmem:[%s1658_s1 + $0x188] sm:$0xff]   ;;  %v1279_v47 = vld [vmem:[%s1658_s1 + $0x190] sm:$0xff]   ;;  %v1282_v50 = vld [vmem:[%s1658_s1 + $0x1d8] sm:$0xff]  }
  0x12   :  { %1124 = vmatprep.subr.bf16.mxu1 %v1247_v17  ;;  %v1283_v51 = vld [vmem:[%s1658_s1 + $0x198] sm:$0xff]   ;;  %v1284_v52 = vld [vmem:[%s1658_s1 + $0x160] sm:$0xff]   ;;  %v1288_v56 = vld [vmem:[%s1658_s1 + $0x168] sm:$0xff]  }
  0x13   :  { %v1285_v53 = vld [vmem:[%s1658_s1 + $0x120] sm:$0xff]   ;;  %v1289_v57 = vld [vmem:[%s1659_s0 + $0x4c] ss:$36 sps:$4 sm:$0xff]   ;;  %v1291_v58 = vld [vmem:[%s1659_s0 + $0x54] ss:$36 sps:$4 sm:$0xff]  }
  0x14   :  { %1097 = vmatpush3.bf16.msra.mxu0 %v1248_v18  ;;  %v1286_v54 = vld [vmem:[%s1658_s1 + $0x1e0] sm:$0xff]   ;;  %v1293_v59 = vld [vmem:[%s1658_s1 + $0x128] sm:$0xff]   ;;  %v1295_v61 = vld [vmem:[%s1659_s0 + $0x50] ss:$36 sps:$4 sm:$0xff]  }
  0x15   :  { %1125 = vmatpush3.bf16.msra.mxu1 %v1249_v19  ;;  %1098 = vmatprep.subr.bf16.mxu0 %v1250_v20  ;;  %v1287_v55 = vld [vmem:[%s1658_s1 + $0x1a0] sm:$0xff]   ;;  %v1294_v60 = vld [vmem:[%s1659_s0 + $0x48] ss:$36 sps:$4 sm:$0xff]   ;;  %v1298_v0 = vld [vmem:[%s1658_s1 + $0x170] sm:$0xff]  }
  0x16   :  { %1126 = vmatprep.subr.bf16.mxu1 %v1251_v21  ;;  %v1296_v62 = vld [vmem:[%s1658_s1 + $0x1e8] sm:$0xff]   ;;  %v1299_v1 = vld [vmem:[%s1658_s1 + $0x130] sm:$0xff]   ;;  %v1302_v4 = vld [vmem:[%s1658_s1 + $0x178] sm:$0xff]  }
  0x17   :  { %v1297_v63 = vld [vmem:[%s1658_s1 + $0x1a8] sm:$0xff]   ;;  %v1300_v2 = vld [vmem:[%s1658_s1 + $0x1f0] sm:$0xff]   ;;  %v1303_v5 = vld [vmem:[%s1658_s1 + $0x138] sm:$0xff]  }
  0x18   :  { %1099 = vmatpush3.bf16.msra.mxu0 %v1252_v22  ;;  %v1301_v3 = vld [vmem:[%s1658_s1 + $0x1b0] sm:$0xff]   ;;  %v1304_v6 = vld [vmem:[%s1658_s1 + $0x1f8] sm:$0xff]   ;;  %v1309_v10 = vld [vmem:[%s1658_s1 + $0x200] sm:$0xff]  }
  0x19   :  { %1127 = vmatpush3.bf16.msra.mxu1 %v1253_v23  ;;  %1100 = vmatprep.subr.bf16.mxu0 %v1254_v24  ;;  %v1305_v7 = vld [vmem:[%s1659_s0 + $0x10] ss:$36 sps:$4 sm:$0xff]   ;;  %v1308_v9 = vld [vmem:[%s1658_s1 + $0x1b8] sm:$0xff]   ;;  %v1313_v13 = vld [vmem:[%s1658_s1 + $0x208] sm:$0xff]  }
  0x1a   :  { %1128 = vmatprep.subr.bf16.mxu1 %v1255_v25  ;;  %v1307_v8 = vld [vmem:[%s1659_s0 + $0x14] ss:$36 sps:$4 sm:$0xff]   ;;  %v1312_v12 = vld [vmem:[%s1659_s0 + $0x1c] ss:$36 sps:$4 sm:$0xff]   ;;  %v1318_v17 = vld [vmem:[%s1659_s0 + $0x64] ss:$36 sps:$4 sm:$0xff]  }
  0x1b   :  { %v1310_v11 = vld [vmem:[%s1659_s0 + $0x18] ss:$36 sps:$4 sm:$0xff]   ;;  %v1317_v16 = vld [vmem:[%s1658_s1 + $0x210] sm:$0xff]   ;;  %v1320_v18 = vld [vmem:[%s1659_s0 + $0x60] ss:$36 sps:$4 sm:$0xff]  }
  0x1c   :  { %1101 = vmatpush3.bf16.msra.mxu0 %v1256_v26  ;;  %v1314_v14 = vld [vmem:[%s1659_s0 + $0x5c] ss:$36 sps:$4 sm:$0xff]   ;;  %v1323_v22 = vld [vmem:[%s1658_s1 + $0x228] sm:$0xff]   ;;  %v1324_v23 = vld [vmem:[%s1658_s1 + $0x230] sm:$0xff]  }
  0x1d   :  { %1129 = vmatpush3.bf16.msra.mxu1 %v1257_v27  ;;  %1102 = vmatprep.subr.bf16.mxu0 %v1258_v28  ;;  %v1316_v15 = vld [vmem:[%s1659_s0 + $0x58] ss:$36 sps:$4 sm:$0xff]   ;;  %v1322_v20 = vld [vmem:[%s1658_s1 + $0x220] sm:$0xff]   ;;  %v1327_v25 = vld [vmem:[%s1659_s0 + $0x68] ss:$36 sps:$4 sm:$0xff]  }
  0x1e   :  { %1130 = vmatprep.subr.bf16.mxu1 %v1259_v29  ;;  %v1321_v19 = vld [vmem:[%s1658_s1 + $0x218] sm:$0xff]   ;;  %v1326_v21 = vld [vmem:[%s1659_s0 + $0x20] ss:$36 sps:$4 sm:$0xff]  }
  0x1f   :  { %v1325_v24 = vld [vmem:[%s1658_s1 + $0x238] sm:$0xff]  }
  0x20   :  { %1103 = vmatpush3.bf16.msra.mxu0 %v1260_v30 }
  0x21   :  { %1131 = vmatpush3.bf16.msra.mxu1 %v1261_v31  ;;  %1144 = vmatprep.subr.bf16.mxu0 %v1268_v36 }
  0x22   :  { %1172 = vmatprep.subr.bf16.mxu1 %v1270_v38 }
  0x23   :  { %742 = vmatmul.mubr.bf16.vlgmr.msra.gmra.mrb[0].mxu0 %v1262_v32 }
  0x24   :  { %791 = vmatmul.mubr.bf16.vlgmr.msra.gmra.mrb[0].mxu1 %v1265_v34  ;;  %1145 = vmatpush3.bf16.msra.mxu0 %v1269_v37 }
  0x25   :  { %1173 = vmatpush3.bf16.msra.mxu1 %v1271_v39  ;;  %1146 = vmatprep.subr.bf16.mxu0 %v1272_v40 }
  0x26   :  { %1174 = vmatprep.subr.bf16.mxu1 %v1274_v42  ;;  %749 = vmatprep.mubr.bf16.mxu0 %v1289_v57 }
  0x27   :  { %798 = vmatprep.mubr.bf16.mxu1 %v1291_v58 }
  0x28   :  { %1147 = vmatpush3.bf16.msra.mxu0 %v1273_v41 }
  0x29   :  { %1175 = vmatpush3.bf16.msra.mxu1 %v1275_v43  ;;  %1148 = vmatprep.subr.bf16.mxu0 %v1276_v44 }
  0x2a   :  { %1176 = vmatprep.subr.bf16.mxu1 %v1278_v46 }
  0x2b   :  { %750 = vmatmul.mubr.bf16.gmra.mrb[4].mxu0 %v1294_v60 }
  0x2c   :  { %1149 = vmatpush3.bf16.msra.mxu0 %v1277_v45  ;;  %799 = vmatmul.mubr.bf16.gmra.mrb[4].mxu1 %v1295_v61 }
  0x2d   :  { %1177 = vmatpush3.bf16.msra.mxu1 %v1279_v47  ;;  %1150 = vmatprep.subr.bf16.mxu0 %v1280_v48 }
  0x2e   :  { %1178 = vmatprep.subr.bf16.mxu1 %v1282_v50  ;;  %839 = vmatprep.mubr.bf16.mxu0 %v1307_v8 }
  0x2f   :  { %888 = vmatprep.mubr.bf16.mxu1 %v1312_v12 }
  0x30   :  { %1151 = vmatpush3.bf16.msra.mxu0 %v1281_v49 }
  0x31   :  { %1179 = vmatpush3.bf16.msra.mxu1 %v1283_v51  ;;  %1152 = vmatprep.subr.bf16.mxu0 %v1284_v52 }
  0x32   :  { %1180 = vmatprep.subr.bf16.mxu1 %v1286_v54 }
  0x34   :  { %1153 = vmatpush3.bf16.msra.mxu0 %v1285_v53 }
  0x35   :  { %1181 = vmatpush3.bf16.msra.mxu1 %v1287_v55  ;;  %1154 = vmatprep.subr.bf16.mxu0 %v1288_v56 }
  0x36   :  { %1182 = vmatprep.subr.bf16.mxu1 %v1296_v62 }
  0x38   :  { %1155 = vmatpush3.bf16.msra.mxu0 %v1293_v59 }
  0x39   :  { %1183 = vmatpush3.bf16.msra.mxu1 %v1297_v63  ;;  %1156 = vmatprep.subr.bf16.mxu0 %v1298_v0 }
  0x3a   :  { %1184 = vmatprep.subr.bf16.mxu1 %v1300_v2 }
  0x3c   :  { %1157 = vmatpush3.bf16.msra.mxu0 %v1299_v1 }
  0x3d   :  { %1185 = vmatpush3.bf16.msra.mxu1 %v1301_v3  ;;  %1158 = vmatprep.subr.bf16.mxu0 %v1302_v4 }
  0x3e   :  { %1186 = vmatprep.subr.bf16.mxu1 %v1304_v6 }
  0x40   :  { %1159 = vmatpush3.bf16.msra.mxu0 %v1303_v5 }
  0x41   :  { %1187 = vmatpush3.bf16.msra.mxu1 %v1308_v9  ;;  %1210 = vmatprep.subr.bf16.mxu0 %v1309_v10 }
  0x43   :  { %840 = vmatmul.mubr.bf16.vlgmr.msra.gmra.mrb[8].mxu0 %v1305_v7 }
  0x44   :  { %1211 = vmatpush3.bf16.msra.mxu0 %v1309_v10  ;;  %889 = vmatmul.mubr.bf16.vlgmr.msra.gmra.mrb[8].mxu1 %v1310_v11 }
  0x45   :  { %1212 = vmatprep.subr.bf16.mxu0 %v1313_v13  ;;  %847 = vmatprep.mubr.bf16.mxu0 %v1314_v14 }
  0x46   :  { %896 = vmatprep.mubr.bf16.mxu1 %v1318_v17 }
  0x48   :  { %1213 = vmatpush3.bf16.msra.mxu0 %v1313_v13 }
  0x49   :  { %1214 = vmatprep.subr.bf16.mxu0 %v1317_v16 }
  0x4b   :  { %848 = vmatmul.mubr.bf16.gmra.mrb[12].mxu0 %v1316_v15 }
  0x4c   :  { %1215 = vmatpush3.bf16.msra.mxu0 %v1317_v16  ;;  %897 = vmatmul.mubr.bf16.gmra.mrb[12].mxu1 %v1320_v18 }
  0x4d   :  { %1216 = vmatprep.subr.bf16.mxu0 %v1321_v19  ;;  %1226 = vmatprep.mubr.bf16.mxu0 %v1326_v21 }
  0x50   :  { %1217 = vmatpush3.bf16.msra.mxu0 %v1321_v19 }
  0x51   :  { %1218 = vmatprep.subr.bf16.mxu0 %v1322_v20 }
  0x54   :  { %1219 = vmatpush3.bf16.msra.mxu0 %v1322_v20 }
  0x55   :  { %1220 = vmatprep.subr.bf16.mxu0 %v1323_v22 }
  0x58   :  { %1221 = vmatpush3.bf16.msra.mxu0 %v1323_v22 }
  0x59   :  { %1222 = vmatprep.subr.bf16.mxu0 %v1324_v23 }
  0x5c   :  { %1223 = vmatpush3.bf16.msra.mxu0 %v1324_v23  ;;  %v1086_v23 = vld [vmem:[%s1660_s2] ss:$0 sm:$0xff] }
  0x5d   :  { %1224 = vmatprep.subr.bf16.mxu0 %v1325_v24 }
  0x60   :  { %1225 = vmatpush3.bf16.msra.mxu0 %v1325_v24 }
  0x63   :  { %1227 = vmatmul.mubr.bf16.vlgmr.msra.gmra.mrb[16].mxu0 %v1327_v25 }
  0xf6   :  { %v1104_v26 = vpop.f32.mrb[0].mxu0 }
  0xf7   :  { %v1132_v27 = vpop.f32.mrb[0].mxu1  ;;  %v1105_v28 = vpop.f32.mrb[1].mxu0 }
  0xf8   :  { %v1106_v29 = vadd.f32 %v1105_v28, %v1104_v26  ;;  %v1133_v30 = vpop.f32.mrb[1].mxu1  ;;  %v1107_v31 = vpop.f32.mrb[2].mxu0  ;;  %v1087_v26 = vld [vmem:[%s1661_s3] ss:$0 sm:$0xff] }
  0xf9   :  { %v1134_v32 = vadd.f32 %v1133_v30, %v1132_v27  ;;  %v1135_v33 = vpop.f32.mrb[2].mxu1  ;;  %v1108_v34 = vpop.f32.mrb[3].mxu0 }
  0xfa   :  { %v1109_v35 = vadd.f32 %v1108_v34, %v1107_v31  ;;  %v1136_v36 = vpop.f32.mrb[3].mxu1 }
  0xfb   :  { %v793_v37 = vadd.f32 %v1134_v32, %v1106_v29  ;;  %v1137_v38 = vadd.f32 %v1136_v36, %v1135_v33  ;;  %v978_v32 = vld [vmem:[%s1662_s4 + $0x10] sm:$0xff]  ;;  %v976_v36 = vld [vmem:[%s1662_s4] sm:$0xff] }
  0xfd   :  { %v796_v39 = vadd.f32 %v1137_v38, %v1109_v35 }
  0xfe   :  { %v1110_v40 = vpop.f32.mrb[4].mxu0 }
  0xff   :  { %v1138_v41 = vpop.f32.mrb[4].mxu1  ;;  %v1111_v42 = vpop.f32.mrb[5].mxu0 }
 0x100   :  { %v1139_v43 = vpop.f32.mrb[5].mxu1  ;;  %v1112_v44 = vadd.f32 %v1111_v42, %v1110_v40  ;;  %v1113_v46 = vpop.f32.mrb[6].mxu0 }
 0x101   :  { %v1140_v45 = vadd.f32 %v1139_v43, %v1138_v41  ;;  %v1141_v47 = vpop.f32.mrb[6].mxu1  ;;  %v1114_v48 = vpop.f32.mrb[7].mxu0  ;;  %v977_v43 = vld [vmem:[%s1662_s4 + $0x8] sm:$0xff] }
 0x102   :  { %v1142_v49 = vpop.f32.mrb[7].mxu1  ;;  %v1115_v51 = vadd.f32 %v1114_v48, %v1113_v46 }
 0x103   :  { %v801_v50 = vadd.f32 %v1140_v45, %v1112_v44  ;;  %v1143_v52 = vadd.f32 %v1142_v49, %v1141_v47 }
 0x105   :  { %v804_v53 = vadd.f32 %v1143_v52, %v1115_v51 }
 0x116   :  { %v1160_v54 = vpop.f32.mrb[8].mxu0 }
 0x117   :  { %v1161_v55 = vpop.f32.mrb[9].mxu0  ;;  %v1188_v58 = vpop.f32.mrb[8].mxu1 }
 0x118   :  { %v1162_v56 = vadd.f32 %v1161_v55, %v1160_v54  ;;  %v1163_v57 = vpop.f32.mrb[10].mxu0  ;;  %v1189_v62 = vpop.f32.mrb[9].mxu1 }
 0x119   :  { %v1164_v59 = vpop.f32.mrb[11].mxu0  ;;  %v1190_v63 = vadd.f32 %v1189_v62, %v1188_v58  ;;  %v1191_v0 = vpop.f32.mrb[10].mxu1 }
 0x11a   :  { %v842_v60 = vadd.f32 %v1162_v56, %v793_v37  ;;  %v1165_v61 = vadd.f32 %v1164_v59, %v1163_v57  ;;  %v1192_v2 = vpop.f32.mrb[11].mxu1 }
 0x11b   :  { %v1193_v3 = vadd.f32 %v1192_v2, %v1191_v0 }
 0x11c   :  { %v845_v1 = vadd.f32 %v1165_v61, %v796_v39  ;;  %v891_v4 = vadd.f32 %v1190_v63, %v842_v60  ;;  %v979_v39 = vld [vmem:[%s1662_s4 + $0x18] sm:$0xff] }
 0x11e   :  { %v1166_v5 = vpop.f32.mrb[12].mxu0  ;;  %v894_v7 = vadd.f32 %v1193_v3, %v845_v1 }
 0x11f   :  { %v1167_v6 = vpop.f32.mrb[13].mxu0  ;;  %v1194_v10 = vpop.f32.mrb[12].mxu1 }
 0x120   :  { %v1168_v8 = vadd.f32 %v1167_v6, %v1166_v5  ;;  %v1169_v9 = vpop.f32.mrb[14].mxu0  ;;  %v1195_v14 = vpop.f32.mrb[13].mxu1 }
 0x121   :  { %v1170_v11 = vpop.f32.mrb[15].mxu0  ;;  %v1196_v15 = vadd.f32 %v1195_v14, %v1194_v10  ;;  %v1197_v16 = vpop.f32.mrb[14].mxu1 }
 0x122   :  { %v850_v12 = vadd.f32 %v1168_v8, %v801_v50  ;;  %v1171_v13 = vadd.f32 %v1170_v11, %v1169_v9  ;;  %v1198_v18 = vpop.f32.mrb[15].mxu1 }
 0x123   :  { %v1199_v19 = vadd.f32 %v1198_v18, %v1197_v16 }
 0x124   :  { %v853_v17 = vadd.f32 %v1171_v13, %v804_v53  ;;  %v899_v20 = vadd.f32 %v1196_v15, %v850_v12 }
 0x126   :  { %v902_v21 = vadd.f32 %v1199_v19, %v853_v17 }
 0x136   :  { %v1228_v22 = vpop.f32.mrb[16].mxu0 }
 0x137   :  { %v948_v24 = vadd.f32 %v1228_v22, %v899_v20  ;;  %v939_v25 = vpop.f32.mrb[17].mxu0 }
 0x138   :  { %v940_v27 = vadd.f32 %v939_v25, %v891_v4  ;;  %v1229_v28 = vpop.f32.mrb[18].mxu0 }
 0x139   :  { %v963_v29 = vmul.f32 %v1086_v23, %v948_v24  ;;  %v951_v30 = vadd.f32 %v1229_v28, %v902_v21  ;;  %v942_v31 = vpop.f32.mrb[19].mxu0 }
 0x13a   :  { %v961_v33 = vmul.f32 %v1086_v23, %v940_v27  ;;  %v943_v34 = vadd.f32 %v942_v31, %v894_v7 }
 0x13b   :  { %v974_v35 = vadd.f32 %v1087_v26, %v963_v29  ;;  %v964_v37 = vmul.f32 %v1086_v23, %v951_v30 }
 0x13c   :  { %v972_v38 = vadd.f32 %v1087_v26, %v961_v33  ;;  %v962_v40 = vmul.f32 %v1086_v23, %v943_v34 }
 0x13d   :  { %v982_v41 = vadd.f32 %v978_v32, %v974_v35  ;;  %v975_v42 = vadd.f32 %v1087_v26, %v964_v37 }
 0x13e   :  { %v980_v44 = vadd.f32 %v976_v36, %v972_v38  ;;  %v973_v45 = vadd.f32 %v1087_v26, %v962_v40 }
 0x13f   :  { %v986_v46 = vmax.f32 %v982_v41, 0.0  ;;  %v983_v47 = vadd.f32 %v979_v39, %v975_v42 }
 0x140   :  { %v984_v48 = vmax.f32 %v980_v44, 0.0  ;;  %v981_v49 = vadd.f32 %v977_v43, %v973_v45 }
 0x141   :  { %990 = vst [vmem:[%s1663_s5 + $0x10] sm:$0xff] %v986_v46  ;;  %v987_v50 = vmax.f32 %v983_v47, 0.0 }
 0x142   :  { %988 = vst [vmem:[%s1663_s5] sm:$0xff] %v984_v48  ;;  %v985_v51 = vmax.f32 %v981_v49, 0.0 }
 0x143   :  { %991 = vst [vmem:[%s1663_s5 + $0x18] sm:$0xff] %v987_v50 }
 0x144   :  { %989 = vst [vmem:[%s1663_s5 + $0x8] sm:$0xff] %v985_v51 }

// kernel: spatial_encoder_forward.22
= control target key start
LH: loop header
LB: loop body
LE: loop exit
PB: predicated region body
PF: predicated region fallthrough
CT: control target
= control target key end

     0   :  { %s783_s15 = smov 0   ;;  %s982_s0 = inlined_call_operand.vmem [shape: bf16[256,128], index: 0, kind: input, shape index: {}]   ;;  %s983_s1 = inlined_call_operand.vmem [shape: bf16[128,256], index: 1, kind: input, shape index: {}]   ;;  %s984_s2 = inlined_call_operand.vmem [shape: f32[1,256], index: 2, kind: input, shape index: {}]   ;;  %s985_s3 = inlined_call_operand.vmem [shape: f32[1,256], index: 3, kind: input, shape index: {}]   ;;  %s986_s4 = inlined_call_operand.vmem [shape: f32[256,256], index: 4, kind: output, shape index: {}]  }
   0x1 LB: > { %s655_s16 = sadd.s32 4294967295, %s755_s15   ;;  %p659_p0 = scmp.ge.s32.totalorder %s755_s15, 1  ;;  %s755_s15 = sphi %s783_s15, %s14_s15  }
   0x2   : > { %p163_p1 = scmp.lt.s32.totalorder %s755_s15, 3 }
   0x4   : > { %p164_p2 = pnand %p659_p0, %p163_p1 }
   0x5   : > { %v717_v0 = vld [vmem:[%s983_s1 + $0x4] ss:$8 sps:$4 sm:$0xff] (!%p164_p2)   ;;  %s660_s19 = sshll.u32 (!%p164_p2), %s655_s16, 4  ;;  %v719_v1 = vld [vmem:[%s983_s1] ss:$8 sps:$4 sm:$0xff] (!%p164_p2)   ;;  %v757_v2 = vmov (!%p164_p2), 0   ;;  %v479_v25 = vlaneseq (!%p164_p2) }
   0x6   : > { %167 = sbr.rel (%p164_p2) target bundleno = 283 (0x11b), region = 36  ;;  %396 = vmatprep.mubr.bf16.mxu0 (!%p164_p2), %v757_v2  ;;  %436 = vmatprep.mubr.bf16.mxu1 (!%p164_p2), %v757_v2  ;;  %p191_p3 = scmp.lt.s32.totalorder (!%p164_p2), %s660_s19, 31  ;;  %v720_v3 = vld [vmem:[%s983_s1 + $0x14] ss:$8 sps:$4 sm:$0xff] (!%p164_p2)   ;;  %v722_v4 = vld [vmem:[%s983_s1 + $0x10] ss:$8 sps:$4 sm:$0xff] (!%p164_p2)  }
   0x7   : > { %364 = vmatprep.subr.bf16.mxu0 (!%p164_p2), %v717_v0  ;;  %692 = vmatprep.subr.bf16.mxu1 (!%p164_p2), %v717_v0  ;;  %v723_v5 = vld [vmem:[%s983_s1 + $0x24] ss:$8 sps:$4 sm:$0xff] (!%p164_p2)   ;;  %v725_v6 = vld [vmem:[%s983_s1 + $0x20] ss:$8 sps:$4 sm:$0xff] (!%p164_p2)   ;;  %v726_v7 = vld [vmem:[%s983_s1 + $0x34] ss:$8 sps:$4 sm:$0xff] (!%p164_p2)  }
   0x8   : > { %365 = vmatpush1.bf16.msra.mxu0 (!%p164_p2), %v719_v1  ;;  %700 = vmatpush1.bf16.msra.mxu1 (!%p164_p2), %v719_v1  ;;  %v728_v8 = vld [vmem:[%s983_s1 + $0x30] ss:$8 sps:$4 sm:$0xff] (!%p164_p2)   ;;  %v729_v9 = vld [vmem:[%s983_s1 + $0x44] ss:$8 sps:$4 sm:$0xff] (!%p164_p2)   ;;  %v731_v10 = vld [vmem:[%s983_s1 + $0x40] ss:$8 sps:$4 sm:$0xff] (!%p164_p2)  }
   0x9   : > { %366 = vmatprep.subr.bf16.mxu0 (!%p164_p2), %v720_v3  ;;  %693 = vmatprep.subr.bf16.mxu1 (!%p164_p2), %v720_v3  ;;  %v732_v11 = vld [vmem:[%s983_s1 + $0x54] ss:$8 sps:$4 sm:$0xff] (!%p164_p2)   ;;  %v734_v12 = vld [vmem:[%s983_s1 + $0x50] ss:$8 sps:$4 sm:$0xff] (!%p164_p2)   ;;  %v735_v13 = vld [vmem:[%s983_s1 + $0x64] ss:$8 sps:$4 sm:$0xff] (!%p164_p2)  }
   0xa   : > { %v737_v14 = vld [vmem:[%s983_s1 + $0x60] ss:$8 sps:$4 sm:$0xff] (!%p164_p2)   ;;  %v738_v15 = vld [vmem:[%s983_s1 + $0x74] ss:$8 sps:$4 sm:$0xff] (!%p164_p2)   ;;  %v740_v16 = vld [vmem:[%s983_s1 + $0x70] ss:$8 sps:$4 sm:$0xff] (!%p164_p2)  }
   0xb   : > { %v480_v26 = vshrl.u32 (!%p164_p2), %v479_v25, 7  ;;  %v477_v28 = vld [vmem:[%s984_s2] sm:$0x3] (!%p164_p2) }
   0xc   : > { %367 = vmatpush1.bf16.msra.mxu0 (!%p164_p2), %v722_v4  ;;  %701 = vmatpush1.bf16.msra.mxu1 (!%p164_p2), %v722_v4  ;;  %v521_v30 = vld [vmem:[%s985_s3] sm:$0x3] (!%p164_p2) }
   0xd   : > { %s988_s19 = smov (!%p191_p3, %s660_s19), 31  ;;  %368 = vmatprep.subr.bf16.mxu0 %v723_v5  ;;  %694 = vmatprep.subr.bf16.mxu1 %v723_v5  ;;  %v481_v27 = vsub.s32 0, %v480_v26  ;;  %v485_v29 = vsub.s32 1, %v480_v26 }
   0xe   : > { %s661_s28 = sshll.u32 %s988_s19, 2  ;;  %s691_s8 = sshll.u32 %s988_s19, 4 }
   0xf   : > { %s820_s9 = scalar_lea.vmem %s982_s0, %s661_s28  ;;  %v869_v31 = vrot.slane %v477_v28, %v481_v27  ;;  %v871_v32 = vrot.slane %v477_v28, %v485_v29  ;;  %v874_v33 = vrot.slane %v521_v30, %v481_v27  ;;  %v876_v36 = vrot.slane %v521_v30, %v485_v29  ;;  %s883_s11 = scalar_lea.vmem %s986_s4, %s691_s8 }
  0x10   : > { %369 = vmatpush1.bf16.msra.mxu0 %v725_v6  ;;  %702 = vmatpush1.bf16.msra.mxu1 %v725_v6  ;;  %v741_v17 = vld [vmem:[%s820_s9] sm:$0xff]   ;;  %v743_v19 = vld [vmem:[%s820_s9 + $0x8] sm:$0xff]   ;;  %v745_v21 = vld [vmem:[%s820_s9 + $0x10] sm:$0xff]  }
  0x11   : > { %370 = vmatprep.subr.bf16.mxu0 %v726_v7  ;;  %695 = vmatprep.subr.bf16.mxu1 %v726_v7  ;;  %v742_v18 = vld [vmem:[%s820_s9 + $0x20] sm:$0xff]   ;;  %v744_v20 = vld [vmem:[%s820_s9 + $0x28] sm:$0xff]   ;;  %v746_v22 = vld [vmem:[%s820_s9 + $0x30] sm:$0xff]  }
  0x12   : > { %v747_v23 = vld [vmem:[%s820_s9 + $0x18] sm:$0xff]  }
  0x13   : > { %v748_v24 = vld [vmem:[%s820_s9 + $0x38] sm:$0xff]  }
  0x14   : > { %371 = vmatpush1.bf16.msra.mxu0 %v728_v8  ;;  %703 = vmatpush1.bf16.msra.mxu1 %v728_v8 }
  0x15   : > { %372 = vmatprep.subr.bf16.mxu0 %v729_v9  ;;  %696 = vmatprep.subr.bf16.mxu1 %v729_v9 }
  0x18   : > { %373 = vmatpush1.bf16.msra.mxu0 %v731_v10  ;;  %704 = vmatpush1.bf16.msra.mxu1 %v731_v10 }
  0x19   : > { %374 = vmatprep.subr.bf16.mxu0 %v732_v11  ;;  %697 = vmatprep.subr.bf16.mxu1 %v732_v11 }
  0x1c   : > { %375 = vmatpush1.bf16.msra.mxu0 %v734_v12  ;;  %705 = vmatpush1.bf16.msra.mxu1 %v734_v12 }
  0x1d   : > { %376 = vmatprep.subr.bf16.mxu0 %v735_v13  ;;  %698 = vmatprep.subr.bf16.mxu1 %v735_v13 }
  0x20   : > { %377 = vmatpush1.bf16.msra.mxu0 %v737_v14  ;;  %706 = vmatpush1.bf16.msra.mxu1 %v737_v14 }
  0x21   : > { %378 = vmatprep.subr.bf16.mxu0 %v738_v15  ;;  %699 = vmatprep.subr.bf16.mxu1 %v738_v15 }
  0x24   : > { %379 = vmatpush1.bf16.msra.mxu0 %v740_v16  ;;  %707 = vmatpush1.bf16.msra.mxu1 %v740_v16 }
  0x27   : > { %397 = vmatmul.mubr.bf16.vlgmr.msra.gmra.mrb[0].mxu0 %v741_v17  ;;  %437 = vmatmul.mubr.bf16.vlgmr.msra.gmra.mrb[0].mxu1 %v742_v18 }
  0x28   : > { %406 = vmatprep.mubr.bf16.mxu0 %v757_v2  ;;  %446 = vmatprep.mubr.bf16.mxu1 %v757_v2 }
  0x2f   : > { %407 = vmatmul.mubr.bf16.gmra.mrb[4].mxu0 %v743_v19  ;;  %447 = vmatmul.mubr.bf16.gmra.mrb[4].mxu1 %v744_v20 }
  0x30   : > { %416 = vmatprep.mubr.bf16.mxu0 %v757_v2  ;;  %456 = vmatprep.mubr.bf16.mxu1 %v757_v2 }
  0x37   : > { %417 = vmatmul.mubr.bf16.gmra.mrb[8].mxu0 %v745_v21  ;;  %457 = vmatmul.mubr.bf16.gmra.mrb[8].mxu1 %v746_v22 }
  0x38   : > { %426 = vmatprep.mubr.bf16.mxu0 %v757_v2  ;;  %466 = vmatprep.mubr.bf16.mxu1 %v757_v2 }
  0x3f   : > { %427 = vmatmul.mubr.bf16.gmra.mrb[12].mxu0 %v747_v23  ;;  %467 = vmatmul.mubr.bf16.gmra.mrb[12].mxu1 %v748_v24 }
  0xfa   : > { %v398_v34 = vpop.f32.mrb[0].mxu0  ;;  %v438_v35 = vpop.f32.mrb[0].mxu1 }
  0xfb   : > { %v489_v37 = vmul.f32 %v869_v31, %v398_v34  ;;  %v505_v38 = vmul.f32 %v869_v31, %v438_v35  ;;  %v400_v39 = vpop.f32.mrb[1].mxu0  ;;  %v440_v40 = vpop.f32.mrb[1].mxu1 }
  0xfc   : > { %v490_v41 = vmul.f32 %v871_v32, %v400_v39  ;;  %v506_v42 = vmul.f32 %v871_v32, %v440_v40  ;;  %v402_v43 = vpop.f32.mrb[2].mxu0  ;;  %v442_v44 = vpop.f32.mrb[2].mxu1 }
  0xfd   : > { %v533_v45 = vadd.f32 %v874_v33, %v489_v37  ;;  %v549_v46 = vadd.f32 %v874_v33, %v505_v38  ;;  %v491_v47 = vmul.f32 %v869_v31, %v402_v43  ;;  %v507_v48 = vmul.f32 %v869_v31, %v442_v44  ;;  %v404_v49 = vpop.f32.mrb[3].mxu0  ;;  %v444_v50 = vpop.f32.mrb[3].mxu1 }
  0xfe   : > { %v534_v51 = vadd.f32 %v876_v36, %v490_v41  ;;  %v550_v52 = vadd.f32 %v876_v36, %v506_v42  ;;  %v492_v53 = vmul.f32 %v871_v32, %v404_v49  ;;  %v508_v54 = vmul.f32 %v871_v32, %v444_v50 }
  0xff   : > { %565 = vst [vmem:[%s883_s11] sm:$0xff] %v533_v45  ;;  %581 = vst [vmem:[%s883_s11 + $0x80] sm:$0xff] %v549_v46  ;;  %v535_v55 = vadd.f32 %v874_v33, %v491_v47  ;;  %v551_v56 = vadd.f32 %v874_v33, %v507_v48 }
 0x100   : > { %566 = vst [vmem:[%s883_s11 + $0x8] sm:$0xff] %v534_v51  ;;  %582 = vst [vmem:[%s883_s11 + $0x88] sm:$0xff] %v550_v52  ;;  %v536_v57 = vadd.f32 %v876_v36, %v492_v53  ;;  %v552_v58 = vadd.f32 %v876_v36, %v508_v54 }
 0x101   : > { %567 = vst [vmem:[%s883_s11 + $0x10] sm:$0xff] %v535_v55  ;;  %583 = vst [vmem:[%s883_s11 + $0x90] sm:$0xff] %v551_v56 }
 0x102   : > { %568 = vst [vmem:[%s883_s11 + $0x18] sm:$0xff] %v536_v57  ;;  %584 = vst [vmem:[%s883_s11 + $0x98] sm:$0xff] %v552_v58  ;;  %v408_v59 = vpop.f32.mrb[4].mxu0  ;;  %v448_v60 = vpop.f32.mrb[4].mxu1 }
 0x103   : > { %v493_v61 = vmul.f32 %v869_v31, %v408_v59  ;;  %v509_v62 = vmul.f32 %v869_v31, %v448_v60  ;;  %v410_v63 = vpop.f32.mrb[5].mxu0  ;;  %v450_v0 = vpop.f32.mrb[5].mxu1 }
 0x104   : > { %v494_v1 = vmul.f32 %v871_v32, %v410_v63  ;;  %v510_v2 = vmul.f32 %v871_v32, %v450_v0  ;;  %v412_v3 = vpop.f32.mrb[6].mxu0  ;;  %v452_v4 = vpop.f32.mrb[6].mxu1 }
 0x105   : > { %v537_v5 = vadd.f32 %v874_v33, %v493_v61  ;;  %v553_v6 = vadd.f32 %v874_v33, %v509_v62  ;;  %v495_v7 = vmul.f32 %v869_v31, %v412_v3  ;;  %v511_v8 = vmul.f32 %v869_v31, %v452_v4  ;;  %v414_v9 = vpop.f32.mrb[7].mxu0  ;;  %v454_v10 = vpop.f32.mrb[7].mxu1 }
 0x106   : > { %v538_v11 = vadd.f32 %v876_v36, %v494_v1  ;;  %v554_v12 = vadd.f32 %v876_v36, %v510_v2  ;;  %v496_v13 = vmul.f32 %v871_v32, %v414_v9  ;;  %v512_v14 = vmul.f32 %v871_v32, %v454_v10 }
 0x107   : > { %569 = vst [vmem:[%s883_s11 + $0x20] sm:$0xff] %v537_v5  ;;  %585 = vst [vmem:[%s883_s11 + $0xa0] sm:$0xff] %v553_v6  ;;  %v539_v15 = vadd.f32 %v874_v33, %v495_v7  ;;  %v555_v16 = vadd.f32 %v874_v33, %v511_v8 }
 0x108   : > { %570 = vst [vmem:[%s883_s11 + $0x28] sm:$0xff] %v538_v11  ;;  %586 = vst [vmem:[%s883_s11 + $0xa8] sm:$0xff] %v554_v12  ;;  %v540_v17 = vadd.f32 %v876_v36, %v496_v13  ;;  %v556_v18 = vadd.f32 %v876_v36, %v512_v14 }
 0x109   : > { %571 = vst [vmem:[%s883_s11 + $0x30] sm:$0xff] %v539_v15  ;;  %587 = vst [vmem:[%s883_s11 + $0xb0] sm:$0xff] %v555_v16 }
 0x10a   : > { %572 = vst [vmem:[%s883_s11 + $0x38] sm:$0xff] %v540_v17  ;;  %588 = vst [vmem:[%s883_s11 + $0xb8] sm:$0xff] %v556_v18  ;;  %v418_v19 = vpop.f32.mrb[8].mxu0  ;;  %v458_v20 = vpop.f32.mrb[8].mxu1 }
 0x10b   : > { %v497_v21 = vmul.f32 %v869_v31, %v418_v19  ;;  %v513_v22 = vmul.f32 %v869_v31, %v458_v20  ;;  %v420_v23 = vpop.f32.mrb[9].mxu0  ;;  %v460_v24 = vpop.f32.mrb[9].mxu1 }
 0x10c   : > { %v498_v25 = vmul.f32 %v871_v32, %v420_v23  ;;  %v514_v26 = vmul.f32 %v871_v32, %v460_v24  ;;  %v422_v27 = vpop.f32.mrb[10].mxu0  ;;  %v462_v28 = vpop.f32.mrb[10].mxu1 }
 0x10d   : > { %v541_v29 = vadd.f32 %v874_v33, %v497_v21  ;;  %v557_v30 = vadd.f32 %v874_v33, %v513_v22  ;;  %v499_v34 = vmul.f32 %v869_v31, %v422_v27  ;;  %v515_v35 = vmul.f32 %v869_v31, %v462_v28  ;;  %v424_v37 = vpop.f32.mrb[11].mxu0  ;;  %v464_v38 = vpop.f32.mrb[11].mxu1 }
 0x10e   : > { %v542_v39 = vadd.f32 %v876_v36, %v498_v25  ;;  %v558_v40 = vadd.f32 %v876_v36, %v514_v26  ;;  %v500_v41 = vmul.f32 %v871_v32, %v424_v37  ;;  %v516_v42 = vmul.f32 %v871_v32, %v464_v38 }
 0x10f   : > { %573 = vst [vmem:[%s883_s11 + $0x40] sm:$0xff] %v541_v29  ;;  %589 = vst [vmem:[%s883_s11 + $0xc0] sm:$0xff] %v557_v30  ;;  %v543_v43 = vadd.f32 %v874_v33, %v499_v34  ;;  %v559_v44 = vadd.f32 %v874_v33, %v515_v35 }
 0x110   : > { %574 = vst [vmem:[%s883_s11 + $0x48] sm:$0xff] %v542_v39  ;;  %590 = vst [vmem:[%s883_s11 + $0xc8] sm:$0xff] %v558_v40  ;;  %v544_v45 = vadd.f32 %v876_v36, %v500_v41  ;;  %v560_v46 = vadd.f32 %v876_v36, %v516_v42 }
 0x111   : > { %575 = vst [vmem:[%s883_s11 + $0x50] sm:$0xff] %v543_v43  ;;  %591 = vst [vmem:[%s883_s11 + $0xd0] sm:$0xff] %v559_v44 }
 0x112   : > { %576 = vst [vmem:[%s883_s11 + $0x58] sm:$0xff] %v544_v45  ;;  %592 = vst [vmem:[%s883_s11 + $0xd8] sm:$0xff] %v560_v46  ;;  %v428_v47 = vpop.f32.mrb[12].mxu0  ;;  %v468_v48 = vpop.f32.mrb[12].mxu1 }
 0x113   : > { %v501_v49 = vmul.f32 %v869_v31, %v428_v47  ;;  %v517_v50 = vmul.f32 %v869_v31, %v468_v48  ;;  %v430_v51 = vpop.f32.mrb[13].mxu0  ;;  %v470_v52 = vpop.f32.mrb[13].mxu1 }
 0x114   : > { %v502_v53 = vmul.f32 %v871_v32, %v430_v51  ;;  %v518_v54 = vmul.f32 %v871_v32, %v470_v52  ;;  %v432_v55 = vpop.f32.mrb[14].mxu0  ;;  %v472_v56 = vpop.f32.mrb[14].mxu1 }
 0x115   : > { %v545_v57 = vadd.f32 %v874_v33, %v501_v49  ;;  %v561_v58 = vadd.f32 %v874_v33, %v517_v50  ;;  %v503_v59 = vmul.f32 %v869_v31, %v432_v55  ;;  %v519_v60 = vmul.f32 %v869_v31, %v472_v56  ;;  %v434_v61 = vpop.f32.mrb[15].mxu0  ;;  %v474_v62 = vpop.f32.mrb[15].mxu1 }
 0x116   : > { %v546_v63 = vadd.f32 %v876_v36, %v502_v53  ;;  %v562_v0 = vadd.f32 %v876_v36, %v518_v54  ;;  %v504_v1 = vmul.f32 %v871_v32, %v434_v61  ;;  %v520_v2 = vmul.f32 %v871_v32, %v474_v62 }
 0x117   : > { %577 = vst [vmem:[%s883_s11 + $0x60] sm:$0xff] %v545_v57  ;;  %593 = vst [vmem:[%s883_s11 + $0xe0] sm:$0xff] %v561_v58  ;;  %v547_v3 = vadd.f32 %v874_v33, %v503_v59  ;;  %v563_v4 = vadd.f32 %v874_v33, %v519_v60 }
 0x118   : > { %578 = vst [vmem:[%s883_s11 + $0x68] sm:$0xff] %v546_v63  ;;  %594 = vst [vmem:[%s883_s11 + $0xe8] sm:$0xff] %v562_v0  ;;  %v548_v31 = vadd.f32 %v876_v36, %v504_v1  ;;  %v564_v5 = vadd.f32 %v876_v36, %v520_v2 }
 0x119   : > { %579 = vst [vmem:[%s883_s11 + $0x70] sm:$0xff] %v547_v3  ;;  %595 = vst [vmem:[%s883_s11 + $0xf0] sm:$0xff] %v563_v4 }
 0x11a   : > { %580 = vst [vmem:[%s883_s11 + $0x78] sm:$0xff] %v548_v31  ;;  %596 = vst [vmem:[%s883_s11 + $0xf8] sm:$0xff] %v564_v5 }
 0x11b PF: > { %s14_s15 = sadd.s32 1, %s755_s15  }
 0x11c   : > { %p11_p4 = scmp.ge.s32.totalorder %s14_s15, 4  }
 0x11e   :  { %13 = sbr.rel (!%p11_p4) target bundleno = 1 (0x1), region = 66 }

// kernel: spatial_encoder_forward.21
= control target key start
LH: loop header
LB: loop body
LE: loop exit
PB: predicated region body
PF: predicated region fallthrough
CT: control target
= control target key end

     0   :  { %s695_s15 = smov 0   ;;  %s774_s0 = inlined_call_operand.vmem [shape: bf16[256,128], index: 0, kind: input, shape index: {}]   ;;  %s775_s1 = inlined_call_operand.vmem [shape: bf16[128,128], index: 1, kind: input, shape index: {}]   ;;  %s776_s2 = inlined_call_operand.vmem [shape: f32[1,128], index: 2, kind: input, shape index: {}]   ;;  %s777_s3 = inlined_call_operand.vmem [shape: f32[1,128], index: 3, kind: input, shape index: {}]   ;;  %s778_s4 = inlined_call_operand.vmem [shape: f32[256,128], index: 4, kind: output, shape index: {}]  }
   0x1 LB: > { %s545_s16 = sadd.s32 4294967295, %s668_s15   ;;  %p549_p0 = scmp.ge.s32.totalorder %s668_s15, 1  ;;  %s668_s15 = sphi %s695_s15, %s14_s15  }
   0x2   : > { %p163_p1 = scmp.lt.s32.totalorder %s668_s15, 3 }
   0x4   : > { %p164_p2 = pnand %p549_p0, %p163_p1 }
   0x5   : > { %v646_v0 = vld [vmem:[%s775_s1] sm:$0xff] (!%p164_p2)   ;;  %s550_s19 = sshll.u32 (!%p164_p2), %s545_s16, 4  ;;  %v647_v1 = vld [vmem:[%s775_s1 + $0x8] sm:$0xff] (!%p164_p2)   ;;  %v648_v2 = vld [vmem:[%s775_s1 + $0x10] sm:$0xff] (!%p164_p2)  }
   0x6   : > { %167 = sbr.rel (%p164_p2) target bundleno = 266 (0x10a), region = 36  ;;  %p190_p3 = scmp.lt.s32.totalorder (!%p164_p2), %s550_s19, 31  ;;  %590 = vmatprep.subr.bf16.mxu0 (!%p164_p2), %v646_v0  ;;  %622 = vmatprep.subr.bf16.mxu1 (!%p164_p2), %v646_v0  ;;  %v649_v3 = vld [vmem:[%s775_s1 + $0x18] sm:$0xff] (!%p164_p2)   ;;  %v650_v6 = vld [vmem:[%s775_s1 + $0x20] sm:$0xff] (!%p164_p2)   ;;  %v651_v7 = vld [vmem:[%s775_s1 + $0x28] sm:$0xff] (!%p164_p2)  }
   0x7   : > { %591 = vmatpush3.bf16.msra.mxu0 (!%p164_p2), %v646_v0  ;;  %630 = vmatpush3.bf16.msra.mxu1 (!%p164_p2), %v646_v0  ;;  %v652_v8 = vld [vmem:[%s775_s1 + $0x30] sm:$0xff] (!%p164_p2)   ;;  %v653_v9 = vld [vmem:[%s775_s1 + $0x38] sm:$0xff] (!%p164_p2)   ;;  %v570_v16 = vld [vmem:[%s776_s2] ss:$0 sm:$0xff] (!%p164_p2) }
   0x8   : > { %592 = vmatprep.subr.bf16.mxu0 (!%p164_p2), %v647_v1  ;;  %623 = vmatprep.subr.bf16.mxu1 (!%p164_p2), %v647_v1  ;;  %v571_v18 = vld [vmem:[%s777_s3] ss:$0 sm:$0xff] (!%p164_p2) }
   0xb   : > { %593 = vmatpush3.bf16.msra.mxu0 (!%p164_p2), %v647_v1  ;;  %631 = vmatpush3.bf16.msra.mxu1 (!%p164_p2), %v647_v1 }
   0xc   : > { %594 = vmatprep.subr.bf16.mxu0 (!%p164_p2), %v648_v2  ;;  %624 = vmatprep.subr.bf16.mxu1 (!%p164_p2), %v648_v2 }
   0xd   : > { %s780_s19 = smov (!%p190_p3, %s550_s19), 31 }
   0xe   : > { %s551_s24 = sshll.u32 %s780_s19, 2  ;;  %s553_s14 = sshll.u32 %s780_s19, 3 }
   0xf   : > { %s718_s27 = scalar_lea.vmem %s774_s0, %s551_s24  ;;  %595 = vmatpush3.bf16.msra.mxu0 %v648_v2  ;;  %632 = vmatpush3.bf16.msra.mxu1 %v648_v2  ;;  %s753_s21 = scalar_lea.vmem %s778_s4, %s553_s14 }
  0x10   : > { %v654_v4 = vld [vmem:[%s718_s27] sm:$0xff]   ;;  %596 = vmatprep.subr.bf16.mxu0 %v649_v3  ;;  %625 = vmatprep.subr.bf16.mxu1 %v649_v3  ;;  %v656_v10 = vld [vmem:[%s718_s27 + $0x8] sm:$0xff]   ;;  %v658_v12 = vld [vmem:[%s718_s27 + $0x10] sm:$0xff]  }
  0x11   : > { %v655_v5 = vld [vmem:[%s718_s27 + $0x20] sm:$0xff]   ;;  %606 = vmatprep.mubr.bf16.mxu0 %v654_v4  ;;  %v657_v11 = vld [vmem:[%s718_s27 + $0x28] sm:$0xff]   ;;  %v659_v13 = vld [vmem:[%s718_s27 + $0x30] sm:$0xff]  }
  0x12   : > { %614 = vmatprep.mubr.bf16.mxu1 %v655_v5  ;;  %v660_v14 = vld [vmem:[%s718_s27 + $0x18] sm:$0xff]  }
  0x13   : > { %597 = vmatpush3.bf16.msra.mxu0 %v649_v3  ;;  %633 = vmatpush3.bf16.msra.mxu1 %v649_v3  ;;  %v661_v15 = vld [vmem:[%s718_s27 + $0x38] sm:$0xff]  }
  0x14   : > { %598 = vmatprep.subr.bf16.mxu0 %v650_v6  ;;  %626 = vmatprep.subr.bf16.mxu1 %v650_v6 }
  0x17   : > { %599 = vmatpush3.bf16.msra.mxu0 %v650_v6  ;;  %634 = vmatpush3.bf16.msra.mxu1 %v650_v6 }
  0x18   : > { %600 = vmatprep.subr.bf16.mxu0 %v651_v7  ;;  %627 = vmatprep.subr.bf16.mxu1 %v651_v7 }
  0x1b   : > { %601 = vmatpush3.bf16.msra.mxu0 %v651_v7  ;;  %635 = vmatpush3.bf16.msra.mxu1 %v651_v7 }
  0x1c   : > { %602 = vmatprep.subr.bf16.mxu0 %v652_v8  ;;  %628 = vmatprep.subr.bf16.mxu1 %v652_v8 }
  0x1f   : > { %603 = vmatpush3.bf16.msra.mxu0 %v652_v8  ;;  %636 = vmatpush3.bf16.msra.mxu1 %v652_v8 }
  0x20   : > { %604 = vmatprep.subr.bf16.mxu0 %v653_v9  ;;  %629 = vmatprep.subr.bf16.mxu1 %v653_v9 }
  0x23   : > { %605 = vmatpush3.bf16.msra.mxu0 %v653_v9  ;;  %637 = vmatpush3.bf16.msra.mxu1 %v653_v9 }
  0x26   : > { %607 = vmatmul.mubr.bf16.vlgmr.msra.gmra.mrb[0].mxu0 %v656_v10  ;;  %615 = vmatmul.mubr.bf16.vlgmr.msra.gmra.mrb[0].mxu1 %v657_v11 }
  0x27   : > { %610 = vmatprep.mubr.bf16.mxu0 %v658_v12  ;;  %618 = vmatprep.mubr.bf16.mxu1 %v659_v13 }
  0x2e   : > { %611 = vmatmul.mubr.bf16.gmra.mrb[4].mxu0 %v660_v14  ;;  %619 = vmatmul.mubr.bf16.gmra.mrb[4].mxu1 %v661_v15 }
  0xf9   : > { %v608_v17 = vpop.f32.mrb[0].mxu0  ;;  %v616_v19 = vpop.f32.mrb[0].mxu1 }
  0xfa   : > { %v436_v20 = vmul.f32 %v608_v17, %v570_v16  ;;  %v444_v21 = vmul.f32 %v616_v19, %v570_v16  ;;  %v364_v22 = vpop.f32.mrb[1].mxu0  ;;  %v396_v23 = vpop.f32.mrb[1].mxu1 }
  0xfb   : > { %v434_v24 = vmul.f32 %v570_v16, %v364_v22  ;;  %v442_v25 = vmul.f32 %v570_v16, %v396_v23  ;;  %v609_v26 = vpop.f32.mrb[2].mxu0  ;;  %v617_v27 = vpop.f32.mrb[2].mxu1 }
  0xfc   : > { %v459_v28 = vadd.f32 %v571_v18, %v436_v20  ;;  %v467_v29 = vadd.f32 %v571_v18, %v444_v21  ;;  %v437_v30 = vmul.f32 %v609_v26, %v570_v16  ;;  %v445_v31 = vmul.f32 %v617_v27, %v570_v16  ;;  %v367_v32 = vpop.f32.mrb[3].mxu0  ;;  %v399_v33 = vpop.f32.mrb[3].mxu1 }
  0xfd   : > { %v457_v34 = vadd.f32 %v571_v18, %v434_v24  ;;  %v465_v35 = vadd.f32 %v571_v18, %v442_v25  ;;  %v435_v36 = vmul.f32 %v570_v16, %v367_v32  ;;  %v443_v37 = vmul.f32 %v570_v16, %v399_v33 }
  0xfe   : > { %475 = vst [vmem:[%s753_s21 + $0x10] sm:$0xff] %v459_v28  ;;  %483 = vst [vmem:[%s753_s21 + $0x50] sm:$0xff] %v467_v29  ;;  %v460_v38 = vadd.f32 %v571_v18, %v437_v30  ;;  %v468_v39 = vadd.f32 %v571_v18, %v445_v31 }
  0xff   : > { %473 = vst [vmem:[%s753_s21] sm:$0xff] %v457_v34  ;;  %481 = vst [vmem:[%s753_s21 + $0x40] sm:$0xff] %v465_v35  ;;  %v458_v40 = vadd.f32 %v571_v18, %v435_v36  ;;  %v466_v41 = vadd.f32 %v571_v18, %v443_v37 }
 0x100   : > { %476 = vst [vmem:[%s753_s21 + $0x18] sm:$0xff] %v460_v38  ;;  %484 = vst [vmem:[%s753_s21 + $0x58] sm:$0xff] %v468_v39 }
 0x101   : > { %474 = vst [vmem:[%s753_s21 + $0x8] sm:$0xff] %v458_v40  ;;  %482 = vst [vmem:[%s753_s21 + $0x48] sm:$0xff] %v466_v41  ;;  %v612_v42 = vpop.f32.mrb[4].mxu0  ;;  %v620_v43 = vpop.f32.mrb[4].mxu1 }
 0x102   : > { %v440_v44 = vmul.f32 %v612_v42, %v570_v16  ;;  %v448_v45 = vmul.f32 %v620_v43, %v570_v16  ;;  %v380_v46 = vpop.f32.mrb[5].mxu0  ;;  %v412_v47 = vpop.f32.mrb[5].mxu1 }
 0x103   : > { %v438_v48 = vmul.f32 %v570_v16, %v380_v46  ;;  %v446_v49 = vmul.f32 %v570_v16, %v412_v47  ;;  %v613_v50 = vpop.f32.mrb[6].mxu0  ;;  %v621_v51 = vpop.f32.mrb[6].mxu1 }
 0x104   : > { %v463_v52 = vadd.f32 %v571_v18, %v440_v44  ;;  %v471_v53 = vadd.f32 %v571_v18, %v448_v45  ;;  %v441_v54 = vmul.f32 %v613_v50, %v570_v16  ;;  %v449_v55 = vmul.f32 %v621_v51, %v570_v16  ;;  %v383_v56 = vpop.f32.mrb[7].mxu0  ;;  %v415_v57 = vpop.f32.mrb[7].mxu1 }
 0x105   : > { %v461_v58 = vadd.f32 %v571_v18, %v438_v48  ;;  %v469_v59 = vadd.f32 %v571_v18, %v446_v49  ;;  %v439_v60 = vmul.f32 %v570_v16, %v383_v56  ;;  %v447_v61 = vmul.f32 %v570_v16, %v415_v57 }
 0x106   : > { %479 = vst [vmem:[%s753_s21 + $0x30] sm:$0xff] %v463_v52  ;;  %487 = vst [vmem:[%s753_s21 + $0x70] sm:$0xff] %v471_v53  ;;  %v464_v62 = vadd.f32 %v571_v18, %v441_v54  ;;  %v472_v63 = vadd.f32 %v571_v18, %v449_v55 }
 0x107   : > { %477 = vst [vmem:[%s753_s21 + $0x20] sm:$0xff] %v461_v58  ;;  %485 = vst [vmem:[%s753_s21 + $0x60] sm:$0xff] %v469_v59  ;;  %v462_v0 = vadd.f32 %v571_v18, %v439_v60  ;;  %v470_v1 = vadd.f32 %v571_v18, %v447_v61 }
 0x108   : > { %480 = vst [vmem:[%s753_s21 + $0x38] sm:$0xff] %v464_v62  ;;  %488 = vst [vmem:[%s753_s21 + $0x78] sm:$0xff] %v472_v63 }
 0x109   : > { %478 = vst [vmem:[%s753_s21 + $0x28] sm:$0xff] %v462_v0  ;;  %486 = vst [vmem:[%s753_s21 + $0x68] sm:$0xff] %v470_v1 }
 0x10a PF: > { %s14_s15 = sadd.s32 1, %s668_s15  }
 0x10b   : > { %p11_p4 = scmp.ge.s32.totalorder %s14_s15, 4  }
 0x10d   :  { %13 = sbr.rel (!%p11_p4) target bundleno = 1 (0x1), region = 66 }

// kernel: spatial_encoder_forward.23
= control target key start
LH: loop header
LB: loop body
LE: loop exit
PB: predicated region body
PF: predicated region fallthrough
CT: control target
= control target key end

     0   :  { %9 = vsyncpa [#allocation3], 0  ;;  %s1590_s0 = inlined_call_operand.vmem [shape: bf16[512,256], index: 0, kind: input, shape index: {}]   ;;  %s1591_s1 = inlined_call_operand.vmem [shape: bf16[256,32], index: 1, kind: input, shape index: {}]   ;;  %s1592_s2 = inlined_call_operand.vmem [shape: f32[1,32], index: 2, kind: input, shape index: {}]   ;;  %s1593_s3 = inlined_call_operand.vmem [shape: f32[1,32], index: 3, kind: input, shape index: {}]   ;;  %s1594_s4 = inlined_call_operand.hbm [shape: f32[512,32], index: 4, kind: output, shape index: {}]  }
   0x1   :  { %11 = vsyncpa [#allocation3 + $0x1], 0  ;;  %s1261_s15 = smov 0   ;;  %s1263_s16 = smov 0  }
   0x2   :  { %s1265_s17 = smov 0   ;;  %s1267_s18 = smov 0  }
   0x3 LB: > { %s1282_s19 = sadd.s32 4294967295, %s1231_s18   ;;  %s871_s20 = sadd.s32 4294967294, %s1231_s18   ;;  %s1231_s18 = sphi %s1267_s18, %s1600_s18   ;;  %s1227_s17 = sphi %s1265_s17, %s1599_s17   ;;  %s1223_s16 = sphi %s1263_s16, %s1598_s16   ;;  %s1219_s15 = sphi %s1261_s15, %s1597_s15  }
   0x4   : > { %s1286_s21 = sadd.s32 1, %s1231_s18   ;;  %s113_s22 = sadd.s32 1, %s1227_s17 }
   0x5   : > { %s110_s23 = ssub.s32 %s1231_s18, %s1286_s21  ;;  %p123_p0 = scmp.ne.s32.totalorder %s1227_s17, %s1223_s16 }
   0x6   : > { %p111_p1 = scmp.eq.s32.totalorder %s110_s23, 0  ;;  %p124_p2 = scmp.eq.s32.totalorder %s1282_s19, 1 }
   0x7   : > { %p129_p3 = scmp.ne.s32.totalorder %s1223_s16, %s1219_s15  ;;  %p130_p4 = scmp.eq.s32.totalorder %s871_s20, 1 }
   0x8   : > { %s1297_s24 = scalar_select %p111_p1, %s1227_s17, %s113_s22  }
   0x9   : > { %p1299_p5 = por %p124_p2, %p123_p0  ;;  %p1303_p6 = por %p130_p4, %p129_p3 }
   0xa   : > { %p874_p7 = scmp.ge.s32.totalorder %s1231_s18, 1  ;;  %p167_p8 = scmp.lt.s32.totalorder %s1231_s18, 3 }
   0xc   : > { %p168_p9 = pnand %p874_p7, %p167_p8 }
   0xd   : > { %v1105_v0 = vld [vmem:[%s1591_s1 + $0x40] sm:$0xff] (!%p168_p9)   ;;  %s876_s29 = sshll.u32 (!%p168_p9), %s1282_s19, 5  ;;  %v1107_v2 = vld [vmem:[%s1591_s1 + $0x48] sm:$0xff] (!%p168_p9)   ;;  %v1109_v4 = vld [vmem:[%s1591_s1 + $0x50] sm:$0xff] (!%p168_p9)   ;;  %s191_s5 = sand.u32 (!%p168_p9), 1, %s1223_s16   ;;  %vm762_vm0 = vcmask (!%p168_p9), 261120  }
   0xe   : > { %171 = sbr.rel (%p168_p9) target bundleno = 338 (0x152), region = 36  ;;  %v1106_v1 = vld [vmem:[%s1591_s1] sm:$0xff] (!%p168_p9)   ;;  %936 = vmatprep.subr.bf16.mxu0 (!%p168_p9), %v1105_v0  ;;  %1048 = vmatprep.subr.bf16.mxu1 (!%p168_p9), %v1105_v0  ;;  %v1108_v3 = vld [vmem:[%s1591_s1 + $0x8] sm:$0xff] (!%p168_p9)   ;;  %p195_p10 = scmp.lt.s32.totalorder (!%p168_p9), %s876_s29, 63  ;;  %v1110_v5 = vld [vmem:[%s1591_s1 + $0x10] sm:$0xff] (!%p168_p9)  }
   0xf   : > { %937 = vmatpush3.bf16.msra.mxu0 (!%p168_p9), %v1106_v1  ;;  %1056 = vmatpush3.bf16.msra.mxu1 (!%p168_p9), %v1106_v1  ;;  %v1111_v6 = vld [vmem:[%s1591_s1 + $0x58] sm:$0xff] (!%p168_p9)   ;;  %v1113_v8 = vld [vmem:[%s1591_s1 + $0x60] sm:$0xff] (!%p168_p9)   ;;  %v1115_v10 = vld [vmem:[%s1591_s1 + $0x68] sm:$0xff] (!%p168_p9)   ;;  %s875_s9 = sshll.u32 (!%p168_p9), %s191_s5, 8  ;;  %s935_s11 = sshll.u32 (!%p168_p9), %s1282_s19, 12 }
  0x10   : > { %938 = vmatprep.subr.bf16.mxu0 (!%p168_p9), %v1107_v2  ;;  %1049 = vmatprep.subr.bf16.mxu1 (!%p168_p9), %v1107_v2  ;;  %v1112_v7 = vld [vmem:[%s1591_s1 + $0x18] sm:$0xff] (!%p168_p9)   ;;  %v1114_v9 = vld [vmem:[%s1591_s1 + $0x20] sm:$0xff] (!%p168_p9)   ;;  %v1116_v13 = vld [vmem:[%s1591_s1 + $0x28] sm:$0xff] (!%p168_p9)   ;;  %s1414_s10 = scalar_lea.vmem (!%p168_p9), [#allocation2], %s875_s9  ;;  %s1533_s20 = scalar_lea.hbm (!%p168_p9), %s1594_s4, %s935_s11 }
  0x11   : > { %v1117_v14 = vld [vmem:[%s1591_s1 + $0x70] sm:$0xff] (!%p168_p9)   ;;  %v1119_v16 = vld [vmem:[%s1591_s1 + $0x78] sm:$0xff] (!%p168_p9)   ;;  %v1399_v51 = vld [vmem:[%s1592_s2] ss:$0 sm:$0xff] (!%p168_p9)  ;;  %s809_s12 = sshll.u32 (!%p168_p9), %s1414_s10, 4  ;;  %s1549_s19 = scalar_lea.sflag (!%p168_p9), [#allocation3], %s191_s5  ;;  %s1535_s12 = int_to_ptr.vmem [resolvable:$true] %s809_s12 }
  0x12   : > { %v1118_v15 = vld [vmem:[%s1591_s1 + $0x30] sm:$0xff] (!%p168_p9)   ;;  %v1120_v17 = vld [vmem:[%s1591_s1 + $0x38] sm:$0xff] (!%p168_p9)   ;;  %v1406_v57 = vld [vmem:[%s1593_s3] ss:$0 sm:$0xff] (!%p168_p9)  ;;  %s1169_s22 = scalar_lea.vmem (!%p168_p9), %s1535_s12, 4096  ;;  %s1233_s23 = smov (!%p168_p9), [#allocation2]  }
  0x13   : > { %939 = vmatpush3.bf16.msra.mxu0 (!%p168_p9), %v1108_v3  ;;  %1057 = vmatpush3.bf16.msra.mxu1 (!%p168_p9), %v1108_v3  ;;  %p1170_p11 = scmp.ne.s32.totalorder (!%p168_p9), %s1535_s12, %s1169_s22 }
  0x14   : > { %940 = vmatprep.subr.bf16.mxu0 (!%p168_p9), %v1109_v4  ;;  %1050 = vmatprep.subr.bf16.mxu1 (!%p168_p9), %v1109_v4 }
  0x15   : > { %s1602_s29 = smov (!%p195_p10, %s876_s29), 63  ;;  %p1171_p12 = pnand %p1170_p11, %p1299_p5 }
  0x16   : > { %s934_s27 = sshll.u32 %s1602_s29, 3 }
  0x17   : > { %941 = vmatpush3.bf16.msra.mxu0 %v1110_v5  ;;  %1058 = vmatpush3.bf16.msra.mxu1 %v1110_v5  ;;  %s1340_s7 = scalar_lea.vmem %s1590_s0, %s934_s27  ;;  %p1172_p13 = pneg %p1171_p12 }
  0x18   : > { %942 = vmatprep.subr.bf16.mxu0 %v1111_v6  ;;  %1051 = vmatprep.subr.bf16.mxu1 %v1111_v6  ;;  %v1123_v11 = vld [vmem:[%s1340_s7 + $0x4] ss:$8 sps:$4 sm:$0xff]   ;;  %v1121_v18 = vld [vmem:[%s1340_s7] ss:$8 sps:$4 sm:$0xff]   ;;  %v1127_v20 = vld [vmem:[%s1340_s7 + $0x14] ss:$8 sps:$4 sm:$0xff]  }
  0x19   : > { %v1126_v12 = vld [vmem:[%s1340_s7 + $0x84] ss:$8 sps:$4 sm:$0xff]   ;;  %555 = vmatprep.mubr.bf16.mxu0 %v1123_v11  ;;  %v1124_v19 = vld [vmem:[%s1340_s7 + $0x80] ss:$8 sps:$4 sm:$0xff]   ;;  %v1129_v21 = vld [vmem:[%s1340_s7 + $0x94] ss:$8 sps:$4 sm:$0xff]  }
  0x1a   : > { %619 = vmatprep.mubr.bf16.mxu1 %v1126_v12  ;;  %v1131_v22 = vld [vmem:[%s1340_s7 + $0x10] ss:$8 sps:$4 sm:$0xff]   ;;  %v1133_v24 = vld [vmem:[%s1340_s7 + $0x24] ss:$8 sps:$4 sm:$0xff]   ;;  %v1137_v26 = vld [vmem:[%s1340_s7 + $0x20] ss:$8 sps:$4 sm:$0xff]  }
  0x1b   : > { %943 = vmatpush3.bf16.msra.mxu0 %v1112_v7  ;;  %1059 = vmatpush3.bf16.msra.mxu1 %v1112_v7  ;;  %v1132_v23 = vld [vmem:[%s1340_s7 + $0x90] ss:$8 sps:$4 sm:$0xff]   ;;  %v1135_v25 = vld [vmem:[%s1340_s7 + $0xa4] ss:$8 sps:$4 sm:$0xff]   ;;  %v1138_v27 = vld [vmem:[%s1340_s7 + $0xa0] ss:$8 sps:$4 sm:$0xff]  }
  0x1c   : > { %944 = vmatprep.subr.bf16.mxu0 %v1113_v8  ;;  %1052 = vmatprep.subr.bf16.mxu1 %v1113_v8  ;;  %v1139_v28 = vld [vmem:[%s1340_s7 + $0x34] ss:$8 sps:$4 sm:$0xff]   ;;  %v1143_v30 = vld [vmem:[%s1340_s7 + $0x30] ss:$8 sps:$4 sm:$0xff]   ;;  %v1145_v32 = vld [vmem:[%s1340_s7 + $0x44] ss:$8 sps:$4 sm:$0xff]  }
  0x1d   : > { %v1141_v29 = vld [vmem:[%s1340_s7 + $0xb4] ss:$8 sps:$4 sm:$0xff]   ;;  %v1144_v31 = vld [vmem:[%s1340_s7 + $0xb0] ss:$8 sps:$4 sm:$0xff]   ;;  %v1147_v33 = vld [vmem:[%s1340_s7 + $0xc4] ss:$8 sps:$4 sm:$0xff]  }
  0x1e   : > { %v1149_v34 = vld [vmem:[%s1340_s7 + $0x40] ss:$8 sps:$4 sm:$0xff]   ;;  %v1151_v36 = vld [vmem:[%s1340_s7 + $0x54] ss:$8 sps:$4 sm:$0xff]   ;;  %v1155_v38 = vld [vmem:[%s1340_s7 + $0x50] ss:$8 sps:$4 sm:$0xff]  }
  0x1f   : > { %945 = vmatpush3.bf16.msra.mxu0 %v1114_v9  ;;  %1060 = vmatpush3.bf16.msra.mxu1 %v1114_v9  ;;  %v1150_v35 = vld [vmem:[%s1340_s7 + $0xc0] ss:$8 sps:$4 sm:$0xff]   ;;  %v1153_v37 = vld [vmem:[%s1340_s7 + $0xd4] ss:$8 sps:$4 sm:$0xff]   ;;  %v1156_v39 = vld [vmem:[%s1340_s7 + $0xd0] ss:$8 sps:$4 sm:$0xff]  }
  0x20   : > { %946 = vmatprep.subr.bf16.mxu0 %v1115_v10  ;;  %1053 = vmatprep.subr.bf16.mxu1 %v1115_v10  ;;  %v1157_v40 = vld [vmem:[%s1340_s7 + $0x64] ss:$8 sps:$4 sm:$0xff]   ;;  %v1161_v42 = vld [vmem:[%s1340_s7 + $0x60] ss:$8 sps:$4 sm:$0xff]   ;;  %v1163_v44 = vld [vmem:[%s1340_s7 + $0x74] ss:$8 sps:$4 sm:$0xff]  }
  0x21   : > { %v1159_v41 = vld [vmem:[%s1340_s7 + $0xe4] ss:$8 sps:$4 sm:$0xff]   ;;  %v1162_v43 = vld [vmem:[%s1340_s7 + $0xe0] ss:$8 sps:$4 sm:$0xff]   ;;  %v1165_v45 = vld [vmem:[%s1340_s7 + $0xf4] ss:$8 sps:$4 sm:$0xff]  }
  0x22   : > { %v1167_v46 = vld [vmem:[%s1340_s7 + $0x70] ss:$8 sps:$4 sm:$0xff]   ;;  %s1173_s27 = sshll.u32 %s1233_s23, 4  ;;  %s1174_s27 = int_to_ptr.vmem [resolvable:$false] %s1173_s27 }
  0x23   : > { %947 = vmatpush3.bf16.msra.mxu0 %v1116_v13  ;;  %1061 = vmatpush3.bf16.msra.mxu1 %v1116_v13  ;;  %v1168_v47 = vld [vmem:[%s1340_s7 + $0xf0] ss:$8 sps:$4 sm:$0xff]   ;;  %s1175_s28 = scalar_lea.vmem %s1174_s27, 8192  ;;  %p1176_p0 = scmp.lt.s32.totalorder %s1535_s12, %s1174_s27 }
  0x24   : > { %948 = vmatprep.subr.bf16.mxu0 %v1117_v14  ;;  %1054 = vmatprep.subr.bf16.mxu1 %v1117_v14  ;;  %p1177_p1 = scmp.lt.s32.totalorder %s1175_s28, %s1169_s22 }
  0x26   : > { %p1178_p2 = por %p1177_p1, %p1176_p0 }
  0x27   : > { %949 = vmatpush3.bf16.msra.mxu0 %v1118_v15  ;;  %1062 = vmatpush3.bf16.msra.mxu1 %v1118_v15 }
  0x28   : > { %950 = vmatprep.subr.bf16.mxu0 %v1119_v16  ;;  %1055 = vmatprep.subr.bf16.mxu1 %v1119_v16  ;;  %p1179_p3 = pnand %p1178_p2, %p1172_p13 }
  0x2b   : > { %951 = vmatpush3.bf16.msra.mxu0 %v1120_v17  ;;  %1063 = vmatpush3.bf16.msra.mxu1 %v1120_v17 }
  0x2e   : > { %556 = vmatmul.mubr.bf16.vlgmr.msra.gmra.mrb[0].mxu0 %v1121_v18  ;;  %620 = vmatmul.mubr.bf16.vlgmr.msra.gmra.mrb[0].mxu1 %v1124_v19 }
  0x2f   : > { %563 = vmatprep.mubr.bf16.mxu0 %v1127_v20  ;;  %627 = vmatprep.mubr.bf16.mxu1 %v1129_v21 }
  0x36   : > { %564 = vmatmul.mubr.bf16.gmra.mrb[4].mxu0 %v1131_v22  ;;  %628 = vmatmul.mubr.bf16.gmra.mrb[4].mxu1 %v1132_v23 }
  0x37   : > { %571 = vmatprep.mubr.bf16.mxu0 %v1133_v24  ;;  %635 = vmatprep.mubr.bf16.mxu1 %v1135_v25 }
  0x3e   : > { %572 = vmatmul.mubr.bf16.gmra.mrb[8].mxu0 %v1137_v26  ;;  %636 = vmatmul.mubr.bf16.gmra.mrb[8].mxu1 %v1138_v27 }
  0x3f   : > { %579 = vmatprep.mubr.bf16.mxu0 %v1139_v28  ;;  %643 = vmatprep.mubr.bf16.mxu1 %v1141_v29 }
  0x46   : > { %580 = vmatmul.mubr.bf16.gmra.mrb[12].mxu0 %v1143_v30  ;;  %644 = vmatmul.mubr.bf16.gmra.mrb[12].mxu1 %v1144_v31 }
  0x47   : > { %587 = vmatprep.mubr.bf16.mxu0 %v1145_v32  ;;  %651 = vmatprep.mubr.bf16.mxu1 %v1147_v33 }
  0x4e   : > { %588 = vmatmul.mubr.bf16.gmra.mrb[16].mxu0 %v1149_v34  ;;  %652 = vmatmul.mubr.bf16.gmra.mrb[16].mxu1 %v1150_v35 }
  0x4f   : > { %595 = vmatprep.mubr.bf16.mxu0 %v1151_v36  ;;  %659 = vmatprep.mubr.bf16.mxu1 %v1153_v37 }
  0x56   : > { %596 = vmatmul.mubr.bf16.gmra.mrb[20].mxu0 %v1155_v38  ;;  %660 = vmatmul.mubr.bf16.gmra.mrb[20].mxu1 %v1156_v39 }
  0x57   : > { %603 = vmatprep.mubr.bf16.mxu0 %v1157_v40  ;;  %667 = vmatprep.mubr.bf16.mxu1 %v1159_v41 }
  0x5e   : > { %604 = vmatmul.mubr.bf16.gmra.mrb[24].mxu0 %v1161_v42  ;;  %668 = vmatmul.mubr.bf16.gmra.mrb[24].mxu1 %v1162_v43 }
  0x5f   : > { %611 = vmatprep.mubr.bf16.mxu0 %v1163_v44  ;;  %675 = vmatprep.mubr.bf16.mxu1 %v1165_v45 }
  0x66   : > { %612 = vmatmul.mubr.bf16.gmra.mrb[28].mxu0 %v1167_v46  ;;  %676 = vmatmul.mubr.bf16.gmra.mrb[28].mxu1 %v1168_v47 }
 0x101   : > { %v952_v48 = vpop.f32.mrb[0].mxu0  ;;  %v1000_v49 = vpop.f32.mrb[0].mxu1 }
 0x102   : > { %v953_v50 = vpop.f32.mrb[1].mxu0  ;;  %v1001_v52 = vpop.f32.mrb[1].mxu1 }
 0x103   : > { %v954_v53 = vadd.f32 %v953_v50, %v952_v48  ;;  %v1002_v54 = vadd.f32 %v1001_v52, %v1000_v49  ;;  %v955_v55 = vpop.f32.mrb[2].mxu0  ;;  %v1003_v56 = vpop.f32.mrb[2].mxu1 }
 0x104   : > { %v956_v58 = vpop.f32.mrb[3].mxu0  ;;  %v1004_v59 = vpop.f32.mrb[3].mxu1 }
 0x105   : > { %v691_v60 = vmul.f32 %v954_v53, %v1399_v51  ;;  %v707_v61 = vmul.f32 %v1002_v54, %v1399_v51  ;;  %v957_v62 = vadd.f32 %v956_v58, %v955_v55  ;;  %v1005_v63 = vadd.f32 %v1004_v59, %v1003_v56 }
 0x107   : > { %v730_v0 = vadd.f32 %v1406_v57, %v691_v60  ;;  %v746_v1 = vadd.f32 %v1406_v57, %v707_v61  ;;  %v692_v2 = vmul.f32 %v957_v62, %v1399_v51  ;;  %v708_v3 = vmul.f32 %v1005_v63, %v1399_v51 }
 0x109   : > { %763 = vst.msk [vmem:[%s1414_s10] sm:$0xff] %vm762_vm0, %v730_v0  ;;  %779 = vst.msk [vmem:[%s1414_s10 + $0x80] sm:$0xff] %vm762_vm0, %v746_v1  ;;  %v731_v4 = vadd.f32 %v1406_v57, %v692_v2  ;;  %v747_v5 = vadd.f32 %v1406_v57, %v708_v3  ;;  %v958_v6 = vpop.f32.mrb[4].mxu0  ;;  %v1006_v7 = vpop.f32.mrb[4].mxu1 }
 0x10a   : > { %v959_v8 = vpop.f32.mrb[5].mxu0  ;;  %v1007_v9 = vpop.f32.mrb[5].mxu1 }
 0x10b   : > { %764 = vst.msk [vmem:[%s1414_s10 + $0x8] sm:$0xff] %vm762_vm0, %v731_v4  ;;  %780 = vst.msk [vmem:[%s1414_s10 + $0x88] sm:$0xff] %vm762_vm0, %v747_v5  ;;  %v960_v10 = vadd.f32 %v959_v8, %v958_v6  ;;  %v1008_v11 = vadd.f32 %v1007_v9, %v1006_v7  ;;  %v961_v12 = vpop.f32.mrb[6].mxu0  ;;  %v1009_v13 = vpop.f32.mrb[6].mxu1 }
 0x10c   : > { %v962_v14 = vpop.f32.mrb[7].mxu0  ;;  %v1010_v15 = vpop.f32.mrb[7].mxu1 }
 0x10d   : > { %v693_v16 = vmul.f32 %v960_v10, %v1399_v51  ;;  %v709_v17 = vmul.f32 %v1008_v11, %v1399_v51  ;;  %v963_v18 = vadd.f32 %v962_v14, %v961_v12  ;;  %v1011_v19 = vadd.f32 %v1010_v15, %v1009_v13 }
 0x10f   : > { %v732_v20 = vadd.f32 %v1406_v57, %v693_v16  ;;  %v748_v21 = vadd.f32 %v1406_v57, %v709_v17  ;;  %v694_v22 = vmul.f32 %v963_v18, %v1399_v51  ;;  %v710_v23 = vmul.f32 %v1011_v19, %v1399_v51 }
 0x111   : > { %765 = vst.msk [vmem:[%s1414_s10 + $0x10] sm:$0xff] %vm762_vm0, %v732_v20  ;;  %781 = vst.msk [vmem:[%s1414_s10 + $0x90] sm:$0xff] %vm762_vm0, %v748_v21  ;;  %v733_v24 = vadd.f32 %v1406_v57, %v694_v22  ;;  %v749_v25 = vadd.f32 %v1406_v57, %v710_v23  ;;  %v964_v26 = vpop.f32.mrb[8].mxu0  ;;  %v1012_v27 = vpop.f32.mrb[8].mxu1 }
 0x112   : > { %v965_v28 = vpop.f32.mrb[9].mxu0  ;;  %v1013_v29 = vpop.f32.mrb[9].mxu1 }
 0x113   : > { %766 = vst.msk [vmem:[%s1414_s10 + $0x18] sm:$0xff] %vm762_vm0, %v733_v24  ;;  %782 = vst.msk [vmem:[%s1414_s10 + $0x98] sm:$0xff] %vm762_vm0, %v749_v25  ;;  %v966_v30 = vadd.f32 %v965_v28, %v964_v26  ;;  %v1014_v31 = vadd.f32 %v1013_v29, %v1012_v27  ;;  %v967_v32 = vpop.f32.mrb[10].mxu0  ;;  %v1015_v33 = vpop.f32.mrb[10].mxu1 }
 0x114   : > { %v968_v34 = vpop.f32.mrb[11].mxu0  ;;  %v1016_v35 = vpop.f32.mrb[11].mxu1 }
 0x115   : > { %v695_v36 = vmul.f32 %v966_v30, %v1399_v51  ;;  %v711_v37 = vmul.f32 %v1014_v31, %v1399_v51  ;;  %v969_v38 = vadd.f32 %v968_v34, %v967_v32  ;;  %v1017_v39 = vadd.f32 %v1016_v35, %v1015_v33 }
 0x117   : > { %v734_v40 = vadd.f32 %v1406_v57, %v695_v36  ;;  %v750_v41 = vadd.f32 %v1406_v57, %v711_v37  ;;  %v696_v42 = vmul.f32 %v969_v38, %v1399_v51  ;;  %v712_v43 = vmul.f32 %v1017_v39, %v1399_v51 }
 0x119   : > { %767 = vst.msk [vmem:[%s1414_s10 + $0x20] sm:$0xff] %vm762_vm0, %v734_v40  ;;  %783 = vst.msk [vmem:[%s1414_s10 + $0xa0] sm:$0xff] %vm762_vm0, %v750_v41  ;;  %v735_v44 = vadd.f32 %v1406_v57, %v696_v42  ;;  %v751_v45 = vadd.f32 %v1406_v57, %v712_v43  ;;  %v970_v46 = vpop.f32.mrb[12].mxu0  ;;  %v1018_v47 = vpop.f32.mrb[12].mxu1 }
 0x11a   : > { %v971_v48 = vpop.f32.mrb[13].mxu0  ;;  %v1019_v49 = vpop.f32.mrb[13].mxu1 }
 0x11b   : > { %768 = vst.msk [vmem:[%s1414_s10 + $0x28] sm:$0xff] %vm762_vm0, %v735_v44  ;;  %784 = vst.msk [vmem:[%s1414_s10 + $0xa8] sm:$0xff] %vm762_vm0, %v751_v45  ;;  %v972_v50 = vadd.f32 %v971_v48, %v970_v46  ;;  %v1020_v52 = vadd.f32 %v1019_v49, %v1018_v47  ;;  %v973_v53 = vpop.f32.mrb[14].mxu0  ;;  %v1021_v54 = vpop.f32.mrb[14].mxu1 }
 0x11c   : > { %v974_v55 = vpop.f32.mrb[15].mxu0  ;;  %v1022_v56 = vpop.f32.mrb[15].mxu1 }
 0x11d   : > { %v697_v58 = vmul.f32 %v972_v50, %v1399_v51  ;;  %v713_v59 = vmul.f32 %v1020_v52, %v1399_v51  ;;  %v975_v60 = vadd.f32 %v974_v55, %v973_v53  ;;  %v1023_v61 = vadd.f32 %v1022_v56, %v1021_v54 }
 0x11f   : > { %v736_v62 = vadd.f32 %v1406_v57, %v697_v58  ;;  %v752_v63 = vadd.f32 %v1406_v57, %v713_v59  ;;  %v698_v0 = vmul.f32 %v975_v60, %v1399_v51  ;;  %v714_v1 = vmul.f32 %v1023_v61, %v1399_v51 }
 0x121   : > { %769 = vst.msk [vmem:[%s1414_s10 + $0x30] sm:$0xff] %vm762_vm0, %v736_v62  ;;  %785 = vst.msk [vmem:[%s1414_s10 + $0xb0] sm:$0xff] %vm762_vm0, %v752_v63  ;;  %v737_v2 = vadd.f32 %v1406_v57, %v698_v0  ;;  %v753_v3 = vadd.f32 %v1406_v57, %v714_v1  ;;  %v976_v4 = vpop.f32.mrb[16].mxu0  ;;  %v1024_v5 = vpop.f32.mrb[16].mxu1 }
 0x122   : > { %v977_v6 = vpop.f32.mrb[17].mxu0  ;;  %v1025_v7 = vpop.f32.mrb[17].mxu1 }
 0x123   : > { %770 = vst.msk [vmem:[%s1414_s10 + $0x38] sm:$0xff] %vm762_vm0, %v737_v2  ;;  %786 = vst.msk [vmem:[%s1414_s10 + $0xb8] sm:$0xff] %vm762_vm0, %v753_v3  ;;  %v978_v8 = vadd.f32 %v977_v6, %v976_v4  ;;  %v1026_v9 = vadd.f32 %v1025_v7, %v1024_v5  ;;  %v979_v10 = vpop.f32.mrb[18].mxu0  ;;  %v1027_v11 = vpop.f32.mrb[18].mxu1 }
 0x124   : > { %v980_v12 = vpop.f32.mrb[19].mxu0  ;;  %v1028_v13 = vpop.f32.mrb[19].mxu1 }
 0x125   : > { %v699_v14 = vmul.f32 %v978_v8, %v1399_v51  ;;  %v715_v15 = vmul.f32 %v1026_v9, %v1399_v51  ;;  %v981_v16 = vadd.f32 %v980_v12, %v979_v10  ;;  %v1029_v17 = vadd.f32 %v1028_v13, %v1027_v11 }
 0x127   : > { %v738_v18 = vadd.f32 %v1406_v57, %v699_v14  ;;  %v754_v19 = vadd.f32 %v1406_v57, %v715_v15  ;;  %v700_v20 = vmul.f32 %v981_v16, %v1399_v51  ;;  %v716_v21 = vmul.f32 %v1029_v17, %v1399_v51 }
 0x129   : > { %771 = vst.msk [vmem:[%s1414_s10 + $0x40] sm:$0xff] %vm762_vm0, %v738_v18  ;;  %787 = vst.msk [vmem:[%s1414_s10 + $0xc0] sm:$0xff] %vm762_vm0, %v754_v19  ;;  %v739_v22 = vadd.f32 %v1406_v57, %v700_v20  ;;  %v755_v23 = vadd.f32 %v1406_v57, %v716_v21  ;;  %v982_v24 = vpop.f32.mrb[20].mxu0  ;;  %v1030_v25 = vpop.f32.mrb[20].mxu1 }
 0x12a   : > { %v983_v26 = vpop.f32.mrb[21].mxu0  ;;  %v1031_v27 = vpop.f32.mrb[21].mxu1 }
 0x12b   : > { %772 = vst.msk [vmem:[%s1414_s10 + $0x48] sm:$0xff] %vm762_vm0, %v739_v22  ;;  %788 = vst.msk [vmem:[%s1414_s10 + $0xc8] sm:$0xff] %vm762_vm0, %v755_v23  ;;  %v984_v28 = vadd.f32 %v983_v26, %v982_v24  ;;  %v1032_v29 = vadd.f32 %v1031_v27, %v1030_v25  ;;  %v985_v30 = vpop.f32.mrb[22].mxu0  ;;  %v1033_v31 = vpop.f32.mrb[22].mxu1 }
 0x12c   : > { %v986_v32 = vpop.f32.mrb[23].mxu0  ;;  %v1034_v33 = vpop.f32.mrb[23].mxu1 }
 0x12d   : > { %v701_v34 = vmul.f32 %v984_v28, %v1399_v51  ;;  %v717_v35 = vmul.f32 %v1032_v29, %v1399_v51  ;;  %v987_v36 = vadd.f32 %v986_v32, %v985_v30  ;;  %v1035_v37 = vadd.f32 %v1034_v33, %v1033_v31 }
 0x12f   : > { %v740_v38 = vadd.f32 %v1406_v57, %v701_v34  ;;  %v756_v39 = vadd.f32 %v1406_v57, %v717_v35  ;;  %v702_v40 = vmul.f32 %v987_v36, %v1399_v51  ;;  %v718_v41 = vmul.f32 %v1035_v37, %v1399_v51 }
 0x131   : > { %773 = vst.msk [vmem:[%s1414_s10 + $0x50] sm:$0xff] %vm762_vm0, %v740_v38  ;;  %789 = vst.msk [vmem:[%s1414_s10 + $0xd0] sm:$0xff] %vm762_vm0, %v756_v39  ;;  %v741_v42 = vadd.f32 %v1406_v57, %v702_v40  ;;  %v757_v43 = vadd.f32 %v1406_v57, %v718_v41  ;;  %v988_v44 = vpop.f32.mrb[24].mxu0  ;;  %v1036_v45 = vpop.f32.mrb[24].mxu1 }
 0x132   : > { %v989_v46 = vpop.f32.mrb[25].mxu0  ;;  %v1037_v47 = vpop.f32.mrb[25].mxu1 }
 0x133   : > { %774 = vst.msk [vmem:[%s1414_s10 + $0x58] sm:$0xff] %vm762_vm0, %v741_v42  ;;  %790 = vst.msk [vmem:[%s1414_s10 + $0xd8] sm:$0xff] %vm762_vm0, %v757_v43  ;;  %v990_v48 = vadd.f32 %v989_v46, %v988_v44  ;;  %v1038_v49 = vadd.f32 %v1037_v47, %v1036_v45  ;;  %v991_v50 = vpop.f32.mrb[26].mxu0  ;;  %v1039_v52 = vpop.f32.mrb[26].mxu1 }
 0x134   : > { %v992_v53 = vpop.f32.mrb[27].mxu0  ;;  %v1040_v54 = vpop.f32.mrb[27].mxu1 }
 0x135   : > { %v703_v55 = vmul.f32 %v990_v48, %v1399_v51  ;;  %v719_v56 = vmul.f32 %v1038_v49, %v1399_v51  ;;  %v993_v58 = vadd.f32 %v992_v53, %v991_v50  ;;  %v1041_v59 = vadd.f32 %v1040_v54, %v1039_v52 }
 0x137   : > { %v742_v60 = vadd.f32 %v1406_v57, %v703_v55  ;;  %v758_v61 = vadd.f32 %v1406_v57, %v719_v56  ;;  %v704_v62 = vmul.f32 %v993_v58, %v1399_v51  ;;  %v720_v63 = vmul.f32 %v1041_v59, %v1399_v51 }
 0x139   : > { %775 = vst.msk [vmem:[%s1414_s10 + $0x60] sm:$0xff] %vm762_vm0, %v742_v60  ;;  %791 = vst.msk [vmem:[%s1414_s10 + $0xe0] sm:$0xff] %vm762_vm0, %v758_v61  ;;  %v743_v0 = vadd.f32 %v1406_v57, %v704_v62  ;;  %v759_v1 = vadd.f32 %v1406_v57, %v720_v63  ;;  %v994_v2 = vpop.f32.mrb[28].mxu0  ;;  %v1042_v3 = vpop.f32.mrb[28].mxu1 }
 0x13a   : > { %v995_v4 = vpop.f32.mrb[29].mxu0  ;;  %v1043_v5 = vpop.f32.mrb[29].mxu1 }
 0x13b   : > { %776 = vst.msk [vmem:[%s1414_s10 + $0x68] sm:$0xff] %vm762_vm0, %v743_v0  ;;  %792 = vst.msk [vmem:[%s1414_s10 + $0xe8] sm:$0xff] %vm762_vm0, %v759_v1  ;;  %v996_v6 = vadd.f32 %v995_v4, %v994_v2  ;;  %v1044_v7 = vadd.f32 %v1043_v5, %v1042_v3  ;;  %v997_v8 = vpop.f32.mrb[30].mxu0  ;;  %v1045_v9 = vpop.f32.mrb[30].mxu1 }
 0x13c   : > { %v998_v10 = vpop.f32.mrb[31].mxu0  ;;  %v1046_v11 = vpop.f32.mrb[31].mxu1 }
 0x13d   : > { %v705_v12 = vmul.f32 %v996_v6, %v1399_v51  ;;  %v721_v13 = vmul.f32 %v1044_v7, %v1399_v51  ;;  %v999_v14 = vadd.f32 %v998_v10, %v997_v8  ;;  %v1047_v15 = vadd.f32 %v1046_v11, %v1045_v9 }
 0x13f   : > { %v744_v16 = vadd.f32 %v1406_v57, %v705_v12  ;;  %v760_v17 = vadd.f32 %v1406_v57, %v721_v13  ;;  %v706_v18 = vmul.f32 %v999_v14, %v1399_v51  ;;  %v722_v19 = vmul.f32 %v1047_v15, %v1399_v51 }
 0x141   : > { %777 = vst.msk [vmem:[%s1414_s10 + $0x70] sm:$0xff] %vm762_vm0, %v744_v16  ;;  %793 = vst.msk [vmem:[%s1414_s10 + $0xf0] sm:$0xff] %vm762_vm0, %v760_v17  ;;  %v745_v20 = vadd.f32 %v1406_v57, %v706_v18  ;;  %v761_v21 = vadd.f32 %v1406_v57, %v722_v19 }
 0x143   : > { %778 = vst.msk [vmem:[%s1414_s10 + $0x78] sm:$0xff] %vm762_vm0, %v745_v20  ;;  %794 = vst.msk [vmem:[%s1414_s10 + $0xf8] sm:$0xff] %vm762_vm0, %v761_v21 }
 0x144   : > { %1182 = shalt.err (!%p1179_p3)
}
 0x145   : > { %s1183_s30 = scalar_lea.hbm %s1533_s20, 4096  ;;  %s1187_s8 = scalar_lea.hbm %s1594_s4, 8192 }
 0x146   : > { %p1184_p4 = scmp.ne.s32.totalorder %s1533_s20, %s1183_s30  ;;  %p1188_p9 = scmp.lt.u32.totalorder %s1533_s20, %s1594_s4 }
 0x147   : > { %p1189_p10 = scmp.lt.u32.totalorder %s1187_s8, %s1183_s30  ;;  %p1191_p12 = scmp.lt.u32.totalorder %s1183_s30, %s1533_s20 }
 0x148   : > { %p1185_p7 = pnand %p1184_p4, %p1299_p5 }
 0x149   : > { %p1190_p11 = por %p1189_p10, %p1188_p9 }
 0x14a   : > { %p1186_p8 = pneg %p1185_p7 }
 0x14b   : > { %p1192_p13 = por %p1191_p12, %p1190_p11 }
 0x14d   : > { %p1193_p0 = pnand %p1192_p13, %p1186_p8 }
 0x14f   : > { %1196 = shalt.err (!%p1193_p0)
}
 0x150   : > { %s1234_s7 = smov 128   ;;  %s1235_s10 = smov 8  }
 0x151   : > { %1064 = dma.vmem_to_hbm [thread:$0]  (%p1299_p5), %s1535_s12, 4096, %s1533_s20, %s1549_s19, %s1234_s7, %s1234_s7, %s1235_s10  }
 0x152 PF: > { %p1070_p1 = scmp.ge.s32.totalorder %s1231_s18, 2  ;;  %s824_s11 = sand.u32 1, %s1219_s15  }
 0x153   : > { %s825_s13 = scalar_lea.sflag [#allocation3], %s824_s11 }
 0x154   : > { %p1067_p2 = pnand %p1070_p1, %p1303_p6 }
 0x156   : > { %1214 = dma.done.wait (!%p1067_p2), %s825_s13, 4096  }
 0x157   : > { %1216 = vsyncadd (!%p1067_p2), %s825_s13, 4294963200  ;;  %p14_p3 = scmp.ge.s32.totalorder %s1286_s21, 4   ;;  %s1597_s15 = smov %s1223_s16 }
 0x158   : > { %s1598_s16 = smov %s1227_s17  ;;  %s1599_s17 = smov %s1297_s24 }
 0x159   : > { %s1600_s18 = smov %s1286_s21  ;;  %16 = sbr.rel (!%p14_p3) target bundleno = 3 (0x3), region = 71 }
 0x160   :  { %830 = vsyncpa [#allocation3], 1 }
 0x161   :  { %832 = vsyncpa [#allocation3 + $0x1], 1 }

</bundles_post_ra>
